<compile_context>
chip_gen: v7x
topology: tpu7x:2x2x1
jax: 0.10.0
libtpu: 0.0.40
codegen_flags: <defaults>
</compile_context>

<pallas_src>
import jax
import jax.numpy as jnp
from jax import lax
from jax.experimental import pallas as pl
from jax.experimental.pallas import tpu as pltpu


def _round_up(n, m):
    return (n + m - 1) // m * m


# ----------------------------- kernel bodies -------------------------------

def _lstm_body(x_ref, wih_ref, whh_ref, b_ref, pick_ref,
               xw_scr, h_scr, c_scr, last_scr):
    """Run the LSTM over this N-tile.  Leaves the hidden state at timestep
    pick_ref[n] of each row n in `last_scr` (f32)."""
    T, N, D = x_ref.shape
    H = whh_ref.shape[0]
    cdt = whh_ref.dtype                       # MXU operand dtype (bf16)

    # --- preamble: input projection for all timesteps in one matmul --------
    # (T, N, D) -> (T*N, D); n_tile is sublane-aligned so this is a no-op
    # relayout.  Bias is folded in here, off the serial critical path.
    x_all = x_ref[...].reshape(T * N, D)
    xw = jnp.dot(x_all, wih_ref[...], preferred_element_type=jnp.float32)
    xw_scr[...] = (xw + b_ref[...]).reshape(T, N, 4 * H)

    h_scr[...] = jnp.zeros_like(h_scr)
    c_scr[...] = jnp.zeros_like(c_scr)
    last_scr[...] = jnp.zeros_like(last_scr)

    pick = pick_ref[...]                                      # (N, 1) int32
    # loop-invariant lane mask: lanes [2H, 3H) (gate g) -> tanh, rest sigmoid
    lane = lax.broadcasted_iota(jnp.int32, (N, 4 * H), 1)
    g_lane = (lane >= 2 * H) & (lane < 3 * H)

    def step(t, carry):
        gates = xw_scr[t] + jnp.dot(h_scr[...].astype(cdt), whh_ref[...],
                                    preferred_element_type=jnp.float32)
        # one tanh over the full (N, 4H) width:
        #   g lanes     : tanh(z)
        #   i/f/o lanes : sigmoid(z) = 0.5 * (1 + tanh(z / 2))
        z = jnp.where(g_lane, gates, 0.5 * gates)
        t_all = jnp.tanh(z)
        act = jnp.where(g_lane, t_all, 0.5 * t_all + 0.5)
        i = act[:, 0 * H:1 * H]
        f = act[:, 1 * H:2 * H]
        g = act[:, 2 * H:3 * H]
        o = act[:, 3 * H:4 * H]
        c = f * c_scr[...] + i * g
        h = o * jnp.tanh(c)
        c_scr[...] = c
        h_scr[...] = h
        # keep h only at the "last non-pad" timestep of each row
        last_scr[...] = jnp.where(pick == t, h, last_scr[...])
        return carry

    # fully unroll short recurrences (static slice of xw_scr, LLO visibility)
    lax.fori_loop(0, T, step, 0, unroll=True if T <= 16 else None)


def _lstm_last_kernel(x_ref, wih_ref, whh_ref, b_ref, pick_ref,
                      last_ref, xw_scr, h_scr, c_scr):
    _lstm_body(x_ref, wih_ref, whh_ref, b_ref, pick_ref,
               xw_scr, h_scr, c_scr, last_ref)


def _lstm_head_kernel(x_ref, wih_ref, whh_ref, b_ref, pick_ref,
                      lw_ref, lb_ref, pred_ref,
                      xw_scr, h_scr, c_scr, last_scr):
    _lstm_body(x_ref, wih_ref, whh_ref, b_ref, pick_ref,
               xw_scr, h_scr, c_scr, last_scr)
    # fused Linear(H, C) epilogue on the selected last hidden states
    pred_ref[...] = (jnp.dot(last_scr[...], lw_ref[...],
                             preferred_element_type=jnp.float32)
                     + lb_ref[...])


# ------------------------------ pallas wrapper ------------------------------

def _lstm_pallas(x_tm, pick, w_ih, w_hh, b, lin_w=None, lin_b=None, *,
                 n_tile=256):
    """x_tm: (T, N, D) time-major, pick: (N, 1) int32 timestep index to keep.
    Without lin_w/lin_b -> (N, H) f32 selected hidden states.
    With    lin_w/lin_b -> (N, C) f32 fused linear-head output."""
    T, N, D = x_tm.shape
    H = w_hh.shape[0]
    with_head = lin_w is not None

    # sublane alignment: 16 rows for bf16 inputs, 8 for f32 (keeps the in-
    # kernel (T,N,D)->(T*N,D) reshape a pure no-op relayout).
    align = 16 if x_tm.dtype.itemsize < 4 else 8
    n_tile = min(_round_up(n_tile, align), _round_up(N, align))
    n_pad = _round_up(N, n_tile)
    if n_pad != N:
        x_tm = jnp.pad(x_tm, ((0, 0), (0, n_pad - N), (0, 0)))
        pick = jnp.pad(pick, ((0, n_pad - N), (0, 0)))
    grid = (n_pad // n_tile,)

    in_arrays = [x_tm, w_ih, w_hh, b, pick]
    in_specs = [
        pl.BlockSpec((T, n_tile, D), lambda n: (0, n, 0)),
        pl.BlockSpec((D, 4 * H), lambda n: (0, 0)),
        pl.BlockSpec((H, 4 * H), lambda n: (0, 0)),
        pl.BlockSpec((1, 4 * H), lambda n: (0, 0)),
        pl.BlockSpec((n_tile, 1), lambda n: (n, 0)),
    ]
    scratch = [
        pltpu.VMEM((T, n_tile, 4 * H), jnp.float32),   # precomputed x@W_ih + b
        pltpu.VMEM((n_tile, H), jnp.float32),          # h
        pltpu.VMEM((n_tile, H), jnp.float32),          # c
    ]
    if with_head:
        C = lin_w.shape[1]
        kernel = _lstm_head_kernel
        in_arrays += [lin_w, lin_b]
        in_specs += [pl.BlockSpec((H, C), lambda n: (0, 0)),
                     pl.BlockSpec((1, C), lambda n: (0, 0))]
        scratch += [pltpu.VMEM((n_tile, H), jnp.float32)]   # selected last state
        out_shape = jax.ShapeDtypeStruct((n_pad, C), jnp.float32)
        out_spec = pl.BlockSpec((n_tile, C), lambda n: (n, 0))
    else:
        kernel = _lstm_last_kernel
        out_shape = jax.ShapeDtypeStruct((n_pad, H), jnp.float32)
        out_spec = pl.BlockSpec((n_tile, H), lambda n: (n, 0))

    # VMEM budget for one tile (double-buffered blocks + scratch), with margin.
    # If this would exceed ~64 MiB (v7x physical), shrink n_tile instead.
    itm = x_tm.dtype.itemsize
    wtm = w_ih.dtype.itemsize
    need = (2 * T * n_tile * D * itm                   # x blocks
            + 2 * (D + H + 1) * 4 * H * wtm            # W_ih, W_hh, bias
            + 2 * n_tile * 4                           # pick
            + 2 * n_tile * max(H, 128) * 4             # output block
            + T * n_tile * 4 * H * 4                   # xw scratch
            + 4 * n_tile * H * 4)                      # h, c, last (+ slack)
    vmem_limit = int(min(max(2 * need, 16 * 2 ** 20), 64 * 2 ** 20))

    out = pl.pallas_call(
        kernel,
        out_shape=out_shape,
        grid_spec=pltpu.PrefetchScalarGridSpec(
            num_scalar_prefetch=0,
            grid=grid,
            in_specs=in_specs,
            out_specs=out_spec,
            scratch_shapes=scratch),
        compiler_params=pltpu.CompilerParams(
            dimension_semantics=("parallel",),
            vmem_limit_bytes=vmem_limit),
    )(*in_arrays)
    return out[:N]


# ------------------------------ model wrapper -------------------------------

def _last_false_index(mask, axis):
    """Index of the position just before the first True of `mask` along
    `axis`; wraps to size-1 when the first element is True or there is no
    True (mirrors the PyTorch get_last_false_values helper)."""
    size = mask.shape[axis]
    first_true = jnp.argmax(mask.astype(jnp.int32), axis=axis)
    return (jnp.where(first_true == 0, size, first_true) - 1).astype(jnp.int32)


def init_params(key, vocab_size, E, H, num_classes):
    ks = jax.random.split(key, 11)
    initrange = 0.5 / E
    s = 1.0 / float(H) ** 0.5

    def u(k, shape, lim):
        return jax.random.uniform(k, shape, jnp.float32, -lim, lim)

    return {
        "embedding": u(ks[0], (vocab_size, E), initrange),
        # token LSTM (input E, hidden H); bias = b_ih + b_hh, gate order [i,f,g,o]
        "tok_wih": u(ks[1], (E, 4 * H), s),
        "tok_whh": u(ks[2], (H, 4 * H), s),
        "tok_b":   u(ks[3], (1, 4 * H), s) + u(ks[4], (1, 4 * H), s),
        # instr LSTM (input H, hidden H)
        "ins_wih": u(ks[5], (H, 4 * H), s),
        "ins_whh": u(ks[6], (H, 4 * H), s),
        "ins_b":   u(ks[7], (1, 4 * H), s) + u(ks[8], (1, 4 * H), s),
        # final Linear(H, num_classes)
        "lin_w":   u(ks[9], (H, num_classes), s),
        "lin_b":   u(ks[10], (1, num_classes), s),
    }


def batch_rnn_forward(x, params, pad_idx=0, compute_dtype=jnp.bfloat16,
                      n_tile=256):
    """x: (B, I, S) int32 token ids -> (B,) float32 predictions."""
    B, I, S = x.shape
    H = params["tok_whh"].shape[0]

    mask = (x == pad_idx)                                     # (B, I, S)
    tok_pick = _last_false_index(mask, axis=2).reshape(B * I, 1)
    ins_pick = _last_false_index(jnp.all(mask, axis=-1), axis=1).reshape(B, 1)

    # Embedding lookup directly into the kernel's time-major layout: the
    # transpose happens on the tiny int32 id tensor, not the float embeddings.
    # TODO(synk): embedding gather and pick-index argmax stay in plain JAX
    # (data-dependent gathers); the matmul/recurrence hot path is in Pallas.
    ids_tm = x.reshape(B * I, S).T                            # (S, B*I)
    tokens_tm = jnp.take(params["embedding"], ids_tm,
                         axis=0).astype(compute_dtype)        # (S, B*I, E)

    # token LSTM: only the hidden state of the last non-pad token comes back
    instr_chain = _lstm_pallas(
        tokens_tm, tok_pick,
        params["tok_wih"].astype(compute_dtype),
        params["tok_whh"].astype(compute_dtype),
        params["tok_b"], n_tile=n_tile)                       # (B*I, H) f32

    # instruction LSTM over the chain (time axis = I) with the Linear head
    # fused into the kernel epilogue.  Small (B,I,H)->(I,B,H) relayout only.
    ins_in = (instr_chain.reshape(B, I, H)
              .transpose(1, 0, 2).astype(compute_dtype))      # (I, B, H)
    pred = _lstm_pallas(
        ins_in, ins_pick,
        params["ins_wih"].astype(compute_dtype),
        params["ins_whh"].astype(compute_dtype),
        params["ins_b"],
        lin_w=params["lin_w"], lin_b=params["lin_b"],
        n_tile=n_tile)                                        # (B, C) f32

    return pred[:, 0] if pred.shape[-1] == 1 else pred


if __name__ == "__main__":
    B, I, S = 2, 4, 8
    E, H = 32, 32
    vocab_size, num_classes, pad_idx = 16, 1, 0

    key = jax.random.PRNGKey(0)
    pkey, xkey = jax.random.split(key)
    params = init_params(pkey, vocab_size, E, H, num_classes)

    # token ids in [1, vocab), then pad (id 0) the tail of each instruction
    x = jax.random.randint(xkey, (B, I, S), 1, vocab_size, dtype=jnp.int32)
    seq_lens = jnp.array([[8, 5, 3, 2], [6, 8, 1, 4]], dtype=jnp.int32)  # (B, I)
    seq_pos = jnp.arange(S, dtype=jnp.int32)[None, None, :]
    x = jnp.where(seq_pos < seq_lens[:, :, None], x, 0)

    fwd = jax.jit(lambda xx: batch_rnn_forward(xx, params, pad_idx=pad_idx))
    out = jax.block_until_ready(fwd(x))
    assert out.shape == (B,) and out.dtype == jnp.float32
    print("KERNEL_OK")
</pallas_src>

<mosaic_0001>
module attributes {stable_mosaic.version = 11 : i64} {
  func.func @_lstm_last_kernel(%arg0: i32, %arg1: memref<8x16x32xbf16, #tpu.memory_space<vmem>>, %arg2: memref<32x128xbf16, #tpu.memory_space<vmem>>, %arg3: memref<32x128xbf16, #tpu.memory_space<vmem>>, %arg4: memref<1x128xf32, #tpu.memory_space<vmem>>, %arg5: memref<16x1xi32, #tpu.memory_space<vmem>>, %arg6: memref<16x32xf32, #tpu.memory_space<vmem>>, %arg7: memref<8x16x128xf32, #tpu.memory_space<vmem>>, %arg8: memref<16x32xf32, #tpu.memory_space<vmem>>, %arg9: memref<16x32xf32, #tpu.memory_space<vmem>>) attributes {dimension_semantics = [#tpu.dimension_semantics<parallel>], iteration_bounds = array<i64: 1>, scalar_prefetch = 0 : i64, scratch_operands = 3 : i64, tpu.core_type = #tpu.core_type<tc>, window_params = [{transform_indices = @transform_0, window_bounds = array<i64: 8, 16, 32>}, {pipeline_mode = #tpu.pipeline_mode<synchronous>, transform_indices = @transform_1, window_bounds = array<i64: 32, 128>}, {pipeline_mode = #tpu.pipeline_mode<synchronous>, transform_indices = @transform_2, window_bounds = array<i64: 32, 128>}, {pipeline_mode = #tpu.pipeline_mode<synchronous>, transform_indices = @transform_3, window_bounds = array<i64: 1, 128>}, {transform_indices = @transform_4, window_bounds = array<i64: 16, 1>}, {transform_indices = @transform_5, window_bounds = array<i64: 16, 32>}]} {
    %c0 = arith.constant 0 : index
    %c0_0 = arith.constant 0 : index
    %c0_1 = arith.constant 0 : index
    %0 = vector.load %arg1[%c0, %c0_0, %c0_1] : memref<8x16x32xbf16, #tpu.memory_space<vmem>>, vector<8x16x32xbf16>
    %1 = vector.shape_cast %0 : vector<8x16x32xbf16> to vector<128x32xbf16>
    %c0_2 = arith.constant 0 : index
    %c0_3 = arith.constant 0 : index
    %2 = vector.load %arg2[%c0_2, %c0_3] : memref<32x128xbf16, #tpu.memory_space<vmem>>, vector<32x128xbf16>
    %cst = arith.constant dense<0.000000e+00> : vector<128x128xf32>
    %3 = tpu.matmul %1, %2, %cst {dimension_numbers = #tpu.dot_dimension_numbers<[1], [0], [0], [1], [0, 0, 1, 1], [], []>} : vector<128x32xbf16>, vector<32x128xbf16>, vector<128x128xf32> -> vector<128x128xf32>
    %c0_4 = arith.constant 0 : index
    %c0_5 = arith.constant 0 : index
    %4 = vector.load %arg4[%c0_4, %c0_5] : memref<1x128xf32, #tpu.memory_space<vmem>>, vector<1x128xf32>
    %5 = vector.broadcast %4 : vector<1x128xf32> to vector<128x128xf32>
    %6 = arith.addf %3, %5 : vector<128x128xf32>
    %7 = vector.shape_cast %6 : vector<128x128xf32> to vector<8x16x128xf32>
    %c0_6 = arith.constant 0 : index
    %c0_7 = arith.constant 0 : index
    %c0_8 = arith.constant 0 : index
    %8 = vector.load %arg7[%c0_6, %c0_7, %c0_8] : memref<8x16x128xf32, #tpu.memory_space<vmem>>, vector<8x16x128xf32>
    tpu.vector_store %arg7[%c0_6, %c0_7, %c0_8], %7 {strides = array<i32>} : memref<8x16x128xf32, #tpu.memory_space<vmem>>, vector<8x16x128xf32>,
    %cst_9 = arith.constant 0.000000e+00 : f32
    %9 = vector.broadcast %cst_9 : f32 to vector<16x32xf32>
    %c0_10 = arith.constant 0 : index
    %c0_11 = arith.constant 0 : index
    %10 = vector.load %arg8[%c0_10, %c0_11] : memref<16x32xf32, #tpu.memory_space<vmem>>, vector<16x32xf32>
    tpu.vector_store %arg8[%c0_10, %c0_11], %9 {strides = array<i32>} : memref<16x32xf32, #tpu.memory_space<vmem>>, vector<16x32xf32>,
    %cst_12 = arith.constant 0.000000e+00 : f32
    %11 = vector.broadcast %cst_12 : f32 to vector<16x32xf32>
    %c0_13 = arith.constant 0 : index
    %c0_14 = arith.constant 0 : index
    %12 = vector.load %arg9[%c0_13, %c0_14] : memref<16x32xf32, #tpu.memory_space<vmem>>, vector<16x32xf32>
    tpu.vector_store %arg9[%c0_13, %c0_14], %11 {strides = array<i32>} : memref<16x32xf32, #tpu.memory_space<vmem>>, vector<16x32xf32>,
    %cst_15 = arith.constant 0.000000e+00 : f32
    %13 = vector.broadcast %cst_15 : f32 to vector<16x32xf32>
    %c0_16 = arith.constant 0 : index
    %c0_17 = arith.constant 0 : index
    %14 = vector.load %arg6[%c0_16, %c0_17] : memref<16x32xf32, #tpu.memory_space<vmem>>, vector<16x32xf32>
    tpu.vector_store %arg6[%c0_16, %c0_17], %13 {strides = array<i32>} : memref<16x32xf32, #tpu.memory_space<vmem>>, vector<16x32xf32>,
    %c0_18 = arith.constant 0 : index
    %c0_19 = arith.constant 0 : index
    %15 = vector.load %arg5[%c0_18, %c0_19] : memref<16x1xi32, #tpu.memory_space<vmem>>, vector<16x1xi32>
    %16 = tpu.iota {dimensions = array<i32: 1>} : vector<16x128xi32>
    %c64_i32 = arith.constant 64 : i32
    %17 = vector.broadcast %c64_i32 : i32 to vector<16x128xi32>
    %18 = arith.cmpi sge, %16, %17 : vector<16x128xi32>
    %c96_i32 = arith.constant 96 : i32
    %19 = vector.broadcast %c96_i32 : i32 to vector<16x128xi32>
    %20 = arith.cmpi slt, %16, %19 : vector<16x128xi32>
    %21 = arith.andi %18, %20 : vector<16x128xi1>
    %c0_i32 = arith.constant 0 : i32
    %22 = arith.index_cast %c0_i32 : i32 to index
    %c0_20 = arith.constant 0 : index
    %c0_21 = arith.constant 0 : index
    %23 = vector.load %arg7[%22, %c0_20, %c0_21] : memref<8x16x128xf32, #tpu.memory_space<vmem>>, vector<1x16x128xf32>
    %24 = vector.shape_cast %23 : vector<1x16x128xf32> to vector<16x128xf32>
    %c0_22 = arith.constant 0 : index
    %c0_23 = arith.constant 0 : index
    %25 = vector.load %arg8[%c0_22, %c0_23] : memref<16x32xf32, #tpu.memory_space<vmem>>, vector<16x32xf32>
    %26 = arith.truncf %25 : vector<16x32xf32> to vector<16x32xbf16>
    %c0_24 = arith.constant 0 : index
    %c0_25 = arith.constant 0 : index
    %27 = vector.load %arg3[%c0_24, %c0_25] : memref<32x128xbf16, #tpu.memory_space<vmem>>, vector<32x128xbf16>
    %cst_26 = arith.constant dense<0.000000e+00> : vector<16x128xf32>
    %28 = tpu.matmul %26, %27, %cst_26 {dimension_numbers = #tpu.dot_dimension_numbers<[1], [0], [0], [1], [0, 0, 1, 1], [], []>} : vector<16x32xbf16>, vector<32x128xbf16>, vector<16x128xf32> -> vector<16x128xf32>
    %29 = arith.addf %24, %28 : vector<16x128xf32>
    %cst_27 = arith.constant 5.000000e-01 : f32
    %30 = vector.broadcast %cst_27 : f32 to vector<16x128xf32>
    %31 = arith.mulf %30, %29 : vector<16x128xf32>
    %32 = arith.select %21, %29, %31 : vector<16x128xi1>, vector<16x128xf32>
    %33 = math.tanh %32 : vector<16x128xf32>
    %cst_28 = arith.constant 5.000000e-01 : f32
    %34 = vector.broadcast %cst_28 : f32 to vector<16x128xf32>
    %35 = arith.mulf %34, %33 : vector<16x128xf32>
    %cst_29 = arith.constant 5.000000e-01 : f32
    %36 = vector.broadcast %cst_29 : f32 to vector<16x128xf32>
    %37 = arith.addf %35, %36 : vector<16x128xf32>
    %38 = arith.select %21, %33, %37 : vector<16x128xi1>, vector<16x128xf32>
    %39 = vector.extract_strided_slice %38 {offsets = [0, 0], sizes = [16, 32], strides = [1, 1]} : vector<16x128xf32> to vector<16x32xf32>
    %40 = vector.extract_strided_slice %38 {offsets = [0, 32], sizes = [16, 32], strides = [1, 1]} : vector<16x128xf32> to vector<16x32xf32>
    %41 = vector.extract_strided_slice %38 {offsets = [0, 64], sizes = [16, 32], strides = [1, 1]} : vector<16x128xf32> to vector<16x32xf32>
    %42 = vector.extract_strided_slice %38 {offsets = [0, 96], sizes = [16, 32], strides = [1, 1]} : vector<16x128xf32> to vector<16x32xf32>
    %c0_30 = arith.constant 0 : index
    %c0_31 = arith.constant 0 : index
    %43 = vector.load %arg9[%c0_30, %c0_31] : memref<16x32xf32, #tpu.memory_space<vmem>>, vector<16x32xf32>
    %44 = arith.mulf %40, %43 : vector<16x32xf32>
    %45 = arith.mulf %39, %41 : vector<16x32xf32>
    %46 = arith.addf %44, %45 : vector<16x32xf32>
    %47 = math.tanh %46 : vector<16x32xf32>
    %48 = arith.mulf %42, %47 : vector<16x32xf32>
    %c0_32 = arith.constant 0 : index
    %c0_33 = arith.constant 0 : index
    %49 = vector.load %arg9[%c0_32, %c0_33] : memref<16x32xf32, #tpu.memory_space<vmem>>, vector<16x32xf32>
    tpu.vector_store %arg9[%c0_32, %c0_33], %46 {strides = array<i32>} : memref<16x32xf32, #tpu.memory_space<vmem>>, vector<16x32xf32>,
    %c0_34 = arith.constant 0 : index
    %c0_35 = arith.constant 0 : index
    %50 = vector.load %arg8[%c0_34, %c0_35] : memref<16x32xf32, #tpu.memory_space<vmem>>, vector<16x32xf32>
    tpu.vector_store %arg8[%c0_34, %c0_35], %48 {strides = array<i32>} : memref<16x32xf32, #tpu.memory_space<vmem>>, vector<16x32xf32>,
    %51 = vector.broadcast %c0_i32 : i32 to vector<16x1xi32>
    %52 = arith.cmpi eq, %15, %51 : vector<16x1xi32>
    %c0_36 = arith.constant 0 : index
    %c0_37 = arith.constant 0 : index
    %53 = vector.load %arg6[%c0_36, %c0_37] : memref<16x32xf32, #tpu.memory_space<vmem>>, vector<16x32xf32>
    %54 = vector.shape_cast %52 : vector<16x1xi1> to vector<16x1xi1>
    %55 = vector.broadcast %54 : vector<16x1xi1> to vector<16x32xi1>
    %56 = arith.select %55, %48, %53 : vector<16x32xi1>, vector<16x32xf32>
    %c0_38 = arith.constant 0 : index
    %c0_39 = arith.constant 0 : index
    %57 = vector.load %arg6[%c0_38, %c0_39] : memref<16x32xf32, #tpu.memory_space<vmem>>, vector<16x32xf32>
    tpu.vector_store %arg6[%c0_38, %c0_39], %56 {strides = array<i32>} : memref<16x32xf32, #tpu.memory_space<vmem>>, vector<16x32xf32>,
    %c1_i32 = arith.constant 1 : i32
    %58 = arith.index_cast %c1_i32 : i32 to index
    %c0_40 = arith.constant 0 : index
    %c0_41 = arith.constant 0 : index
    %59 = vector.load %arg7[%58, %c0_40, %c0_41] : memref<8x16x128xf32, #tpu.memory_space<vmem>>, vector<1x16x128xf32>
    %60 = vector.shape_cast %59 : vector<1x16x128xf32> to vector<16x128xf32>
    %c0_42 = arith.constant 0 : index
    %c0_43 = arith.constant 0 : index
    %61 = vector.load %arg8[%c0_42, %c0_43] : memref<16x32xf32, #tpu.memory_space<vmem>>, vector<16x32xf32>
    %62 = arith.truncf %61 : vector<16x32xf32> to vector<16x32xbf16>
    %c0_44 = arith.constant 0 : index
    %c0_45 = arith.constant 0 : index
    %63 = vector.load %arg3[%c0_44, %c0_45] : memref<32x128xbf16, #tpu.memory_space<vmem>>, vector<32x128xbf16>
    %cst_46 = arith.constant dense<0.000000e+00> : vector<16x128xf32>
    %64 = tpu.matmul %62, %63, %cst_46 {dimension_numbers = #tpu.dot_dimension_numbers<[1], [0], [0], [1], [0, 0, 1, 1], [], []>} : vector<16x32xbf16>, vector<32x128xbf16>, vector<16x128xf32> -> vector<16x128xf32>
    %65 = arith.addf %60, %64 : vector<16x128xf32>
    %cst_47 = arith.constant 5.000000e-01 : f32
    %66 = vector.broadcast %cst_47 : f32 to vector<16x128xf32>
    %67 = arith.mulf %66, %65 : vector<16x128xf32>
    %68 = arith.select %21, %65, %67 : vector<16x128xi1>, vector<16x128xf32>
    %69 = math.tanh %68 : vector<16x128xf32>
    %cst_48 = arith.constant 5.000000e-01 : f32
    %70 = vector.broadcast %cst_48 : f32 to vector<16x128xf32>
    %71 = arith.mulf %70, %69 : vector<16x128xf32>
    %cst_49 = arith.constant 5.000000e-01 : f32
    %72 = vector.broadcast %cst_49 : f32 to vector<16x128xf32>
    %73 = arith.addf %71, %72 : vector<16x128xf32>
    %74 = arith.select %21, %69, %73 : vector<16x128xi1>, vector<16x128xf32>
    %75 = vector.extract_strided_slice %74 {offsets = [0, 0], sizes = [16, 32], strides = [1, 1]} : vector<16x128xf32> to vector<16x32xf32>
    %76 = vector.extract_strided_slice %74 {offsets = [0, 32], sizes = [16, 32], strides = [1, 1]} : vector<16x128xf32> to vector<16x32xf32>
    %77 = vector.extract_strided_slice %74 {offsets = [0, 64], sizes = [16, 32], strides = [1, 1]} : vector<16x128xf32> to vector<16x32xf32>
    %78 = vector.extract_strided_slice %74 {offsets = [0, 96], sizes = [16, 32], strides = [1, 1]} : vector<16x128xf32> to vector<16x32xf32>
    %c0_50 = arith.constant 0 : index
    %c0_51 = arith.constant 0 : index
    %79 = vector.load %arg9[%c0_50, %c0_51] : memref<16x32xf32, #tpu.memory_space<vmem>>, vector<16x32xf32>
    %80 = arith.mulf %76, %79 : vector<16x32xf32>
    %81 = arith.mulf %75, %77 : vector<16x32xf32>
    %82 = arith.addf %80, %81 : vector<16x32xf32>
    %83 = math.tanh %82 : vector<16x32xf32>
    %84 = arith.mulf %78, %83 : vector<16x32xf32>
    %c0_52 = arith.constant 0 : index
    %c0_53 = arith.constant 0 : index
    %85 = vector.load %arg9[%c0_52, %c0_53] : memref<16x32xf32, #tpu.memory_space<vmem>>, vector<16x32xf32>
    tpu.vector_store %arg9[%c0_52, %c0_53], %82 {strides = array<i32>} : memref<16x32xf32, #tpu.memory_space<vmem>>, vector<16x32xf32>,
    %c0_54 = arith.constant 0 : index
    %c0_55 = arith.constant 0 : index
    %86 = vector.load %arg8[%c0_54, %c0_55] : memref<16x32xf32, #tpu.memory_space<vmem>>, vector<16x32xf32>
    tpu.vector_store %arg8[%c0_54, %c0_55], %84 {strides = array<i32>} : memref<16x32xf32, #tpu.memory_space<vmem>>, vector<16x32xf32>,
    %87 = vector.broadcast %c1_i32 : i32 to vector<16x1xi32>
    %88 = arith.cmpi eq, %15, %87 : vector<16x1xi32>
    %c0_56 = arith.constant 0 : index
    %c0_57 = arith.constant 0 : index
    %89 = vector.load %arg6[%c0_56, %c0_57] : memref<16x32xf32, #tpu.memory_space<vmem>>, vector<16x32xf32>
    %90 = vector.shape_cast %88 : vector<16x1xi1> to vector<16x1xi1>
    %91 = vector.broadcast %90 : vector<16x1xi1> to vector<16x32xi1>
    %92 = arith.select %91, %84, %89 : vector<16x32xi1>, vector<16x32xf32>
    %c0_58 = arith.constant 0 : index
    %c0_59 = arith.constant 0 : index
    %93 = vector.load %arg6[%c0_58, %c0_59] : memref<16x32xf32, #tpu.memory_space<vmem>>, vector<16x32xf32>
    tpu.vector_store %arg6[%c0_58, %c0_59], %92 {strides = array<i32>} : memref<16x32xf32, #tpu.memory_space<vmem>>, vector<16x32xf32>,
    %c2_i32 = arith.constant 2 : i32
    %94 = arith.index_cast %c2_i32 : i32 to index
    %c0_60 = arith.constant 0 : index
    %c0_61 = arith.constant 0 : index
    %95 = vector.load %arg7[%94, %c0_60, %c0_61] : memref<8x16x128xf32, #tpu.memory_space<vmem>>, vector<1x16x128xf32>
    %96 = vector.shape_cast %95 : vector<1x16x128xf32> to vector<16x128xf32>
    %c0_62 = arith.constant 0 : index
    %c0_63 = arith.constant 0 : index
    %97 = vector.load %arg8[%c0_62, %c0_63] : memref<16x32xf32, #tpu.memory_space<vmem>>, vector<16x32xf32>
    %98 = arith.truncf %97 : vector<16x32xf32> to vector<16x32xbf16>
    %c0_64 = arith.constant 0 : index
    %c0_65 = arith.constant 0 : index
    %99 = vector.load %arg3[%c0_64, %c0_65] : memref<32x128xbf16, #tpu.memory_space<vmem>>, vector<32x128xbf16>
    %cst_66 = arith.constant dense<0.000000e+00> : vector<16x128xf32>
    %100 = tpu.matmul %98, %99, %cst_66 {dimension_numbers = #tpu.dot_dimension_numbers<[1], [0], [0], [1], [0, 0, 1, 1], [], []>} : vector<16x32xbf16>, vector<32x128xbf16>, vector<16x128xf32> -> vector<16x128xf32>
    %101 = arith.addf %96, %100 : vector<16x128xf32>
    %cst_67 = arith.constant 5.000000e-01 : f32
    %102 = vector.broadcast %cst_67 : f32 to vector<16x128xf32>
    %103 = arith.mulf %102, %101 : vector<16x128xf32>
    %104 = arith.select %21, %101, %103 : vector<16x128xi1>, vector<16x128xf32>
    %105 = math.tanh %104 : vector<16x128xf32>
    %cst_68 = arith.constant 5.000000e-01 : f32
    %106 = vector.broadcast %cst_68 : f32 to vector<16x128xf32>
    %107 = arith.mulf %106, %105 : vector<16x128xf32>
    %cst_69 = arith.constant 5.000000e-01 : f32
    %108 = vector.broadcast %cst_69 : f32 to vector<16x128xf32>
    %109 = arith.addf %107, %108 : vector<16x128xf32>
    %110 = arith.select %21, %105, %109 : vector<16x128xi1>, vector<16x128xf32>
    %111 = vector.extract_strided_slice %110 {offsets = [0, 0], sizes = [16, 32], strides = [1, 1]} : vector<16x128xf32> to vector<16x32xf32>
    %112 = vector.extract_strided_slice %110 {offsets = [0, 32], sizes = [16, 32], strides = [1, 1]} : vector<16x128xf32> to vector<16x32xf32>
    %113 = vector.extract_strided_slice %110 {offsets = [0, 64], sizes = [16, 32], strides = [1, 1]} : vector<16x128xf32> to vector<16x32xf32>
    %114 = vector.extract_strided_slice %110 {offsets = [0, 96], sizes = [16, 32], strides = [1, 1]} : vector<16x128xf32> to vector<16x32xf32>
    %c0_70 = arith.constant 0 : index
    %c0_71 = arith.constant 0 : index
    %115 = vector.load %arg9[%c0_70, %c0_71] : memref<16x32xf32, #tpu.memory_space<vmem>>, vector<16x32xf32>
    %116 = arith.mulf %112, %115 : vector<16x32xf32>
    %117 = arith.mulf %111, %113 : vector<16x32xf32>
    %118 = arith.addf %116, %117 : vector<16x32xf32>
    %119 = math.tanh %118 : vector<16x32xf32>
    %120 = arith.mulf %114, %119 : vector<16x32xf32>
    %c0_72 = arith.constant 0 : index
    %c0_73 = arith.constant 0 : index
    %121 = vector.load %arg9[%c0_72, %c0_73] : memref<16x32xf32, #tpu.memory_space<vmem>>, vector<16x32xf32>
    tpu.vector_store %arg9[%c0_72, %c0_73], %118 {strides = array<i32>} : memref<16x32xf32, #tpu.memory_space<vmem>>, vector<16x32xf32>,
    %c0_74 = arith.constant 0 : index
    %c0_75 = arith.constant 0 : index
    %122 = vector.load %arg8[%c0_74, %c0_75] : memref<16x32xf32, #tpu.memory_space<vmem>>, vector<16x32xf32>
    tpu.vector_store %arg8[%c0_74, %c0_75], %120 {strides = array<i32>} : memref<16x32xf32, #tpu.memory_space<vmem>>, vector<16x32xf32>,
    %123 = vector.broadcast %c2_i32 : i32 to vector<16x1xi32>
    %124 = arith.cmpi eq, %15, %123 : vector<16x1xi32>
    %c0_76 = arith.constant 0 : index
    %c0_77 = arith.constant 0 : index
    %125 = vector.load %arg6[%c0_76, %c0_77] : memref<16x32xf32, #tpu.memory_space<vmem>>, vector<16x32xf32>
    %126 = vector.shape_cast %124 : vector<16x1xi1> to vector<16x1xi1>
    %127 = vector.broadcast %126 : vector<16x1xi1> to vector<16x32xi1>
    %128 = arith.select %127, %120, %125 : vector<16x32xi1>, vector<16x32xf32>
    %c0_78 = arith.constant 0 : index
    %c0_79 = arith.constant 0 : index
    %129 = vector.load %arg6[%c0_78, %c0_79] : memref<16x32xf32, #tpu.memory_space<vmem>>, vector<16x32xf32>
    tpu.vector_store %arg6[%c0_78, %c0_79], %128 {strides = array<i32>} : memref<16x32xf32, #tpu.memory_space<vmem>>, vector<16x32xf32>,
    %c3_i32 = arith.constant 3 : i32
    %130 = arith.index_cast %c3_i32 : i32 to index
    %c0_80 = arith.constant 0 : index
    %c0_81 = arith.constant 0 : index
    %131 = vector.load %arg7[%130, %c0_80, %c0_81] : memref<8x16x128xf32, #tpu.memory_space<vmem>>, vector<1x16x128xf32>
    %132 = vector.shape_cast %131 : vector<1x16x128xf32> to vector<16x128xf32>
    %c0_82 = arith.constant 0 : index
    %c0_83 = arith.constant 0 : index
    %133 = vector.load %arg8[%c0_82, %c0_83] : memref<16x32xf32, #tpu.memory_space<vmem>>, vector<16x32xf32>
    %134 = arith.truncf %133 : vector<16x32xf32> to vector<16x32xbf16>
    %c0_84 = arith.constant 0 : index
    %c0_85 = arith.constant 0 : index
    %135 = vector.load %arg3[%c0_84, %c0_85] : memref<32x128xbf16, #tpu.memory_space<vmem>>, vector<32x128xbf16>
    %cst_86 = arith.constant dense<0.000000e+00> : vector<16x128xf32>
    %136 = tpu.matmul %134, %135, %cst_86 {dimension_numbers = #tpu.dot_dimension_numbers<[1], [0], [0], [1], [0, 0, 1, 1], [], []>} : vector<16x32xbf16>, vector<32x128xbf16>, vector<16x128xf32> -> vector<16x128xf32>
    %137 = arith.addf %132, %136 : vector<16x128xf32>
    %cst_87 = arith.constant 5.000000e-01 : f32
    %138 = vector.broadcast %cst_87 : f32 to vector<16x128xf32>
    %139 = arith.mulf %138, %137 : vector<16x128xf32>
    %140 = arith.select %21, %137, %139 : vector<16x128xi1>, vector<16x128xf32>
    %141 = math.tanh %140 : vector<16x128xf32>
    %cst_88 = arith.constant 5.000000e-01 : f32
    %142 = vector.broadcast %cst_88 : f32 to vector<16x128xf32>
    %143 = arith.mulf %142, %141 : vector<16x128xf32>
    %cst_89 = arith.constant 5.000000e-01 : f32
    %144 = vector.broadcast %cst_89 : f32 to vector<16x128xf32>
    %145 = arith.addf %143, %144 : vector<16x128xf32>
    %146 = arith.select %21, %141, %145 : vector<16x128xi1>, vector<16x128xf32>
    %147 = vector.extract_strided_slice %146 {offsets = [0, 0], sizes = [16, 32], strides = [1, 1]} : vector<16x128xf32> to vector<16x32xf32>
    %148 = vector.extract_strided_slice %146 {offsets = [0, 32], sizes = [16, 32], strides = [1, 1]} : vector<16x128xf32> to vector<16x32xf32>
    %149 = vector.extract_strided_slice %146 {offsets = [0, 64], sizes = [16, 32], strides = [1, 1]} : vector<16x128xf32> to vector<16x32xf32>
    %150 = vector.extract_strided_slice %146 {offsets = [0, 96], sizes = [16, 32], strides = [1, 1]} : vector<16x128xf32> to vector<16x32xf32>
    %c0_90 = arith.constant 0 : index
    %c0_91 = arith.constant 0 : index
    %151 = vector.load %arg9[%c0_90, %c0_91] : memref<16x32xf32, #tpu.memory_space<vmem>>, vector<16x32xf32>
    %152 = arith.mulf %148, %151 : vector<16x32xf32>
    %153 = arith.mulf %147, %149 : vector<16x32xf32>
    %154 = arith.addf %152, %153 : vector<16x32xf32>
    %155 = math.tanh %154 : vector<16x32xf32>
    %156 = arith.mulf %150, %155 : vector<16x32xf32>
    %c0_92 = arith.constant 0 : index
    %c0_93 = arith.constant 0 : index
    %157 = vector.load %arg9[%c0_92, %c0_93] : memref<16x32xf32, #tpu.memory_space<vmem>>, vector<16x32xf32>
    tpu.vector_store %arg9[%c0_92, %c0_93], %154 {strides = array<i32>} : memref<16x32xf32, #tpu.memory_space<vmem>>, vector<16x32xf32>,
    %c0_94 = arith.constant 0 : index
    %c0_95 = arith.constant 0 : index
    %158 = vector.load %arg8[%c0_94, %c0_95] : memref<16x32xf32, #tpu.memory_space<vmem>>, vector<16x32xf32>
    tpu.vector_store %arg8[%c0_94, %c0_95], %156 {strides = array<i32>} : memref<16x32xf32, #tpu.memory_space<vmem>>, vector<16x32xf32>,
    %159 = vector.broadcast %c3_i32 : i32 to vector<16x1xi32>
    %160 = arith.cmpi eq, %15, %159 : vector<16x1xi32>
    %c0_96 = arith.constant 0 : index
    %c0_97 = arith.constant 0 : index
    %161 = vector.load %arg6[%c0_96, %c0_97] : memref<16x32xf32, #tpu.memory_space<vmem>>, vector<16x32xf32>
    %162 = vector.shape_cast %160 : vector<16x1xi1> to vector<16x1xi1>
    %163 = vector.broadcast %162 : vector<16x1xi1> to vector<16x32xi1>
    %164 = arith.select %163, %156, %161 : vector<16x32xi1>, vector<16x32xf32>
    %c0_98 = arith.constant 0 : index
    %c0_99 = arith.constant 0 : index
    %165 = vector.load %arg6[%c0_98, %c0_99] : memref<16x32xf32, #tpu.memory_space<vmem>>, vector<16x32xf32>
    tpu.vector_store %arg6[%c0_98, %c0_99], %164 {strides = array<i32>} : memref<16x32xf32, #tpu.memory_space<vmem>>, vector<16x32xf32>,
    %c4_i32 = arith.constant 4 : i32
    %166 = arith.index_cast %c4_i32 : i32 to index
    %c0_100 = arith.constant 0 : index
    %c0_101 = arith.constant 0 : index
    %167 = vector.load %arg7[%166, %c0_100, %c0_101] : memref<8x16x128xf32, #tpu.memory_space<vmem>>, vector<1x16x128xf32>
    %168 = vector.shape_cast %167 : vector<1x16x128xf32> to vector<16x128xf32>
    %c0_102 = arith.constant 0 : index
    %c0_103 = arith.constant 0 : index
    %169 = vector.load %arg8[%c0_102, %c0_103] : memref<16x32xf32, #tpu.memory_space<vmem>>, vector<16x32xf32>
    %170 = arith.truncf %169 : vector<16x32xf32> to vector<16x32xbf16>
    %c0_104 = arith.constant 0 : index
    %c0_105 = arith.constant 0 : index
    %171 = vector.load %arg3[%c0_104, %c0_105] : memref<32x128xbf16, #tpu.memory_space<vmem>>, vector<32x128xbf16>
    %cst_106 = arith.constant dense<0.000000e+00> : vector<16x128xf32>
    %172 = tpu.matmul %170, %171, %cst_106 {dimension_numbers = #tpu.dot_dimension_numbers<[1], [0], [0], [1], [0, 0, 1, 1], [], []>} : vector<16x32xbf16>, vector<32x128xbf16>, vector<16x128xf32> -> vector<16x128xf32>
    %173 = arith.addf %168, %172 : vector<16x128xf32>
    %cst_107 = arith.constant 5.000000e-01 : f32
    %174 = vector.broadcast %cst_107 : f32 to vector<16x128xf32>
    %175 = arith.mulf %174, %173 : vector<16x128xf32>
    %176 = arith.select %21, %173, %175 : vector<16x128xi1>, vector<16x128xf32>
    %177 = math.tanh %176 : vector<16x128xf32>
    %cst_108 = arith.constant 5.000000e-01 : f32
    %178 = vector.broadcast %cst_108 : f32 to vector<16x128xf32>
    %179 = arith.mulf %178, %177 : vector<16x128xf32>
    %cst_109 = arith.constant 5.000000e-01 : f32
    %180 = vector.broadcast %cst_109 : f32 to vector<16x128xf32>
    %181 = arith.addf %179, %180 : vector<16x128xf32>
    %182 = arith.select %21, %177, %181 : vector<16x128xi1>, vector<16x128xf32>
    %183 = vector.extract_strided_slice %182 {offsets = [0, 0], sizes = [16, 32], strides = [1, 1]} : vector<16x128xf32> to vector<16x32xf32>
    %184 = vector.extract_strided_slice %182 {offsets = [0, 32], sizes = [16, 32], strides = [1, 1]} : vector<16x128xf32> to vector<16x32xf32>
    %185 = vector.extract_strided_slice %182 {offsets = [0, 64], sizes = [16, 32], strides = [1, 1]} : vector<16x128xf32> to vector<16x32xf32>
    %186 = vector.extract_strided_slice %182 {offsets = [0, 96], sizes = [16, 32], strides = [1, 1]} : vector<16x128xf32> to vector<16x32xf32>
    %c0_110 = arith.constant 0 : index
    %c0_111 = arith.constant 0 : index
    %187 = vector.load %arg9[%c0_110, %c0_111] : memref<16x32xf32, #tpu.memory_space<vmem>>, vector<16x32xf32>
    %188 = arith.mulf %184, %187 : vector<16x32xf32>
    %189 = arith.mulf %183, %185 : vector<16x32xf32>
    %190 = arith.addf %188, %189 : vector<16x32xf32>
    %191 = math.tanh %190 : vector<16x32xf32>
    %192 = arith.mulf %186, %191 : vector<16x32xf32>
    %c0_112 = arith.constant 0 : index
    %c0_113 = arith.constant 0 : index
    %193 = vector.load %arg9[%c0_112, %c0_113] : memref<16x32xf32, #tpu.memory_space<vmem>>, vector<16x32xf32>
    tpu.vector_store %arg9[%c0_112, %c0_113], %190 {strides = array<i32>} : memref<16x32xf32, #tpu.memory_space<vmem>>, vector<16x32xf32>,
    %c0_114 = arith.constant 0 : index
    %c0_115 = arith.constant 0 : index
    %194 = vector.load %arg8[%c0_114, %c0_115] : memref<16x32xf32, #tpu.memory_space<vmem>>, vector<16x32xf32>
    tpu.vector_store %arg8[%c0_114, %c0_115], %192 {strides = array<i32>} : memref<16x32xf32, #tpu.memory_space<vmem>>, vector<16x32xf32>,
    %195 = vector.broadcast %c4_i32 : i32 to vector<16x1xi32>
    %196 = arith.cmpi eq, %15, %195 : vector<16x1xi32>
    %c0_116 = arith.constant 0 : index
    %c0_117 = arith.constant 0 : index
    %197 = vector.load %arg6[%c0_116, %c0_117] : memref<16x32xf32, #tpu.memory_space<vmem>>, vector<16x32xf32>
    %198 = vector.shape_cast %196 : vector<16x1xi1> to vector<16x1xi1>
    %199 = vector.broadcast %198 : vector<16x1xi1> to vector<16x32xi1>
    %200 = arith.select %199, %192, %197 : vector<16x32xi1>, vector<16x32xf32>
    %c0_118 = arith.constant 0 : index
    %c0_119 = arith.constant 0 : index
    %201 = vector.load %arg6[%c0_118, %c0_119] : memref<16x32xf32, #tpu.memory_space<vmem>>, vector<16x32xf32>
    tpu.vector_store %arg6[%c0_118, %c0_119], %200 {strides = array<i32>} : memref<16x32xf32, #tpu.memory_space<vmem>>, vector<16x32xf32>,
    %c5_i32 = arith.constant 5 : i32
    %202 = arith.index_cast %c5_i32 : i32 to index
    %c0_120 = arith.constant 0 : index
    %c0_121 = arith.constant 0 : index
    %203 = vector.load %arg7[%202, %c0_120, %c0_121] : memref<8x16x128xf32, #tpu.memory_space<vmem>>, vector<1x16x128xf32>
    %204 = vector.shape_cast %203 : vector<1x16x128xf32> to vector<16x128xf32>
    %c0_122 = arith.constant 0 : index
    %c0_123 = arith.constant 0 : index
    %205 = vector.load %arg8[%c0_122, %c0_123] : memref<16x32xf32, #tpu.memory_space<vmem>>, vector<16x32xf32>
    %206 = arith.truncf %205 : vector<16x32xf32> to vector<16x32xbf16>
    %c0_124 = arith.constant 0 : index
    %c0_125 = arith.constant 0 : index
    %207 = vector.load %arg3[%c0_124, %c0_125] : memref<32x128xbf16, #tpu.memory_space<vmem>>, vector<32x128xbf16>
    %cst_126 = arith.constant dense<0.000000e+00> : vector<16x128xf32>
    %208 = tpu.matmul %206, %207, %cst_126 {dimension_numbers = #tpu.dot_dimension_numbers<[1], [0], [0], [1], [0, 0, 1, 1], [], []>} : vector<16x32xbf16>, vector<32x128xbf16>, vector<16x128xf32> -> vector<16x128xf32>
    %209 = arith.addf %204, %208 : vector<16x128xf32>
    %cst_127 = arith.constant 5.000000e-01 : f32
    %210 = vector.broadcast %cst_127 : f32 to vector<16x128xf32>
    %211 = arith.mulf %210, %209 : vector<16x128xf32>
    %212 = arith.select %21, %209, %211 : vector<16x128xi1>, vector<16x128xf32>
    %213 = math.tanh %212 : vector<16x128xf32>
    %cst_128 = arith.constant 5.000000e-01 : f32
    %214 = vector.broadcast %cst_128 : f32 to vector<16x128xf32>
    %215 = arith.mulf %214, %213 : vector<16x128xf32>
    %cst_129 = arith.constant 5.000000e-01 : f32
    %216 = vector.broadcast %cst_129 : f32 to vector<16x128xf32>
    %217 = arith.addf %215, %216 : vector<16x128xf32>
    %218 = arith.select %21, %213, %217 : vector<16x128xi1>, vector<16x128xf32>
    %219 = vector.extract_strided_slice %218 {offsets = [0, 0], sizes = [16, 32], strides = [1, 1]} : vector<16x128xf32> to vector<16x32xf32>
    %220 = vector.extract_strided_slice %218 {offsets = [0, 32], sizes = [16, 32], strides = [1, 1]} : vector<16x128xf32> to vector<16x32xf32>
    %221 = vector.extract_strided_slice %218 {offsets = [0, 64], sizes = [16, 32], strides = [1, 1]} : vector<16x128xf32> to vector<16x32xf32>
    %222 = vector.extract_strided_slice %218 {offsets = [0, 96], sizes = [16, 32], strides = [1, 1]} : vector<16x128xf32> to vector<16x32xf32>
    %c0_130 = arith.constant 0 : index
    %c0_131 = arith.constant 0 : index
    %223 = vector.load %arg9[%c0_130, %c0_131] : memref<16x32xf32, #tpu.memory_space<vmem>>, vector<16x32xf32>
    %224 = arith.mulf %220, %223 : vector<16x32xf32>
    %225 = arith.mulf %219, %221 : vector<16x32xf32>
    %226 = arith.addf %224, %225 : vector<16x32xf32>
    %227 = math.tanh %226 : vector<16x32xf32>
    %228 = arith.mulf %222, %227 : vector<16x32xf32>
    %c0_132 = arith.constant 0 : index
    %c0_133 = arith.constant 0 : index
    %229 = vector.load %arg9[%c0_132, %c0_133] : memref<16x32xf32, #tpu.memory_space<vmem>>, vector<16x32xf32>
    tpu.vector_store %arg9[%c0_132, %c0_133], %226 {strides = array<i32>} : memref<16x32xf32, #tpu.memory_space<vmem>>, vector<16x32xf32>,
    %c0_134 = arith.constant 0 : index
    %c0_135 = arith.constant 0 : index
    %230 = vector.load %arg8[%c0_134, %c0_135] : memref<16x32xf32, #tpu.memory_space<vmem>>, vector<16x32xf32>
    tpu.vector_store %arg8[%c0_134, %c0_135], %228 {strides = array<i32>} : memref<16x32xf32, #tpu.memory_space<vmem>>, vector<16x32xf32>,
    %231 = vector.broadcast %c5_i32 : i32 to vector<16x1xi32>
    %232 = arith.cmpi eq, %15, %231 : vector<16x1xi32>
    %c0_136 = arith.constant 0 : index
    %c0_137 = arith.constant 0 : index
    %233 = vector.load %arg6[%c0_136, %c0_137] : memref<16x32xf32, #tpu.memory_space<vmem>>, vector<16x32xf32>
    %234 = vector.shape_cast %232 : vector<16x1xi1> to vector<16x1xi1>
    %235 = vector.broadcast %234 : vector<16x1xi1> to vector<16x32xi1>
    %236 = arith.select %235, %228, %233 : vector<16x32xi1>, vector<16x32xf32>
    %c0_138 = arith.constant 0 : index
    %c0_139 = arith.constant 0 : index
    %237 = vector.load %arg6[%c0_138, %c0_139] : memref<16x32xf32, #tpu.memory_space<vmem>>, vector<16x32xf32>
    tpu.vector_store %arg6[%c0_138, %c0_139], %236 {strides = array<i32>} : memref<16x32xf32, #tpu.memory_space<vmem>>, vector<16x32xf32>,
    %c6_i32 = arith.constant 6 : i32
    %238 = arith.index_cast %c6_i32 : i32 to index
    %c0_140 = arith.constant 0 : index
    %c0_141 = arith.constant 0 : index
    %239 = vector.load %arg7[%238, %c0_140, %c0_141] : memref<8x16x128xf32, #tpu.memory_space<vmem>>, vector<1x16x128xf32>
    %240 = vector.shape_cast %239 : vector<1x16x128xf32> to vector<16x128xf32>
    %c0_142 = arith.constant 0 : index
    %c0_143 = arith.constant 0 : index
    %241 = vector.load %arg8[%c0_142, %c0_143] : memref<16x32xf32, #tpu.memory_space<vmem>>, vector<16x32xf32>
    %242 = arith.truncf %241 : vector<16x32xf32> to vector<16x32xbf16>
    %c0_144 = arith.constant 0 : index
    %c0_145 = arith.constant 0 : index
    %243 = vector.load %arg3[%c0_144, %c0_145] : memref<32x128xbf16, #tpu.memory_space<vmem>>, vector<32x128xbf16>
    %cst_146 = arith.constant dense<0.000000e+00> : vector<16x128xf32>
    %244 = tpu.matmul %242, %243, %cst_146 {dimension_numbers = #tpu.dot_dimension_numbers<[1], [0], [0], [1], [0, 0, 1, 1], [], []>} : vector<16x32xbf16>, vector<32x128xbf16>, vector<16x128xf32> -> vector<16x128xf32>
    %245 = arith.addf %240, %244 : vector<16x128xf32>
    %cst_147 = arith.constant 5.000000e-01 : f32
    %246 = vector.broadcast %cst_147 : f32 to vector<16x128xf32>
    %247 = arith.mulf %246, %245 : vector<16x128xf32>
    %248 = arith.select %21, %245, %247 : vector<16x128xi1>, vector<16x128xf32>
    %249 = math.tanh %248 : vector<16x128xf32>
    %cst_148 = arith.constant 5.000000e-01 : f32
    %250 = vector.broadcast %cst_148 : f32 to vector<16x128xf32>
    %251 = arith.mulf %250, %249 : vector<16x128xf32>
    %cst_149 = arith.constant 5.000000e-01 : f32
    %252 = vector.broadcast %cst_149 : f32 to vector<16x128xf32>
    %253 = arith.addf %251, %252 : vector<16x128xf32>
    %254 = arith.select %21, %249, %253 : vector<16x128xi1>, vector<16x128xf32>
    %255 = vector.extract_strided_slice %254 {offsets = [0, 0], sizes = [16, 32], strides = [1, 1]} : vector<16x128xf32> to vector<16x32xf32>
    %256 = vector.extract_strided_slice %254 {offsets = [0, 32], sizes = [16, 32], strides = [1, 1]} : vector<16x128xf32> to vector<16x32xf32>
    %257 = vector.extract_strided_slice %254 {offsets = [0, 64], sizes = [16, 32], strides = [1, 1]} : vector<16x128xf32> to vector<16x32xf32>
    %258 = vector.extract_strided_slice %254 {offsets = [0, 96], sizes = [16, 32], strides = [1, 1]} : vector<16x128xf32> to vector<16x32xf32>
    %c0_150 = arith.constant 0 : index
    %c0_151 = arith.constant 0 : index
    %259 = vector.load %arg9[%c0_150, %c0_151] : memref<16x32xf32, #tpu.memory_space<vmem>>, vector<16x32xf32>
    %260 = arith.mulf %256, %259 : vector<16x32xf32>
    %261 = arith.mulf %255, %257 : vector<16x32xf32>
    %262 = arith.addf %260, %261 : vector<16x32xf32>
    %263 = math.tanh %262 : vector<16x32xf32>
    %264 = arith.mulf %258, %263 : vector<16x32xf32>
    %c0_152 = arith.constant 0 : index
    %c0_153 = arith.constant 0 : index
    %265 = vector.load %arg9[%c0_152, %c0_153] : memref<16x32xf32, #tpu.memory_space<vmem>>, vector<16x32xf32>
    tpu.vector_store %arg9[%c0_152, %c0_153], %262 {strides = array<i32>} : memref<16x32xf32, #tpu.memory_space<vmem>>, vector<16x32xf32>,
    %c0_154 = arith.constant 0 : index
    %c0_155 = arith.constant 0 : index
    %266 = vector.load %arg8[%c0_154, %c0_155] : memref<16x32xf32, #tpu.memory_space<vmem>>, vector<16x32xf32>
    tpu.vector_store %arg8[%c0_154, %c0_155], %264 {strides = array<i32>} : memref<16x32xf32, #tpu.memory_space<vmem>>, vector<16x32xf32>,
    %267 = vector.broadcast %c6_i32 : i32 to vector<16x1xi32>
    %268 = arith.cmpi eq, %15, %267 : vector<16x1xi32>
    %c0_156 = arith.constant 0 : index
    %c0_157 = arith.constant 0 : index
    %269 = vector.load %arg6[%c0_156, %c0_157] : memref<16x32xf32, #tpu.memory_space<vmem>>, vector<16x32xf32>
    %270 = vector.shape_cast %268 : vector<16x1xi1> to vector<16x1xi1>
    %271 = vector.broadcast %270 : vector<16x1xi1> to vector<16x32xi1>
    %272 = arith.select %271, %264, %269 : vector<16x32xi1>, vector<16x32xf32>
    %c0_158 = arith.constant 0 : index
    %c0_159 = arith.constant 0 : index
    %273 = vector.load %arg6[%c0_158, %c0_159] : memref<16x32xf32, #tpu.memory_space<vmem>>, vector<16x32xf32>
    tpu.vector_store %arg6[%c0_158, %c0_159], %272 {strides = array<i32>} : memref<16x32xf32, #tpu.memory_space<vmem>>, vector<16x32xf32>,
    %c7_i32 = arith.constant 7 : i32
    %274 = arith.index_cast %c7_i32 : i32 to index
    %c0_160 = arith.constant 0 : index
    %c0_161 = arith.constant 0 : index
    %275 = vector.load %arg7[%274, %c0_160, %c0_161] : memref<8x16x128xf32, #tpu.memory_space<vmem>>, vector<1x16x128xf32>
    %276 = vector.shape_cast %275 : vector<1x16x128xf32> to vector<16x128xf32>
    %c0_162 = arith.constant 0 : index
    %c0_163 = arith.constant 0 : index
    %277 = vector.load %arg8[%c0_162, %c0_163] : memref<16x32xf32, #tpu.memory_space<vmem>>, vector<16x32xf32>
    %278 = arith.truncf %277 : vector<16x32xf32> to vector<16x32xbf16>
    %c0_164 = arith.constant 0 : index
    %c0_165 = arith.constant 0 : index
    %279 = vector.load %arg3[%c0_164, %c0_165] : memref<32x128xbf16, #tpu.memory_space<vmem>>, vector<32x128xbf16>
    %cst_166 = arith.constant dense<0.000000e+00> : vector<16x128xf32>
    %280 = tpu.matmul %278, %279, %cst_166 {dimension_numbers = #tpu.dot_dimension_numbers<[1], [0], [0], [1], [0, 0, 1, 1], [], []>} : vector<16x32xbf16>, vector<32x128xbf16>, vector<16x128xf32> -> vector<16x128xf32>
    %281 = arith.addf %276, %280 : vector<16x128xf32>
    %cst_167 = arith.constant 5.000000e-01 : f32
    %282 = vector.broadcast %cst_167 : f32 to vector<16x128xf32>
    %283 = arith.mulf %282, %281 : vector<16x128xf32>
    %284 = arith.select %21, %281, %283 : vector<16x128xi1>, vector<16x128xf32>
    %285 = math.tanh %284 : vector<16x128xf32>
    %cst_168 = arith.constant 5.000000e-01 : f32
    %286 = vector.broadcast %cst_168 : f32 to vector<16x128xf32>
    %287 = arith.mulf %286, %285 : vector<16x128xf32>
    %cst_169 = arith.constant 5.000000e-01 : f32
    %288 = vector.broadcast %cst_169 : f32 to vector<16x128xf32>
    %289 = arith.addf %287, %288 : vector<16x128xf32>
    %290 = arith.select %21, %285, %289 : vector<16x128xi1>, vector<16x128xf32>
    %291 = vector.extract_strided_slice %290 {offsets = [0, 0], sizes = [16, 32], strides = [1, 1]} : vector<16x128xf32> to vector<16x32xf32>
    %292 = vector.extract_strided_slice %290 {offsets = [0, 32], sizes = [16, 32], strides = [1, 1]} : vector<16x128xf32> to vector<16x32xf32>
    %293 = vector.extract_strided_slice %290 {offsets = [0, 64], sizes = [16, 32], strides = [1, 1]} : vector<16x128xf32> to vector<16x32xf32>
    %294 = vector.extract_strided_slice %290 {offsets = [0, 96], sizes = [16, 32], strides = [1, 1]} : vector<16x128xf32> to vector<16x32xf32>
    %c0_170 = arith.constant 0 : index
    %c0_171 = arith.constant 0 : index
    %295 = vector.load %arg9[%c0_170, %c0_171] : memref<16x32xf32, #tpu.memory_space<vmem>>, vector<16x32xf32>
    %296 = arith.mulf %292, %295 : vector<16x32xf32>
    %297 = arith.mulf %291, %293 : vector<16x32xf32>
    %298 = arith.addf %296, %297 : vector<16x32xf32>
    %299 = math.tanh %298 : vector<16x32xf32>
    %300 = arith.mulf %294, %299 : vector<16x32xf32>
    %c0_172 = arith.constant 0 : index
    %c0_173 = arith.constant 0 : index
    %301 = vector.load %arg9[%c0_172, %c0_173] : memref<16x32xf32, #tpu.memory_space<vmem>>, vector<16x32xf32>
    tpu.vector_store %arg9[%c0_172, %c0_173], %298 {strides = array<i32>} : memref<16x32xf32, #tpu.memory_space<vmem>>, vector<16x32xf32>,
    %c0_174 = arith.constant 0 : index
    %c0_175 = arith.constant 0 : index
    %302 = vector.load %arg8[%c0_174, %c0_175] : memref<16x32xf32, #tpu.memory_space<vmem>>, vector<16x32xf32>
    tpu.vector_store %arg8[%c0_174, %c0_175], %300 {strides = array<i32>} : memref<16x32xf32, #tpu.memory_space<vmem>>, vector<16x32xf32>,
    %303 = vector.broadcast %c7_i32 : i32 to vector<16x1xi32>
    %304 = arith.cmpi eq, %15, %303 : vector<16x1xi32>
    %c0_176 = arith.constant 0 : index
    %c0_177 = arith.constant 0 : index
    %305 = vector.load %arg6[%c0_176, %c0_177] : memref<16x32xf32, #tpu.memory_space<vmem>>, vector<16x32xf32>
    %306 = vector.shape_cast %304 : vector<16x1xi1> to vector<16x1xi1>
    %307 = vector.broadcast %306 : vector<16x1xi1> to vector<16x32xi1>
    %308 = arith.select %307, %300, %305 : vector<16x32xi1>, vector<16x32xf32>
    %c0_178 = arith.constant 0 : index
    %c0_179 = arith.constant 0 : index
    %309 = vector.load %arg6[%c0_178, %c0_179] : memref<16x32xf32, #tpu.memory_space<vmem>>, vector<16x32xf32>
    tpu.vector_store %arg6[%c0_178, %c0_179], %308 {strides = array<i32>} : memref<16x32xf32, #tpu.memory_space<vmem>>, vector<16x32xf32>,
    %c8_i32 = arith.constant 8 : i32
    return
  }
  func.func @transform_0(%arg0: i32) -> (i32, i32, i32) {
    %c0_i32 = arith.constant 0 : i32
    %c0_i32_0 = arith.constant 0 : i32
    %c0_i32_1 = arith.constant 0 : i32
    return %c0_i32, %arg0, %c0_i32_0 : i32, i32, i32
  }
  func.func @transform_1(%arg0: i32) -> (i32, i32) {
    %c0_i32 = arith.constant 0 : i32
    %c0_i32_0 = arith.constant 0 : i32
    %c0_i32_1 = arith.constant 0 : i32
    return %c0_i32, %c0_i32_0 : i32, i32
  }
  func.func @transform_2(%arg0: i32) -> (i32, i32) {
    %c0_i32 = arith.constant 0 : i32
    %c0_i32_0 = arith.constant 0 : i32
    %c0_i32_1 = arith.constant 0 : i32
    return %c0_i32, %c0_i32_0 : i32, i32
  }
  func.func @transform_3(%arg0: i32) -> (i32, i32) {
    %c0_i32 = arith.constant 0 : i32
    %c0_i32_0 = arith.constant 0 : i32
    %c0_i32_1 = arith.constant 0 : i32
    return %c0_i32, %c0_i32_0 : i32, i32
  }
  func.func @transform_4(%arg0: i32) -> (i32, i32) {
    %c0_i32 = arith.constant 0 : i32
    %c0_i32_0 = arith.constant 0 : i32
    return %arg0, %c0_i32 : i32, i32
  }
  func.func @transform_5(%arg0: i32) -> (i32, i32) {
    %c0_i32 = arith.constant 0 : i32
    %c0_i32_0 = arith.constant 0 : i32
    return %arg0, %c0_i32 : i32, i32
  }
}

module attributes {stable_mosaic.version = 11 : i64} {
  func.func @_lstm_head_kernel(%arg0: i32, %arg1: memref<4x16x32xbf16, #tpu.memory_space<vmem>>, %arg2: memref<32x128xbf16, #tpu.memory_space<vmem>>, %arg3: memref<32x128xbf16, #tpu.memory_space<vmem>>, %arg4: memref<1x128xf32, #tpu.memory_space<vmem>>, %arg5: memref<16x1xi32, #tpu.memory_space<vmem>>, %arg6: memref<32x1xf32, #tpu.memory_space<vmem>>, %arg7: memref<1x1xf32, #tpu.memory_space<vmem>>, %arg8: memref<16x1xf32, #tpu.memory_space<vmem>>, %arg9: memref<4x16x128xf32, #tpu.memory_space<vmem>>, %arg10: memref<16x32xf32, #tpu.memory_space<vmem>>, %arg11: memref<16x32xf32, #tpu.memory_space<vmem>>, %arg12: memref<16x32xf32, #tpu.memory_space<vmem>>) attributes {dimension_semantics = [#tpu.dimension_semantics<parallel>], iteration_bounds = array<i64: 1>, scalar_prefetch = 0 : i64, scratch_operands = 4 : i64, tpu.core_type = #tpu.core_type<tc>, window_params = [{transform_indices = @transform_0, window_bounds = array<i64: 4, 16, 32>}, {pipeline_mode = #tpu.pipeline_mode<synchronous>, transform_indices = @transform_1, window_bounds = array<i64: 32, 128>}, {pipeline_mode = #tpu.pipeline_mode<synchronous>, transform_indices = @transform_2, window_bounds = array<i64: 32, 128>}, {pipeline_mode = #tpu.pipeline_mode<synchronous>, transform_indices = @transform_3, window_bounds = array<i64: 1, 128>}, {transform_indices = @transform_4, window_bounds = array<i64: 16, 1>}, {pipeline_mode = #tpu.pipeline_mode<synchronous>, transform_indices = @transform_5, window_bounds = array<i64: 32, 1>}, {pipeline_mode = #tpu.pipeline_mode<synchronous>, transform_indices = @transform_6, window_bounds = array<i64: 1, 1>}, {transform_indices = @transform_7, window_bounds = array<i64: 16, 1>}]} {
    %c0 = arith.constant 0 : index
    %c0_0 = arith.constant 0 : index
    %c0_1 = arith.constant 0 : index
    %0 = vector.load %arg1[%c0, %c0_0, %c0_1] : memref<4x16x32xbf16, #tpu.memory_space<vmem>>, vector<4x16x32xbf16>
    %1 = vector.shape_cast %0 : vector<4x16x32xbf16> to vector<64x32xbf16>
    %c0_2 = arith.constant 0 : index
    %c0_3 = arith.constant 0 : index
    %2 = vector.load %arg2[%c0_2, %c0_3] : memref<32x128xbf16, #tpu.memory_space<vmem>>, vector<32x128xbf16>
    %cst = arith.constant dense<0.000000e+00> : vector<64x128xf32>
    %3 = tpu.matmul %1, %2, %cst {dimension_numbers = #tpu.dot_dimension_numbers<[1], [0], [0], [1], [0, 0, 1, 1], [], []>} : vector<64x32xbf16>, vector<32x128xbf16>, vector<64x128xf32> -> vector<64x128xf32>
    %c0_4 = arith.constant 0 : index
    %c0_5 = arith.constant 0 : index
    %4 = vector.load %arg4[%c0_4, %c0_5] : memref<1x128xf32, #tpu.memory_space<vmem>>, vector<1x128xf32>
    %5 = vector.broadcast %4 : vector<1x128xf32> to vector<64x128xf32>
    %6 = arith.addf %3, %5 : vector<64x128xf32>
    %7 = vector.shape_cast %6 : vector<64x128xf32> to vector<4x16x128xf32>
    %c0_6 = arith.constant 0 : index
    %c0_7 = arith.constant 0 : index
    %c0_8 = arith.constant 0 : index
    %8 = vector.load %arg9[%c0_6, %c0_7, %c0_8] : memref<4x16x128xf32, #tpu.memory_space<vmem>>, vector<4x16x128xf32>
    tpu.vector_store %arg9[%c0_6, %c0_7, %c0_8], %7 {strides = array<i32>} : memref<4x16x128xf32, #tpu.memory_space<vmem>>, vector<4x16x128xf32>,
    %cst_9 = arith.constant 0.000000e+00 : f32
    %9 = vector.broadcast %cst_9 : f32 to vector<16x32xf32>
    %c0_10 = arith.constant 0 : index
    %c0_11 = arith.constant 0 : index
    %10 = vector.load %arg10[%c0_10, %c0_11] : memref<16x32xf32, #tpu.memory_space<vmem>>, vector<16x32xf32>
    tpu.vector_store %arg10[%c0_10, %c0_11], %9 {strides = array<i32>} : memref<16x32xf32, #tpu.memory_space<vmem>>, vector<16x32xf32>,
    %cst_12 = arith.constant 0.000000e+00 : f32
    %11 = vector.broadcast %cst_12 : f32 to vector<16x32xf32>
    %c0_13 = arith.constant 0 : index
    %c0_14 = arith.constant 0 : index
    %12 = vector.load %arg11[%c0_13, %c0_14] : memref<16x32xf32, #tpu.memory_space<vmem>>, vector<16x32xf32>
    tpu.vector_store %arg11[%c0_13, %c0_14], %11 {strides = array<i32>} : memref<16x32xf32, #tpu.memory_space<vmem>>, vector<16x32xf32>,
    %cst_15 = arith.constant 0.000000e+00 : f32
    %13 = vector.broadcast %cst_15 : f32 to vector<16x32xf32>
    %c0_16 = arith.constant 0 : index
    %c0_17 = arith.constant 0 : index
    %14 = vector.load %arg12[%c0_16, %c0_17] : memref<16x32xf32, #tpu.memory_space<vmem>>, vector<16x32xf32>
    tpu.vector_store %arg12[%c0_16, %c0_17], %13 {strides = array<i32>} : memref<16x32xf32, #tpu.memory_space<vmem>>, vector<16x32xf32>,
    %c0_18 = arith.constant 0 : index
    %c0_19 = arith.constant 0 : index
    %15 = vector.load %arg5[%c0_18, %c0_19] : memref<16x1xi32, #tpu.memory_space<vmem>>, vector<16x1xi32>
    %16 = tpu.iota {dimensions = array<i32: 1>} : vector<16x128xi32>
    %c64_i32 = arith.constant 64 : i32
    %17 = vector.broadcast %c64_i32 : i32 to vector<16x128xi32>
    %18 = arith.cmpi sge, %16, %17 : vector<16x128xi32>
    %c96_i32 = arith.constant 96 : i32
    %19 = vector.broadcast %c96_i32 : i32 to vector<16x128xi32>
    %20 = arith.cmpi slt, %16, %19 : vector<16x128xi32>
    %21 = arith.andi %18, %20 : vector<16x128xi1>
    %c0_i32 = arith.constant 0 : i32
    %22 = arith.index_cast %c0_i32 : i32 to index
    %c0_20 = arith.constant 0 : index
    %c0_21 = arith.constant 0 : index
    %23 = vector.load %arg9[%22, %c0_20, %c0_21] : memref<4x16x128xf32, #tpu.memory_space<vmem>>, vector<1x16x128xf32>
    %24 = vector.shape_cast %23 : vector<1x16x128xf32> to vector<16x128xf32>
    %c0_22 = arith.constant 0 : index
    %c0_23 = arith.constant 0 : index
    %25 = vector.load %arg10[%c0_22, %c0_23] : memref<16x32xf32, #tpu.memory_space<vmem>>, vector<16x32xf32>
    %26 = arith.truncf %25 : vector<16x32xf32> to vector<16x32xbf16>
    %c0_24 = arith.constant 0 : index
    %c0_25 = arith.constant 0 : index
    %27 = vector.load %arg3[%c0_24, %c0_25] : memref<32x128xbf16, #tpu.memory_space<vmem>>, vector<32x128xbf16>
    %cst_26 = arith.constant dense<0.000000e+00> : vector<16x128xf32>
    %28 = tpu.matmul %26, %27, %cst_26 {dimension_numbers = #tpu.dot_dimension_numbers<[1], [0], [0], [1], [0, 0, 1, 1], [], []>} : vector<16x32xbf16>, vector<32x128xbf16>, vector<16x128xf32> -> vector<16x128xf32>
    %29 = arith.addf %24, %28 : vector<16x128xf32>
    %cst_27 = arith.constant 5.000000e-01 : f32
    %30 = vector.broadcast %cst_27 : f32 to vector<16x128xf32>
    %31 = arith.mulf %30, %29 : vector<16x128xf32>
    %32 = arith.select %21, %29, %31 : vector<16x128xi1>, vector<16x128xf32>
    %33 = math.tanh %32 : vector<16x128xf32>
    %cst_28 = arith.constant 5.000000e-01 : f32
    %34 = vector.broadcast %cst_28 : f32 to vector<16x128xf32>
    %35 = arith.mulf %34, %33 : vector<16x128xf32>
    %cst_29 = arith.constant 5.000000e-01 : f32
    %36 = vector.broadcast %cst_29 : f32 to vector<16x128xf32>
    %37 = arith.addf %35, %36 : vector<16x128xf32>
    %38 = arith.select %21, %33, %37 : vector<16x128xi1>, vector<16x128xf32>
    %39 = vector.extract_strided_slice %38 {offsets = [0, 0], sizes = [16, 32], strides = [1, 1]} : vector<16x128xf32> to vector<16x32xf32>
    %40 = vector.extract_strided_slice %38 {offsets = [0, 32], sizes = [16, 32], strides = [1, 1]} : vector<16x128xf32> to vector<16x32xf32>
    %41 = vector.extract_strided_slice %38 {offsets = [0, 64], sizes = [16, 32], strides = [1, 1]} : vector<16x128xf32> to vector<16x32xf32>
    %42 = vector.extract_strided_slice %38 {offsets = [0, 96], sizes = [16, 32], strides = [1, 1]} : vector<16x128xf32> to vector<16x32xf32>
    %c0_30 = arith.constant 0 : index
    %c0_31 = arith.constant 0 : index
    %43 = vector.load %arg11[%c0_30, %c0_31] : memref<16x32xf32, #tpu.memory_space<vmem>>, vector<16x32xf32>
    %44 = arith.mulf %40, %43 : vector<16x32xf32>
    %45 = arith.mulf %39, %41 : vector<16x32xf32>
    %46 = arith.addf %44, %45 : vector<16x32xf32>
    %47 = math.tanh %46 : vector<16x32xf32>
    %48 = arith.mulf %42, %47 : vector<16x32xf32>
    %c0_32 = arith.constant 0 : index
    %c0_33 = arith.constant 0 : index
    %49 = vector.load %arg11[%c0_32, %c0_33] : memref<16x32xf32, #tpu.memory_space<vmem>>, vector<16x32xf32>
    tpu.vector_store %arg11[%c0_32, %c0_33], %46 {strides = array<i32>} : memref<16x32xf32, #tpu.memory_space<vmem>>, vector<16x32xf32>,
    %c0_34 = arith.constant 0 : index
    %c0_35 = arith.constant 0 : index
    %50 = vector.load %arg10[%c0_34, %c0_35] : memref<16x32xf32, #tpu.memory_space<vmem>>, vector<16x32xf32>
    tpu.vector_store %arg10[%c0_34, %c0_35], %48 {strides = array<i32>} : memref<16x32xf32, #tpu.memory_space<vmem>>, vector<16x32xf32>,
    %51 = vector.broadcast %c0_i32 : i32 to vector<16x1xi32>
    %52 = arith.cmpi eq, %15, %51 : vector<16x1xi32>
    %c0_36 = arith.constant 0 : index
    %c0_37 = arith.constant 0 : index
    %53 = vector.load %arg12[%c0_36, %c0_37] : memref<16x32xf32, #tpu.memory_space<vmem>>, vector<16x32xf32>
    %54 = vector.shape_cast %52 : vector<16x1xi1> to vector<16x1xi1>
    %55 = vector.broadcast %54 : vector<16x1xi1> to vector<16x32xi1>
    %56 = arith.select %55, %48, %53 : vector<16x32xi1>, vector<16x32xf32>
    %c0_38 = arith.constant 0 : index
    %c0_39 = arith.constant 0 : index
    %57 = vector.load %arg12[%c0_38, %c0_39] : memref<16x32xf32, #tpu.memory_space<vmem>>, vector<16x32xf32>
    tpu.vector_store %arg12[%c0_38, %c0_39], %56 {strides = array<i32>} : memref<16x32xf32, #tpu.memory_space<vmem>>, vector<16x32xf32>,
    %c1_i32 = arith.constant 1 : i32
    %58 = arith.index_cast %c1_i32 : i32 to index
    %c0_40 = arith.constant 0 : index
    %c0_41 = arith.constant 0 : index
    %59 = vector.load %arg9[%58, %c0_40, %c0_41] : memref<4x16x128xf32, #tpu.memory_space<vmem>>, vector<1x16x128xf32>
    %60 = vector.shape_cast %59 : vector<1x16x128xf32> to vector<16x128xf32>
    %c0_42 = arith.constant 0 : index
    %c0_43 = arith.constant 0 : index
    %61 = vector.load %arg10[%c0_42, %c0_43] : memref<16x32xf32, #tpu.memory_space<vmem>>, vector<16x32xf32>
    %62 = arith.truncf %61 : vector<16x32xf32> to vector<16x32xbf16>
    %c0_44 = arith.constant 0 : index
    %c0_45 = arith.constant 0 : index
    %63 = vector.load %arg3[%c0_44, %c0_45] : memref<32x128xbf16, #tpu.memory_space<vmem>>, vector<32x128xbf16>
    %cst_46 = arith.constant dense<0.000000e+00> : vector<16x128xf32>
    %64 = tpu.matmul %62, %63, %cst_46 {dimension_numbers = #tpu.dot_dimension_numbers<[1], [0], [0], [1], [0, 0, 1, 1], [], []>} : vector<16x32xbf16>, vector<32x128xbf16>, vector<16x128xf32> -> vector<16x128xf32>
    %65 = arith.addf %60, %64 : vector<16x128xf32>
    %cst_47 = arith.constant 5.000000e-01 : f32
    %66 = vector.broadcast %cst_47 : f32 to vector<16x128xf32>
    %67 = arith.mulf %66, %65 : vector<16x128xf32>
    %68 = arith.select %21, %65, %67 : vector<16x128xi1>, vector<16x128xf32>
    %69 = math.tanh %68 : vector<16x128xf32>
    %cst_48 = arith.constant 5.000000e-01 : f32
    %70 = vector.broadcast %cst_48 : f32 to vector<16x128xf32>
    %71 = arith.mulf %70, %69 : vector<16x128xf32>
    %cst_49 = arith.constant 5.000000e-01 : f32
    %72 = vector.broadcast %cst_49 : f32 to vector<16x128xf32>
    %73 = arith.addf %71, %72 : vector<16x128xf32>
    %74 = arith.select %21, %69, %73 : vector<16x128xi1>, vector<16x128xf32>
    %75 = vector.extract_strided_slice %74 {offsets = [0, 0], sizes = [16, 32], strides = [1, 1]} : vector<16x128xf32> to vector<16x32xf32>
    %76 = vector.extract_strided_slice %74 {offsets = [0, 32], sizes = [16, 32], strides = [1, 1]} : vector<16x128xf32> to vector<16x32xf32>
    %77 = vector.extract_strided_slice %74 {offsets = [0, 64], sizes = [16, 32], strides = [1, 1]} : vector<16x128xf32> to vector<16x32xf32>
    %78 = vector.extract_strided_slice %74 {offsets = [0, 96], sizes = [16, 32], strides = [1, 1]} : vector<16x128xf32> to vector<16x32xf32>
    %c0_50 = arith.constant 0 : index
    %c0_51 = arith.constant 0 : index
    %79 = vector.load %arg11[%c0_50, %c0_51] : memref<16x32xf32, #tpu.memory_space<vmem>>, vector<16x32xf32>
    %80 = arith.mulf %76, %79 : vector<16x32xf32>
    %81 = arith.mulf %75, %77 : vector<16x32xf32>
    %82 = arith.addf %80, %81 : vector<16x32xf32>
    %83 = math.tanh %82 : vector<16x32xf32>
    %84 = arith.mulf %78, %83 : vector<16x32xf32>
    %c0_52 = arith.constant 0 : index
    %c0_53 = arith.constant 0 : index
    %85 = vector.load %arg11[%c0_52, %c0_53] : memref<16x32xf32, #tpu.memory_space<vmem>>, vector<16x32xf32>
    tpu.vector_store %arg11[%c0_52, %c0_53], %82 {strides = array<i32>} : memref<16x32xf32, #tpu.memory_space<vmem>>, vector<16x32xf32>,
    %c0_54 = arith.constant 0 : index
    %c0_55 = arith.constant 0 : index
    %86 = vector.load %arg10[%c0_54, %c0_55] : memref<16x32xf32, #tpu.memory_space<vmem>>, vector<16x32xf32>
    tpu.vector_store %arg10[%c0_54, %c0_55], %84 {strides = array<i32>} : memref<16x32xf32, #tpu.memory_space<vmem>>, vector<16x32xf32>,
    %87 = vector.broadcast %c1_i32 : i32 to vector<16x1xi32>
    %88 = arith.cmpi eq, %15, %87 : vector<16x1xi32>
    %c0_56 = arith.constant 0 : index
    %c0_57 = arith.constant 0 : index
    %89 = vector.load %arg12[%c0_56, %c0_57] : memref<16x32xf32, #tpu.memory_space<vmem>>, vector<16x32xf32>
    %90 = vector.shape_cast %88 : vector<16x1xi1> to vector<16x1xi1>
    %91 = vector.broadcast %90 : vector<16x1xi1> to vector<16x32xi1>
    %92 = arith.select %91, %84, %89 : vector<16x32xi1>, vector<16x32xf32>
    %c0_58 = arith.constant 0 : index
    %c0_59 = arith.constant 0 : index
    %93 = vector.load %arg12[%c0_58, %c0_59] : memref<16x32xf32, #tpu.memory_space<vmem>>, vector<16x32xf32>
    tpu.vector_store %arg12[%c0_58, %c0_59], %92 {strides = array<i32>} : memref<16x32xf32, #tpu.memory_space<vmem>>, vector<16x32xf32>,
    %c2_i32 = arith.constant 2 : i32
    %94 = arith.index_cast %c2_i32 : i32 to index
    %c0_60 = arith.constant 0 : index
    %c0_61 = arith.constant 0 : index
    %95 = vector.load %arg9[%94, %c0_60, %c0_61] : memref<4x16x128xf32, #tpu.memory_space<vmem>>, vector<1x16x128xf32>
    %96 = vector.shape_cast %95 : vector<1x16x128xf32> to vector<16x128xf32>
    %c0_62 = arith.constant 0 : index
    %c0_63 = arith.constant 0 : index
    %97 = vector.load %arg10[%c0_62, %c0_63] : memref<16x32xf32, #tpu.memory_space<vmem>>, vector<16x32xf32>
    %98 = arith.truncf %97 : vector<16x32xf32> to vector<16x32xbf16>
    %c0_64 = arith.constant 0 : index
    %c0_65 = arith.constant 0 : index
    %99 = vector.load %arg3[%c0_64, %c0_65] : memref<32x128xbf16, #tpu.memory_space<vmem>>, vector<32x128xbf16>
    %cst_66 = arith.constant dense<0.000000e+00> : vector<16x128xf32>
    %100 = tpu.matmul %98, %99, %cst_66 {dimension_numbers = #tpu.dot_dimension_numbers<[1], [0], [0], [1], [0, 0, 1, 1], [], []>} : vector<16x32xbf16>, vector<32x128xbf16>, vector<16x128xf32> -> vector<16x128xf32>
    %101 = arith.addf %96, %100 : vector<16x128xf32>
    %cst_67 = arith.constant 5.000000e-01 : f32
    %102 = vector.broadcast %cst_67 : f32 to vector<16x128xf32>
    %103 = arith.mulf %102, %101 : vector<16x128xf32>
    %104 = arith.select %21, %101, %103 : vector<16x128xi1>, vector<16x128xf32>
    %105 = math.tanh %104 : vector<16x128xf32>
    %cst_68 = arith.constant 5.000000e-01 : f32
    %106 = vector.broadcast %cst_68 : f32 to vector<16x128xf32>
    %107 = arith.mulf %106, %105 : vector<16x128xf32>
    %cst_69 = arith.constant 5.000000e-01 : f32
    %108 = vector.broadcast %cst_69 : f32 to vector<16x128xf32>
    %109 = arith.addf %107, %108 : vector<16x128xf32>
    %110 = arith.select %21, %105, %109 : vector<16x128xi1>, vector<16x128xf32>
    %111 = vector.extract_strided_slice %110 {offsets = [0, 0], sizes = [16, 32], strides = [1, 1]} : vector<16x128xf32> to vector<16x32xf32>
    %112 = vector.extract_strided_slice %110 {offsets = [0, 32], sizes = [16, 32], strides = [1, 1]} : vector<16x128xf32> to vector<16x32xf32>
    %113 = vector.extract_strided_slice %110 {offsets = [0, 64], sizes = [16, 32], strides = [1, 1]} : vector<16x128xf32> to vector<16x32xf32>
    %114 = vector.extract_strided_slice %110 {offsets = [0, 96], sizes = [16, 32], strides = [1, 1]} : vector<16x128xf32> to vector<16x32xf32>
    %c0_70 = arith.constant 0 : index
    %c0_71 = arith.constant 0 : index
    %115 = vector.load %arg11[%c0_70, %c0_71] : memref<16x32xf32, #tpu.memory_space<vmem>>, vector<16x32xf32>
    %116 = arith.mulf %112, %115 : vector<16x32xf32>
    %117 = arith.mulf %111, %113 : vector<16x32xf32>
    %118 = arith.addf %116, %117 : vector<16x32xf32>
    %119 = math.tanh %118 : vector<16x32xf32>
    %120 = arith.mulf %114, %119 : vector<16x32xf32>
    %c0_72 = arith.constant 0 : index
    %c0_73 = arith.constant 0 : index
    %121 = vector.load %arg11[%c0_72, %c0_73] : memref<16x32xf32, #tpu.memory_space<vmem>>, vector<16x32xf32>
    tpu.vector_store %arg11[%c0_72, %c0_73], %118 {strides = array<i32>} : memref<16x32xf32, #tpu.memory_space<vmem>>, vector<16x32xf32>,
    %c0_74 = arith.constant 0 : index
    %c0_75 = arith.constant 0 : index
    %122 = vector.load %arg10[%c0_74, %c0_75] : memref<16x32xf32, #tpu.memory_space<vmem>>, vector<16x32xf32>
    tpu.vector_store %arg10[%c0_74, %c0_75], %120 {strides = array<i32>} : memref<16x32xf32, #tpu.memory_space<vmem>>, vector<16x32xf32>,
    %123 = vector.broadcast %c2_i32 : i32 to vector<16x1xi32>
    %124 = arith.cmpi eq, %15, %123 : vector<16x1xi32>
    %c0_76 = arith.constant 0 : index
    %c0_77 = arith.constant 0 : index
    %125 = vector.load %arg12[%c0_76, %c0_77] : memref<16x32xf32, #tpu.memory_space<vmem>>, vector<16x32xf32>
    %126 = vector.shape_cast %124 : vector<16x1xi1> to vector<16x1xi1>
    %127 = vector.broadcast %126 : vector<16x1xi1> to vector<16x32xi1>
    %128 = arith.select %127, %120, %125 : vector<16x32xi1>, vector<16x32xf32>
    %c0_78 = arith.constant 0 : index
    %c0_79 = arith.constant 0 : index
    %129 = vector.load %arg12[%c0_78, %c0_79] : memref<16x32xf32, #tpu.memory_space<vmem>>, vector<16x32xf32>
    tpu.vector_store %arg12[%c0_78, %c0_79], %128 {strides = array<i32>} : memref<16x32xf32, #tpu.memory_space<vmem>>, vector<16x32xf32>,
    %c3_i32 = arith.constant 3 : i32
    %130 = arith.index_cast %c3_i32 : i32 to index
    %c0_80 = arith.constant 0 : index
    %c0_81 = arith.constant 0 : index
    %131 = vector.load %arg9[%130, %c0_80, %c0_81] : memref<4x16x128xf32, #tpu.memory_space<vmem>>, vector<1x16x128xf32>
    %132 = vector.shape_cast %131 : vector<1x16x128xf32> to vector<16x128xf32>
    %c0_82 = arith.constant 0 : index
    %c0_83 = arith.constant 0 : index
    %133 = vector.load %arg10[%c0_82, %c0_83] : memref<16x32xf32, #tpu.memory_space<vmem>>, vector<16x32xf32>
    %134 = arith.truncf %133 : vector<16x32xf32> to vector<16x32xbf16>
    %c0_84 = arith.constant 0 : index
    %c0_85 = arith.constant 0 : index
    %135 = vector.load %arg3[%c0_84, %c0_85] : memref<32x128xbf16, #tpu.memory_space<vmem>>, vector<32x128xbf16>
    %cst_86 = arith.constant dense<0.000000e+00> : vector<16x128xf32>
    %136 = tpu.matmul %134, %135, %cst_86 {dimension_numbers = #tpu.dot_dimension_numbers<[1], [0], [0], [1], [0, 0, 1, 1], [], []>} : vector<16x32xbf16>, vector<32x128xbf16>, vector<16x128xf32> -> vector<16x128xf32>
    %137 = arith.addf %132, %136 : vector<16x128xf32>
    %cst_87 = arith.constant 5.000000e-01 : f32
    %138 = vector.broadcast %cst_87 : f32 to vector<16x128xf32>
    %139 = arith.mulf %138, %137 : vector<16x128xf32>
    %140 = arith.select %21, %137, %139 : vector<16x128xi1>, vector<16x128xf32>
    %141 = math.tanh %140 : vector<16x128xf32>
    %cst_88 = arith.constant 5.000000e-01 : f32
    %142 = vector.broadcast %cst_88 : f32 to vector<16x128xf32>
    %143 = arith.mulf %142, %141 : vector<16x128xf32>
    %cst_89 = arith.constant 5.000000e-01 : f32
    %144 = vector.broadcast %cst_89 : f32 to vector<16x128xf32>
    %145 = arith.addf %143, %144 : vector<16x128xf32>
    %146 = arith.select %21, %141, %145 : vector<16x128xi1>, vector<16x128xf32>
    %147 = vector.extract_strided_slice %146 {offsets = [0, 0], sizes = [16, 32], strides = [1, 1]} : vector<16x128xf32> to vector<16x32xf32>
    %148 = vector.extract_strided_slice %146 {offsets = [0, 32], sizes = [16, 32], strides = [1, 1]} : vector<16x128xf32> to vector<16x32xf32>
    %149 = vector.extract_strided_slice %146 {offsets = [0, 64], sizes = [16, 32], strides = [1, 1]} : vector<16x128xf32> to vector<16x32xf32>
    %150 = vector.extract_strided_slice %146 {offsets = [0, 96], sizes = [16, 32], strides = [1, 1]} : vector<16x128xf32> to vector<16x32xf32>
    %c0_90 = arith.constant 0 : index
    %c0_91 = arith.constant 0 : index
    %151 = vector.load %arg11[%c0_90, %c0_91] : memref<16x32xf32, #tpu.memory_space<vmem>>, vector<16x32xf32>
    %152 = arith.mulf %148, %151 : vector<16x32xf32>
    %153 = arith.mulf %147, %149 : vector<16x32xf32>
    %154 = arith.addf %152, %153 : vector<16x32xf32>
    %155 = math.tanh %154 : vector<16x32xf32>
    %156 = arith.mulf %150, %155 : vector<16x32xf32>
    %c0_92 = arith.constant 0 : index
    %c0_93 = arith.constant 0 : index
    %157 = vector.load %arg11[%c0_92, %c0_93] : memref<16x32xf32, #tpu.memory_space<vmem>>, vector<16x32xf32>
    tpu.vector_store %arg11[%c0_92, %c0_93], %154 {strides = array<i32>} : memref<16x32xf32, #tpu.memory_space<vmem>>, vector<16x32xf32>,
    %c0_94 = arith.constant 0 : index
    %c0_95 = arith.constant 0 : index
    %158 = vector.load %arg10[%c0_94, %c0_95] : memref<16x32xf32, #tpu.memory_space<vmem>>, vector<16x32xf32>
    tpu.vector_store %arg10[%c0_94, %c0_95], %156 {strides = array<i32>} : memref<16x32xf32, #tpu.memory_space<vmem>>, vector<16x32xf32>,
    %159 = vector.broadcast %c3_i32 : i32 to vector<16x1xi32>
    %160 = arith.cmpi eq, %15, %159 : vector<16x1xi32>
    %c0_96 = arith.constant 0 : index
    %c0_97 = arith.constant 0 : index
    %161 = vector.load %arg12[%c0_96, %c0_97] : memref<16x32xf32, #tpu.memory_space<vmem>>, vector<16x32xf32>
    %162 = vector.shape_cast %160 : vector<16x1xi1> to vector<16x1xi1>
    %163 = vector.broadcast %162 : vector<16x1xi1> to vector<16x32xi1>
    %164 = arith.select %163, %156, %161 : vector<16x32xi1>, vector<16x32xf32>
    %c0_98 = arith.constant 0 : index
    %c0_99 = arith.constant 0 : index
    %165 = vector.load %arg12[%c0_98, %c0_99] : memref<16x32xf32, #tpu.memory_space<vmem>>, vector<16x32xf32>
    tpu.vector_store %arg12[%c0_98, %c0_99], %164 {strides = array<i32>} : memref<16x32xf32, #tpu.memory_space<vmem>>, vector<16x32xf32>,
    %c4_i32 = arith.constant 4 : i32
    %c0_100 = arith.constant 0 : index
    %c0_101 = arith.constant 0 : index
    %166 = vector.load %arg12[%c0_100, %c0_101] : memref<16x32xf32, #tpu.memory_space<vmem>>, vector<16x32xf32>
    %c0_102 = arith.constant 0 : index
    %c0_103 = arith.constant 0 : index
    %167 = vector.load %arg6[%c0_102, %c0_103] : memref<32x1xf32, #tpu.memory_space<vmem>>, vector<32x1xf32>
    %cst_104 = arith.constant dense<0.000000e+00> : vector<16x1xf32>
    %168 = tpu.matmul %166, %167, %cst_104 {dimension_numbers = #tpu.dot_dimension_numbers<[1], [0], [0], [1], [0, 0, 1, 1], [], []>} : vector<16x32xf32>, vector<32x1xf32>, vector<16x1xf32> -> vector<16x1xf32>
    %c0_105 = arith.constant 0 : index
    %c0_106 = arith.constant 0 : index
    %169 = vector.load %arg7[%c0_105, %c0_106] : memref<1x1xf32, #tpu.memory_space<vmem>>, vector<1x1xf32>
    %170 = vector.broadcast %169 : vector<1x1xf32> to vector<16x1xf32>
    %171 = arith.addf %168, %170 : vector<16x1xf32>
    %c0_107 = arith.constant 0 : index
    %c0_108 = arith.constant 0 : index
    %172 = vector.load %arg8[%c0_107, %c0_108] : memref<16x1xf32, #tpu.memory_space<vmem>>, vector<16x1xf32>
    tpu.vector_store %arg8[%c0_107, %c0_108], %171 {strides = array<i32>} : memref<16x1xf32, #tpu.memory_space<vmem>>, vector<16x1xf32>,
    return
  }
  func.func @transform_0(%arg0: i32) -> (i32, i32, i32) {
    %c0_i32 = arith.constant 0 : i32
    %c0_i32_0 = arith.constant 0 : i32
    %c0_i32_1 = arith.constant 0 : i32
    return %c0_i32, %arg0, %c0_i32_0 : i32, i32, i32
  }
  func.func @transform_1(%arg0: i32) -> (i32, i32) {
    %c0_i32 = arith.constant 0 : i32
    %c0_i32_0 = arith.constant 0 : i32
    %c0_i32_1 = arith.constant 0 : i32
    return %c0_i32, %c0_i32_0 : i32, i32
  }
  func.func @transform_2(%arg0: i32) -> (i32, i32) {
    %c0_i32 = arith.constant 0 : i32
    %c0_i32_0 = arith.constant 0 : i32
    %c0_i32_1 = arith.constant 0 : i32
    return %c0_i32, %c0_i32_0 : i32, i32
  }
  func.func @transform_3(%arg0: i32) -> (i32, i32) {
    %c0_i32 = arith.constant 0 : i32
    %c0_i32_0 = arith.constant 0 : i32
    %c0_i32_1 = arith.constant 0 : i32
    return %c0_i32, %c0_i32_0 : i32, i32
  }
  func.func @transform_4(%arg0: i32) -> (i32, i32) {
    %c0_i32 = arith.constant 0 : i32
    %c0_i32_0 = arith.constant 0 : i32
    return %arg0, %c0_i32 : i32, i32
  }
  func.func @transform_5(%arg0: i32) -> (i32, i32) {
    %c0_i32 = arith.constant 0 : i32
    %c0_i32_0 = arith.constant 0 : i32
    %c0_i32_1 = arith.constant 0 : i32
    return %c0_i32, %c0_i32_0 : i32, i32
  }
  func.func @transform_6(%arg0: i32) -> (i32, i32) {
    %c0_i32 = arith.constant 0 : i32
    %c0_i32_0 = arith.constant 0 : i32
    %c0_i32_1 = arith.constant 0 : i32
    return %c0_i32, %c0_i32_0 : i32, i32
  }
  func.func @transform_7(%arg0: i32) -> (i32, i32) {
    %c0_i32 = arith.constant 0 : i32
    %c0_i32_0 = arith.constant 0 : i32
    return %arg0, %c0_i32 : i32, i32
  }
}

</mosaic_0001>

<bundles_post_ra>
// kernel: _lambda_.3
= control target key start
LH: loop header
LB: loop body
LE: loop exit
PB: predicated region body
PF: predicated region fallthrough
CT: control target
= control target key end

     0   :  { %vm80_vm0 = vcmask 261120   ;;  %v1158_v1 = vmov 0.0   ;;  %vm1159_vm1 = vmmov 0   ;;  %v174_v12 = vlaneseq  ;;  %s1162_s19 = smov 96   ;;  %s1526_s1 = inlined_call_operand.vmem [shape: bf16[32,128], index: 1, kind: input, shape index: {}]   ;;  %s1527_s2 = inlined_call_operand.vmem [shape: bf16[32,128], index: 2, kind: input, shape index: {}]   ;;  %s1528_s0 = inlined_call_operand.vmem [shape: bf16[4,16,32], index: 0, kind: input, shape index: {}]   ;;  %s1529_s3 = inlined_call_operand.vmem [shape: f32[1,128], index: 3, kind: input, shape index: {}]   ;;  %s1530_s4 = inlined_call_operand.vmem [shape: s32[16,1], index: 4, kind: input, shape index: {}]   ;;  %s1531_s5 = inlined_call_operand.vmem [shape: f32[32,1], index: 5, kind: input, shape index: {}]   ;;  %s1532_s6 = inlined_call_operand.<no memory space> [shape: f32[1,1], index: 6, kind: input, shape index: {}]   ;;  %s1533_s7 = inlined_call_operand.vmem [shape: f32[16,1], index: 7, kind: output, shape index: {}]  }
   0x1   :  { %v1112_v0 = vld [vmem:[%s1526_s1] sm:$0xff]   ;;  %1053 = vmatprep.subr.bf16.mxu1 %v1158_v1  ;;  %166 = vst.msk [vmem:[#allocation3] sm:$0xff] %vm80_vm0, %v1158_v1  ;;  %167 = vst.msk [vmem:[#allocation3 + $0x8] sm:$0xff] %vm80_vm0, %v1158_v1  ;;  %1057 = vmatprep.mubr.msk.bf16.mxu1 %vm1159_vm1, %v1158_v1  ;;  %v1114_v3 = vld [vmem:[%s1526_s1 + $0x8] sm:$0xff]   ;;  %s1160_s1 = smov 32  }
   0x2   :  { %168 = vst.msk [vmem:[#allocation4] sm:$0xff] %vm80_vm0, %v1158_v1  ;;  %169 = vst.msk [vmem:[#allocation4 + $0x8] sm:$0xff] %vm80_vm0, %v1158_v1  ;;  %v1113_v2 = vld [vmem:[%s1527_s2] sm:$0xff]   ;;  %1041 = vmatprep.subr.bf16.mxu0 %v1112_v0  ;;  %v1115_v4 = vld [vmem:[%s1527_s2 + $0x8] sm:$0xff]   ;;  %v175_v13 = vand.u32 127, %v174_v12 }
   0x3   :  { %170 = vst.msk [vmem:[#allocation5] sm:$0xff] %vm80_vm0, %v1158_v1  ;;  %171 = vst.msk [vmem:[#allocation5 + $0x8] sm:$0xff] %vm80_vm0, %v1158_v1  ;;  %1042 = vmatpush3.bf16.msra.mxu0 %v1112_v0  ;;  %1054 = vmatpush3.bf16.msra.mxu1 %v1113_v2  ;;  %v1116_v5 = vld [vmem:[%s1528_s0] sm:$0xff]   ;;  %v1117_v6 = vld [vmem:[%s1528_s0 + $0x8] sm:$0xff]  }
   0x4   :  { %1043 = vmatprep.subr.bf16.mxu0 %v1114_v3  ;;  %1055 = vmatprep.subr.bf16.mxu1 %v1158_v1  ;;  %v1250_v14 = vld [vmem:[%s1529_s3] ss:$0 sm:$0xff]  ;;  %vm176_vm2 = vcmp.ge.s32.totalorder %v175_v13, 64  ;;  %vm177_vm3 = vcmp.lt.s32.totalorder %v175_v13, 96  ;;  %s1161_s3 = smov 64   ;;  %v1119_v55 = vld [vmem:[%s1527_s2 + $0x8] sm:$0xff]  }
   0x5   :  { %1045 = vmatprep.mubr.msk.bf16.mxu0 %vm80_vm0, %v1116_v5  ;;  %vm1258_vm4 = vmand %vm176_vm2, %vm177_vm3  ;;  %v1118_v54 = vld [vmem:[%s1527_s2] sm:$0xff]  }
   0x7   :  { %1044 = vmatpush3.bf16.msra.mxu0 %v1114_v3  ;;  %1056 = vmatpush3.bf16.msra.mxu1 %v1115_v4 }
   0x8   :  { %v181_v7 = vld [vmem:[#allocation3] sm:$0xff]  ;;  %v182_v8 = vld [vmem:[#allocation3 + $0x8] sm:$0xff]  ;;  %1061 = vmatprep.subr.bf16.mxu1 %v1158_v1  ;;  %1069 = vmatprep.subr.bf16.mxu0 %v1158_v1 }
   0x9   :  { %v258_v9 = vld [vmem:[#allocation4] sm:$0xff]  ;;  %v183_v10 = vpack.c.bf16 %v182_v8, %v181_v7  ;;  %v259_v11 = vld [vmem:[#allocation4 + $0x8] sm:$0xff] }
   0xa   :  { %262 = vrot.lane.b32.xlu1 %v258_v9, %s1160_s1  ;;  %1046 = vmatmul.mubr.msk.bf16.vlgmr.msra.gmra.mrb[0].mxu0 %vm80_vm0, %v1117_v6 }
   0xb   :  { %1058 = vmatmul.mubr.msk.bf16.vlgmr.msra.gmra.mrb[0].mxu1 %vm80_vm0, %v183_v10 }
   0xc   :  { %1065 = vmatprep.mubr.msk.bf16.mxu1 %vm1159_vm1, %v1158_v1  ;;  %1062 = vmatpush3.bf16.msra.mxu1 %v1118_v54 }
   0xd   :  { %1063 = vmatprep.subr.bf16.mxu1 %v1158_v1 }
   0xe   :  { %264 = vrot.lane.b32.xlu1 %v259_v11, %s1160_s1 }
  0x10   :  { %1064 = vmatpush3.bf16.msra.mxu1 %v1119_v55 }
  0x11   :  { %1077 = vmatprep.subr.bf16.mxu1 %v1158_v1 }
  0x7c   :  { %v263_v44 = vpop.permute.xlu1 %262 }
  0x80   :  { %v265_v46 = vpop.permute.xlu1 %264 }
  0xdd   :  { %v1252_v15 = vpop.f32.mrb[0].mxu0 }
  0xde   :  { %v237_v16 = vpop.f32.mrb[0].mxu1  ;;  %v127_v17 = vpop.f32.mrb[1].mxu0  ;;  %v136_v4 = vadd.f32 %v1252_v15, %v1250_v14 }
  0xdf   :  { %v1059_v18 = vpop.f32.mrb[1].mxu1  ;;  %v128_v19 = vadd.f32 %v1250_v14, %v127_v17  ;;  %v1255_v20 = vpop.f32.mrb[2].mxu0 }
  0xe0   :  { %v240_v21 = vpop.f32.mrb[2].mxu1  ;;  %v130_v22 = vpop.f32.mrb[3].mxu0  ;;  %v139_v6 = vadd.f32 %v1255_v20, %v1250_v14 }
  0xe1   :  { %v1060_v23 = vpop.f32.mrb[3].mxu1  ;;  %v244_v24 = vadd.f32 %v237_v16, %v128_v19  ;;  %v131_v25 = vadd.f32 %v1250_v14, %v130_v22 }
  0xe3   :  { %v246_v27 = vmul.f32 0.5, %v244_v24  ;;  %v245_v28 = vadd.f32 %v240_v21, %v131_v25 }
  0xe5   :  { %v248_v29 = vsel %vm1258_vm4, %v244_v24, %v246_v27  ;;  %v247_v30 = vmul.f32 0.5, %v245_v28 }
  0xe6   :  { %1126 = vtanh.f32 %v248_v29 }
  0xe7   :  { %v249_v31 = vsel %vm1258_vm4, %v245_v28, %v247_v30 }
  0xe8   :  { %1128 = vtanh.f32 %v249_v31 }
  0xf0   :  { %v1127_v32 = vpop.eup %1126 }
  0xf1   :  { %v252_v33 = vmul.f32 0.5, %v1127_v32 }
  0xf2   :  { %v1129_v34 = vpop.eup %1128 }
  0xf3   :  { %v254_v35 = vadd.f32 0.5, %v252_v33  ;;  %v253_v36 = vmul.f32 0.5, %v1129_v34 }
  0xf5   :  { %v256_v37 = vsel %vm1258_vm4, %v1127_v32, %v254_v35  ;;  %v255_v38 = vadd.f32 0.5, %v253_v36 }
  0xf6   :  { %272 = vrot.lane.b32.xlu0 %v256_v37, %s1161_s3  ;;  %v268_v45 = vmul.f32 %v263_v44, %v256_v37  ;;  %v1122_v44 = vld [vmem:[%s1528_s0 + $0x18] sm:$0xff]  }
  0xf7   :  { %v257_v39 = vsel %vm1258_vm4, %v1129_v34, %v255_v38 }
  0xf8   :  { %v269_v49 = vmul.f32 %v265_v46, %v257_v39 }
  0xfa   :  { %274 = vrot.lane.b32.xlu0 %v257_v39, %s1161_s3 }
 0x168   :  { %v273_v40 = vpop.permute.xlu0 %272 }
 0x169   :  { %v278_v41 = vmul.f32 %v273_v40, %v256_v37  ;;  %v1120_v40 = vld [vmem:[%s1527_s2] sm:$0xff]  }
 0x16a   :  { %1070 = vmatpush3.bf16.msra.mxu0 %v1120_v40  ;;  %v1125_v40 = vld [vmem:[%s1527_s2 + $0x8] sm:$0xff]  }
 0x16b   :  { %282 = vrot.lane.b32.xlu0 %v278_v41, %s1160_s1  ;;  %1071 = vmatprep.subr.bf16.mxu0 %v1158_v1 }
 0x16c   :  { %v275_v42 = vpop.permute.xlu0 %274 }
 0x16d   :  { %v279_v43 = vmul.f32 %v275_v42, %v257_v39 }
 0x16f   :  { %284 = vrot.lane.b32.xlu1 %v279_v43, %s1160_s1  ;;  %v1121_v43 = vld [vmem:[%s1528_s0 + $0x10] sm:$0xff]  }
 0x170   :  { %1049 = vmatprep.mubr.msk.bf16.mxu0 %vm80_vm0, %v1121_v43  ;;  %v1398_v43 = vld [vmem:[%s1530_s4 + $0x8] sm:$0xff] }
 0x171   :  { %1050 = vmatmul.mubr.msk.bf16.gmra.mrb[4].mxu0 %vm80_vm0, %v1122_v44  ;;  %vm323_vm6 = vcmp.eq.s32.totalorder %v1398_v43, 0  ;;  %vm501_vm8 = vcmp.eq.s32.totalorder %v1398_v43, 1  ;;  %vm679_vm14 = vcmp.eq.s32.totalorder %v1398_v43, 2 }
 0x172   :  { %1073 = vmatprep.mubr.msk.bf16.mxu0 %vm1159_vm1, %v1158_v1 }
 0x1dd   :  { %v283_v47 = vpop.permute.xlu0 %282 }
 0x1de   :  { %v288_v48 = vadd.f32 %v283_v47, %v268_v45  ;;  %v1123_v45 = vld [vmem:[%s1527_s2 + $0x8] sm:$0xff]  }
 0x1df   :  { %1072 = vmatpush3.bf16.msra.mxu0 %v1123_v45 }
 0x1e0   :  { %1130 = vtanh.f32 %v288_v48 }
 0x1e1   :  { %v285_v50 = vpop.permute.xlu1 %284 }
 0x1e2   :  { %v289_v51 = vadd.f32 %v285_v50, %v269_v49 }
 0x1e4   :  { %1132 = vtanh.f32 %v289_v51 }
 0x1ea   :  { %v1131_v52 = vpop.eup %1130 }
 0x1eb   :  { %294 = vrot.lane.b32.xlu0 %v1131_v52, %s1161_s3 }
 0x1ee   :  { %v1133_v53 = vpop.eup %1132 }
 0x1ef   :  { %296 = vrot.lane.b32.xlu1 %v1133_v53, %s1161_s3 }
 0x25d   :  { %v295_v56 = vpop.permute.xlu0 %294 }
 0x25e   :  { %v1283_v57 = vmul.f32 %v295_v56, %v256_v37 }
 0x260   :  { %314 = vrot.lane.b32.xlu0 %v1283_v57, %s1160_s1 }
 0x261   :  { %v297_v58 = vpop.permute.xlu1 %296 }
 0x262   :  { %v1288_v59 = vmul.f32 %v297_v58, %v257_v39  ;;  %v1353_v58 = vpop.f32.mrb[4].mxu0 }
 0x264   :  { %316 = vrot.lane.b32.xlu1 %v1288_v59, %s1160_s1  ;;  %304 = vrot.lane.b32.xlu0 %v288_v48, %s1162_s19 }
 0x268   :  { %306 = vrot.lane.b32.xlu1 %v289_v51, %s1162_s19 }
 0x2d2   :  { %v315_v60 = vpop.permute.xlu0 %314 }
 0x2d3   :  { %320 = vst.msk [vmem:[#allocation3] sm:$0xff] %vm80_vm0, %v315_v60  ;;  %v143_v60 = vpop.f32.mrb[5].mxu0 }
 0x2d6   :  { %v317_v61 = vpop.permute.xlu1 %316  ;;  %v305_v62 = vpop.permute.xlu0 %304 }
 0x2d7   :  { %321 = vst.msk [vmem:[#allocation3 + $0x8] sm:$0xff] %vm80_vm0, %v317_v61  ;;  %310 = vst.msk [vmem:[#allocation4] sm:$0xff] %vm80_vm0, %v305_v62  ;;  %v1355_v61 = vpop.f32.mrb[6].mxu0 }
 0x2d8   :  { %v146_v62 = vpop.f32.mrb[7].mxu0 }
 0x2da   :  { %v307_v63 = vpop.permute.xlu1 %306  ;;  %v359_v0 = vld [vmem:[#allocation3] sm:$0xff] }
 0x2db   :  { %311 = vst.msk [vmem:[#allocation4 + $0x8] sm:$0xff] %vm80_vm0, %v307_v63  ;;  %v144_v63 = vadd.f32 %v1250_v14, %v143_v60 }
 0x2de   :  { %v360_v2 = vld [vmem:[#allocation3 + $0x8] sm:$0xff]  ;;  %v436_v25 = vld [vmem:[#allocation4] sm:$0xff] }
 0x2df   :  { %v361_v3 = vpack.c.bf16 %v360_v2, %v359_v0  ;;  %v147_v2 = vadd.f32 %v1250_v14, %v146_v62 }
 0x2e1   :  { %1066 = vmatmul.mubr.msk.bf16.vlgmr.msra.gmra.mrb[4].mxu1 %vm80_vm0, %v361_v3 }
 0x2e2   :  { %1081 = vmatprep.mubr.msk.bf16.mxu1 %vm1159_vm1, %v1158_v1  ;;  %v437_v27 = vld [vmem:[#allocation4 + $0x8] sm:$0xff]  ;;  %vm857_vm1 = vcmp.eq.s32.totalorder %v1398_v43, 3 }
 0x3b4   :  { %v415_v5 = vpop.f32.mrb[4].mxu1 }
 0x3b5   :  { %v422_v7 = vadd.f32 %v415_v5, %v136_v4  ;;  %v1067_v8 = vpop.f32.mrb[5].mxu1 }
 0x3b6   :  { %v418_v9 = vpop.f32.mrb[6].mxu1 }
 0x3b7   :  { %v424_v10 = vmul.f32 0.5, %v422_v7  ;;  %v423_v11 = vadd.f32 %v418_v9, %v139_v6  ;;  %v1068_v12 = vpop.f32.mrb[7].mxu1 }
 0x3b9   :  { %v426_v13 = vsel %vm1258_vm4, %v422_v7, %v424_v10  ;;  %v425_v16 = vmul.f32 0.5, %v423_v11 }
 0x3ba   :  { %1134 = vtanh.f32 %v426_v13 }
 0x3bb   :  { %v427_v17 = vsel %vm1258_vm4, %v423_v11, %v425_v16 }
 0x3bc   :  { %1136 = vtanh.f32 %v427_v17 }
 0x3c4   :  { %v1135_v15 = vpop.eup %1134 }
 0x3c5   :  { %v430_v18 = vmul.f32 0.5, %v1135_v15 }
 0x3c6   :  { %v1137_v19 = vpop.eup %1136 }
 0x3c7   :  { %v432_v21 = vadd.f32 0.5, %v430_v18  ;;  %v431_v20 = vmul.f32 0.5, %v1137_v19 }
 0x3c9   :  { %v434_v22 = vsel %vm1258_vm4, %v1135_v15, %v432_v21  ;;  %v433_v23 = vadd.f32 0.5, %v431_v20 }
 0x3ca   :  { %450 = vrot.lane.b32.xlu0 %v434_v22, %s1161_s3 }
 0x3cb   :  { %v435_v24 = vsel %vm1258_vm4, %v1137_v19, %v433_v23 }
 0x3cc   :  { %452 = vrot.lane.b32.xlu1 %v435_v24, %s1161_s3 }
 0x3ce   :  { %440 = vrot.lane.b32.xlu0 %v436_v25, %s1160_s1 }
 0x3d0   :  { %442 = vrot.lane.b32.xlu1 %v437_v27, %s1160_s1 }
 0x43c   :  { %v451_v28 = vpop.permute.xlu0 %450 }
 0x43d   :  { %v456_v29 = vmul.f32 %v451_v28, %v434_v22 }
 0x43e   :  { %v453_v30 = vpop.permute.xlu1 %452 }
 0x43f   :  { %v457_v31 = vmul.f32 %v453_v30, %v435_v24  ;;  %460 = vrot.lane.b32.xlu0 %v456_v29, %s1160_s1 }
 0x440   :  { %v441_v32 = vpop.permute.xlu0 %440 }
 0x441   :  { %462 = vrot.lane.b32.xlu1 %v457_v31, %s1160_s1  ;;  %v446_v34 = vmul.f32 %v441_v32, %v434_v22 }
 0x442   :  { %v443_v33 = vpop.permute.xlu1 %442 }
 0x443   :  { %v447_v36 = vmul.f32 %v443_v33, %v435_v24 }
 0x4b1   :  { %v461_v35 = vpop.permute.xlu0 %460 }
 0x4b2   :  { %v466_v37 = vadd.f32 %v461_v35, %v446_v34 }
 0x4b3   :  { %v463_v38 = vpop.permute.xlu1 %462 }
 0x4b4   :  { %1138 = vtanh.f32 %v466_v37  ;;  %v467_v39 = vadd.f32 %v463_v38, %v447_v36  ;;  %v1163_v36 = vmov 0  }
 0x4b5   :  { %1110 = vset.pattern.permute.xlu0 %v1163_v36  ;;  %1111 = vset.pattern.permute.xlu1 %v1163_v36 }
 0x4b6   :  { %1140 = vtanh.f32 %v467_v39 }
 0x4be   :  { %v1139_v41 = vpop.eup %1138 }
 0x4bf   :  { %472 = vrot.lane.b32.xlu0 %v1139_v41, %s1161_s3  ;;  %v1393_v41 = vld [vmem:[%s1530_s4] sm:$0xff] }
 0x4c0   :  { %v1141_v42 = vpop.eup %1140  ;;  %vm322_vm5 = vcmp.eq.s32.totalorder %v1393_v41, 0  ;;  %vm500_vm10 = vcmp.eq.s32.totalorder %v1393_v41, 1  ;;  %vm678_vm13 = vcmp.eq.s32.totalorder %v1393_v41, 2  ;;  %vm856_vm3 = vcmp.eq.s32.totalorder %v1393_v41, 3 }
 0x4c1   :  { %474 = vrot.lane.b32.xlu1 %v1141_v42, %s1161_s3 }
 0x531   :  { %v473_v46 = vpop.permute.xlu0 %472 }
 0x532   :  { %v1338_v47 = vmul.f32 %v473_v46, %v434_v22 }
 0x533   :  { %v475_v48 = vpop.permute.xlu1 %474 }
 0x534   :  { %v1340_v49 = vmul.f32 %v475_v48, %v435_v24  ;;  %492 = vrot.lane.b32.xlu0 %v1338_v47, %s1160_s1  ;;  %v327_v48 = vsel %vm323_vm6, 1, %v1163_v36  ;;  %vm984_vm6 = vcmask 7168  }
 0x536   :  { %494 = vrot.lane.b32.xlu1 %v1340_v49, %s1160_s1 }
 0x538   :  { %482 = vrot.lane.b32.xlu0 %v466_v37, %s1162_s19 }
 0x53a   :  { %484 = vrot.lane.b32.xlu1 %v467_v39, %s1162_s19  ;;  %v1124_v39 = vld [vmem:[%s1527_s2] sm:$0xff]  }
 0x53b   :  { %1078 = vmatpush3.bf16.msra.mxu1 %v1124_v39 }
 0x53c   :  { %1079 = vmatprep.subr.bf16.mxu1 %v1158_v1  ;;  %v326_v1 = vsel %vm322_vm5, 1, %v1163_v36 }
 0x53f   :  { %1080 = vmatpush3.bf16.msra.mxu1 %v1125_v40 }
 0x5a6   :  { %v493_v50 = vpop.permute.xlu0 %492 }
 0x5a7   :  { %498 = vst.msk [vmem:[#allocation3] sm:$0xff] %vm80_vm0, %v493_v50  ;;  %v325_v50 = vld [vmem:[#allocation5 + $0x8] sm:$0xff] }
 0x5a8   :  { %v495_v51 = vpop.permute.xlu1 %494 }
 0x5a9   :  { %499 = vst.msk [vmem:[#allocation3 + $0x8] sm:$0xff] %vm80_vm0, %v495_v51  ;;  %v324_v51 = vld [vmem:[#allocation5] sm:$0xff] }
 0x5aa   :  { %v483_v52 = vpop.permute.xlu0 %482 }
 0x5ab   :  { %488 = vst.msk [vmem:[#allocation4] sm:$0xff] %vm80_vm0, %v483_v52 }
 0x5ac   :  { %v485_v53 = vpop.permute.xlu1 %484 }
 0x5ad   :  { %489 = vst.msk [vmem:[#allocation4 + $0x8] sm:$0xff] %vm80_vm0, %v485_v53 }
 0x5ae   :  { %v537_v54 = vld [vmem:[#allocation3] sm:$0xff] }
 0x5b0   :  { %v538_v55 = vld [vmem:[#allocation3 + $0x8] sm:$0xff] }
 0x5b1   :  { %v539_v56 = vpack.c.bf16 %v538_v55, %v537_v54 }
 0x5b2   :  { %v614_v20 = vld [vmem:[#allocation4] sm:$0xff] }
 0x5b3   :  { %1074 = vmatmul.mubr.msk.bf16.vlgmr.msra.gmra.mrb[8].mxu0 %vm80_vm0, %v539_v56 }
 0x5b4   :  { %v615_v22 = vld [vmem:[#allocation4 + $0x8] sm:$0xff] }
 0x686   :  { %v593_v0 = vpop.f32.mrb[8].mxu0 }
 0x687   :  { %v600_v3 = vadd.f32 %v593_v0, %v144_v63  ;;  %v1075_v4 = vpop.f32.mrb[9].mxu0 }
 0x688   :  { %v596_v5 = vpop.f32.mrb[10].mxu0  ;;  %v505_v4 = vsel %vm501_vm8, 1, %v1163_v36 }
 0x689   :  { %v602_v6 = vmul.f32 0.5, %v600_v3  ;;  %v601_v7 = vadd.f32 %v596_v5, %v147_v2  ;;  %v1076_v8 = vpop.f32.mrb[11].mxu0  ;;  %v504_v5 = vsel %vm500_vm10, 1, %v1163_v36 }
 0x68b   :  { %v604_v9 = vsel %vm1258_vm4, %v600_v3, %v602_v6  ;;  %v603_v10 = vmul.f32 0.5, %v601_v7 }
 0x68c   :  { %1142 = vtanh.f32 %v604_v9 }
 0x68d   :  { %v605_v11 = vsel %vm1258_vm4, %v601_v7, %v603_v10  ;;  %v155_v10 = vadd.f32 %v1355_v61, %v1250_v14 }
 0x68e   :  { %1144 = vtanh.f32 %v605_v11 }
 0x696   :  { %v1143_v12 = vpop.eup %1142 }
 0x697   :  { %v608_v13 = vmul.f32 0.5, %v1143_v12 }
 0x698   :  { %v1145_v16 = vpop.eup %1144 }
 0x699   :  { %v610_v17 = vadd.f32 0.5, %v608_v13  ;;  %v609_v15 = vmul.f32 0.5, %v1145_v16 }
 0x69b   :  { %v612_v18 = vsel %vm1258_vm4, %v1143_v12, %v610_v17  ;;  %v611_v19 = vadd.f32 0.5, %v609_v15 }
 0x69c   :  { %628 = vrot.lane.b32.xlu0 %v612_v18, %s1161_s3 }
 0x69d   :  { %v613_v21 = vsel %vm1258_vm4, %v1145_v16, %v611_v19 }
 0x69e   :  { %630 = vrot.lane.b32.xlu1 %v613_v21, %s1161_s3 }
 0x6a0   :  { %618 = vrot.lane.b32.xlu0 %v614_v20, %s1160_s1 }
 0x6a2   :  { %620 = vrot.lane.b32.xlu1 %v615_v22, %s1160_s1 }
 0x70e   :  { %v629_v23 = vpop.permute.xlu0 %628 }
 0x70f   :  { %v634_v24 = vmul.f32 %v629_v23, %v612_v18 }
 0x710   :  { %v631_v25 = vpop.permute.xlu1 %630 }
 0x711   :  { %v635_v27 = vmul.f32 %v631_v25, %v613_v21  ;;  %638 = vrot.lane.b32.xlu0 %v634_v24, %s1160_s1 }
 0x712   :  { %v619_v28 = vpop.permute.xlu0 %618 }
 0x713   :  { %640 = vrot.lane.b32.xlu1 %v635_v27, %s1160_s1  ;;  %v624_v30 = vmul.f32 %v619_v28, %v612_v18 }
 0x714   :  { %v621_v29 = vpop.permute.xlu1 %620 }
 0x715   :  { %v625_v32 = vmul.f32 %v621_v29, %v613_v21 }
 0x783   :  { %v639_v31 = vpop.permute.xlu0 %638 }
 0x784   :  { %v1373_v33 = vadd.f32 %v639_v31, %v624_v30  ;;  %v682_v30 = vsel %vm678_vm13, 1, %v1163_v36 }
 0x785   :  { %v641_v34 = vpop.permute.xlu1 %640 }
 0x786   :  { %1146 = vtanh.f32 %v1373_v33  ;;  %v1376_v35 = vadd.f32 %v641_v34, %v625_v32  ;;  %v683_v32 = vsel %vm679_vm14, 1, %v1163_v36 }
 0x788   :  { %1148 = vtanh.f32 %v1376_v35 }
 0x790   :  { %v1147_v37 = vpop.eup %1146 }
 0x791   :  { %650 = vrot.lane.b32.xlu0 %v1147_v37, %s1161_s3 }
 0x792   :  { %v1149_v38 = vpop.eup %1148 }
 0x793   :  { %652 = vrot.lane.b32.xlu1 %v1149_v38, %s1161_s3 }
 0x803   :  { %v651_v42 = vpop.permute.xlu0 %650 }
 0x804   :  { %v1400_v44 = vmul.f32 %v651_v42, %v612_v18 }
 0x805   :  { %v653_v45 = vpop.permute.xlu1 %652 }
 0x806   :  { %v1403_v46 = vmul.f32 %v653_v45, %v613_v21  ;;  %670 = vrot.lane.b32.xlu0 %v1400_v44, %s1160_s1 }
 0x808   :  { %672 = vrot.lane.b32.xlu1 %v1403_v46, %s1160_s1 }
 0x80a   :  { %329 = vperm.xlu0 %1110, %v326_v1  }
 0x80c   :  { %332 = vperm.xlu1 %1111, %v327_v48  }
 0x80e   :  { %340 = vrot.lane.b32.xlu0 %v325_v50, %s1162_s19 }
 0x810   :  { %338 = vrot.lane.b32.xlu1 %v324_v51, %s1162_s19 }
 0x878   :  { %v671_v52 = vpop.permute.xlu0 %670 }
 0x879   :  { %676 = vst.msk [vmem:[#allocation3] sm:$0xff] %vm80_vm0, %v671_v52 }
 0x87a   :  { %v673_v53 = vpop.permute.xlu1 %672 }
 0x87b   :  { %677 = vst.msk [vmem:[#allocation3 + $0x8] sm:$0xff] %vm80_vm0, %v673_v53 }
 0x880   :  { %v715_v54 = vld [vmem:[#allocation3] sm:$0xff] }
 0x882   :  { %v716_v55 = vld [vmem:[#allocation3 + $0x8] sm:$0xff] }
 0x883   :  { %v717_v56 = vpack.c.bf16 %v716_v55, %v715_v54 }
 0x885   :  { %1082 = vmatmul.mubr.msk.bf16.vlgmr.msra.gmra.mrb[8].mxu1 %vm80_vm0, %v717_v56  ;;  %v861_v56 = vsel %vm857_vm1, 1, %v1163_v36 }
 0x889   :  { %v330_v60 = vpop.permute.xlu0 %329 }
 0x88a   :  { %vm334_vm9 = vcmp.eq.s32.totalorder %v330_v60, 1 }
 0x88b   :  { %v333_v62 = vpop.permute.xlu1 %332 }
 0x88c   :  { %vm335_vm7 = vcmp.eq.s32.totalorder %v333_v62, 1  ;;  %v860_v62 = vsel %vm856_vm3, 1, %v1163_v36 }
 0x88d   :  { %v341_v63 = vpop.permute.xlu0 %340 }
 0x88e   :  { %v345_v0 = vsel %vm335_vm7, %v1288_v59, %v341_v63 }
 0x88f   :  { %v339_v2 = vpop.permute.xlu1 %338  ;;  %350 = vrot.lane.b32.xlu0 %v345_v0, %s1160_s1 }
 0x890   :  { %v344_v3 = vsel %vm334_vm9, %v1283_v57, %v339_v2  ;;  %v152_v57 = vadd.f32 %v1353_v58, %v1250_v14 }
 0x891   :  { %348 = vrot.lane.b32.xlu1 %v344_v3, %s1160_s1 }
 0x893   :  { %510 = vperm.xlu0 %1110, %v505_v4  }
 0x895   :  { %507 = vperm.xlu1 %1111, %v504_v5  }
 0x901   :  { %v351_v6 = vpop.permute.xlu0 %350 }
 0x902   :  { %355 = vst.msk [vmem:[#allocation5 + $0x8] sm:$0xff] %vm80_vm0, %v351_v6 }
 0x903   :  { %v349_v59 = vpop.permute.xlu1 %348 }
 0x904   :  { %354 = vst.msk [vmem:[#allocation5] sm:$0xff] %vm80_vm0, %v349_v59 }
 0x909   :  { %v503_v7 = vld [vmem:[#allocation5 + $0x8] sm:$0xff] }
 0x90a   :  { %518 = vrot.lane.b32.xlu0 %v503_v7, %s1162_s19  ;;  %v892_v7 = vld [vmem:[%s1531_s5] sm:$0xff] }
 0x90b   :  { %v502_v8 = vld [vmem:[#allocation5] sm:$0xff] }
 0x90c   :  { %516 = vrot.lane.b32.xlu1 %v502_v8, %s1162_s19  ;;  %v893_v8 = vld [vmem:[%s1531_s5 + $0x8] sm:$0xff] }
 0x912   :  { %v511_v58 = vpop.permute.xlu0 %510 }
 0x913   :  { %vm513_vm11 = vcmp.eq.s32.totalorder %v511_v58, 1  ;;  %v12_v58 = vstv %s1532_s6 }
 0x914   :  { %v508_v22 = vpop.permute.xlu1 %507  ;;  %13 = vst [vmem:[#allocation6] sm:$0x1] %v12_v58 }
 0x915   :  { %vm512_vm12 = vcmp.eq.s32.totalorder %v508_v22, 1 }
 0x958   :  { %v771_v9 = vpop.f32.mrb[8].mxu1 }
 0x959   :  { %v778_v11 = vadd.f32 %v771_v9, %v152_v57  ;;  %v1083_v12 = vpop.f32.mrb[9].mxu1  ;;  %v1096_v9 = vpack.c.bf16 %v893_v8, %v892_v7 }
 0x95a   :  { %v774_v13 = vpop.f32.mrb[10].mxu1  ;;  %v895_v12 = vld [vmem:[%s1531_s5 + $0x18] sm:$0xff] }
 0x95b   :  { %v779_v16 = vadd.f32 %v774_v13, %v155_v10  ;;  %v1084_v17 = vpop.f32.mrb[11].mxu1  ;;  %v780_v15 = vmul.f32 0.5, %v778_v11  ;;  %1097 = vmatprep.subr.bf16.mxu0 %v1096_v9 }
 0x95c   :  { %1099 = vmatpush3.bf16.msra.mxu0 %v1096_v9 }
 0x95d   :  { %v782_v18 = vsel %vm1258_vm4, %v778_v11, %v780_v15  ;;  %v781_v19 = vmul.f32 0.5, %v779_v16  ;;  %v894_v11 = vld [vmem:[%s1531_s5 + $0x10] sm:$0xff] }
 0x95e   :  { %1150 = vtanh.f32 %v782_v18  ;;  %v1100_v13 = vpack.c.bf16 %v895_v12, %v894_v11 }
 0x95f   :  { %v783_v21 = vsel %vm1258_vm4, %v779_v16, %v781_v19 }
 0x960   :  { %1152 = vtanh.f32 %v783_v21  ;;  %1101 = vmatprep.subr.bf16.mxu0 %v1100_v13 }
 0x961   :  { %1103 = vmatpush3.bf16.msra.mxu0 %v1100_v13 }
 0x968   :  { %v1151_v20 = vpop.eup %1150 }
 0x969   :  { %v786_v23 = vmul.f32 0.5, %v1151_v20 }
 0x96a   :  { %v1153_v24 = vpop.eup %1152 }
 0x96b   :  { %v788_v28 = vadd.f32 0.5, %v786_v23  ;;  %v787_v29 = vmul.f32 0.5, %v1153_v24 }
 0x96d   :  { %v789_v31 = vadd.f32 0.5, %v787_v29 }
 0x97c   :  { %v519_v14 = vpop.permute.xlu0 %518 }
 0x97d   :  { %v523_v61 = vsel %vm513_vm11, %v1340_v49, %v519_v14  ;;  %v1448_v49 = vsel %vm1258_vm4, %v1151_v20, %v788_v28 }
 0x97e   :  { %v517_v25 = vpop.permute.xlu1 %516  ;;  %528 = vrot.lane.b32.xlu0 %v523_v61, %s1160_s1 }
 0x97f   :  { %v522_v27 = vsel %vm512_vm12, %v1338_v47, %v517_v25  ;;  %v1456_v47 = vsel %vm1258_vm4, %v1153_v24, %v789_v31 }
 0x980   :  { %526 = vrot.lane.b32.xlu1 %v522_v27, %s1160_s1 }
 0x982   :  { %662 = vrot.lane.b32.xlu0 %v1376_v35, %s1162_s19 }
 0x984   :  { %660 = vrot.lane.b32.xlu1 %v1373_v33, %s1162_s19 }
 0x986   :  { %806 = vrot.lane.b32.xlu0 %v1448_v49, %s1161_s3 }
 0x988   :  { %685 = vperm.xlu1 %1111, %v682_v30  }
 0x98a   :  { %808 = vrot.lane.b32.xlu0 %v1456_v47, %s1161_s3 }
 0x98c   :  { %688 = vperm.xlu1 %1111, %v683_v32  }
 0x9f0   :  { %v529_v33 = vpop.permute.xlu0 %528 }
 0x9f1   :  { %533 = vst.msk [vmem:[#allocation5 + $0x8] sm:$0xff] %vm80_vm0, %v529_v33 }
 0x9f2   :  { %v527_v34 = vpop.permute.xlu1 %526 }
 0x9f3   :  { %532 = vst.msk [vmem:[#allocation5] sm:$0xff] %vm80_vm0, %v527_v34 }
 0x9f4   :  { %v663_v35 = vpop.permute.xlu0 %662 }
 0x9f5   :  { %667 = vst.msk [vmem:[#allocation4 + $0x8] sm:$0xff] %vm80_vm0, %v663_v35 }
 0x9f6   :  { %v661_v37 = vpop.permute.xlu1 %660 }
 0x9f7   :  { %666 = vst.msk [vmem:[#allocation4] sm:$0xff] %vm80_vm0, %v661_v37 }
 0x9f8   :  { %v807_v26 = vpop.permute.xlu0 %806  ;;  %v681_v38 = vld [vmem:[#allocation5 + $0x8] sm:$0xff] }
 0x9f9   :  { %696 = vrot.lane.b32.xlu0 %v681_v38, %s1162_s19  ;;  %v812_v48 = vmul.f32 %v807_v26, %v1448_v49 }
 0x9fa   :  { %v680_v39 = vld [vmem:[#allocation5] sm:$0xff] }
 0x9fb   :  { %694 = vrot.lane.b32.xlu1 %v680_v39, %s1162_s19 }
 0x9fc   :  { %v809_v40 = vpop.permute.xlu0 %808  ;;  %v793_v42 = vld [vmem:[#allocation4 + $0x8] sm:$0xff] }
 0x9fd   :  { %798 = vrot.lane.b32.xlu0 %v793_v42, %s1160_s1  ;;  %v813_v1 = vmul.f32 %v809_v40, %v1456_v47 }
 0x9fe   :  { %v792_v45 = vld [vmem:[#allocation4] sm:$0xff] }
 0x9ff   :  { %796 = vrot.lane.b32.xlu1 %v792_v45, %s1160_s1 }
 0xa01   :  { %818 = vrot.lane.b32.xlu0 %v813_v1, %s1160_s1 }
 0xa03   :  { %816 = vrot.lane.b32.xlu1 %v812_v48, %s1160_s1 }
 0xa07   :  { %v686_v50 = vpop.permute.xlu1 %685 }
 0xa08   :  { %vm690_vm2 = vcmp.eq.s32.totalorder %v686_v50, 1 }
 0xa0b   :  { %v689_v51 = vpop.permute.xlu1 %688 }
 0xa0c   :  { %vm691_vm15 = vcmp.eq.s32.totalorder %v689_v51, 1 }
 0xa6b   :  { %v697_v52 = vpop.permute.xlu0 %696 }
 0xa6c   :  { %v701_v53 = vsel %vm691_vm15, %v1403_v46, %v697_v52 }
 0xa6d   :  { %v695_v54 = vpop.permute.xlu1 %694  ;;  %706 = vrot.lane.b32.xlu0 %v701_v53, %s1160_s1 }
 0xa6e   :  { %v700_v55 = vsel %vm690_vm2, %v1400_v44, %v695_v54 }
 0xa6f   :  { %704 = vrot.lane.b32.xlu1 %v700_v55, %s1160_s1  ;;  %v799_v60 = vpop.permute.xlu0 %798 }
 0xa70   :  { %v803_v43 = vmul.f32 %v799_v60, %v1456_v47 }
 0xa71   :  { %v797_v63 = vpop.permute.xlu1 %796  ;;  %866 = vperm.xlu0 %1110, %v861_v56  }
 0xa72   :  { %v802_v0 = vmul.f32 %v797_v63, %v1448_v49 }
 0xa73   :  { %863 = vperm.xlu1 %1111, %v860_v62   ;;  %v819_v46 = vpop.permute.xlu0 %818 }
 0xa74   :  { %v823_v2 = vadd.f32 %v819_v46, %v803_v43 }
 0xa75   :  { %v817_v3 = vpop.permute.xlu1 %816 }
 0xa76   :  { %1154 = vtanh.f32 %v823_v2  ;;  %v822_v41 = vadd.f32 %v817_v3, %v802_v0 }
 0xa78   :  { %1156 = vtanh.f32 %v822_v41 }
 0xa80   :  { %v1155_v44 = vpop.eup %1154 }
 0xa81   :  { %830 = vrot.lane.b32.xlu0 %v1155_v44, %s1161_s3 }
 0xa82   :  { %v1157_v4 = vpop.eup %1156 }
 0xa83   :  { %828 = vrot.lane.b32.xlu1 %v1157_v4, %s1161_s3 }
 0xadf   :  { %v707_v36 = vpop.permute.xlu0 %706 }
 0xae0   :  { %711 = vst.msk [vmem:[#allocation5 + $0x8] sm:$0xff] %vm80_vm0, %v707_v36 }
 0xae1   :  { %v705_v5 = vpop.permute.xlu1 %704 }
 0xae2   :  { %710 = vst.msk [vmem:[#allocation5] sm:$0xff] %vm80_vm0, %v705_v5 }
 0xae7   :  { %v859_v6 = vld [vmem:[#allocation5 + $0x8] sm:$0xff] }
 0xae8   :  { %874 = vrot.lane.b32.xlu0 %v859_v6, %s1162_s19 }
 0xae9   :  { %v858_v59 = vld [vmem:[#allocation5] sm:$0xff] }
 0xaea   :  { %872 = vrot.lane.b32.xlu1 %v858_v59, %s1162_s19 }
 0xaf0   :  { %v867_v57 = vpop.permute.xlu0 %866 }
 0xaf1   :  { %vm869_vm4 = vcmp.eq.s32.totalorder %v867_v57, 1 }
 0xaf2   :  { %v864_v10 = vpop.permute.xlu1 %863 }
 0xaf3   :  { %vm868_vm5 = vcmp.eq.s32.totalorder %v864_v10, 1 }
 0xaf4   :  { %v831_v16 = vpop.permute.xlu0 %830 }
 0xaf5   :  { %v835_v15 = vmul.f32 %v831_v16, %v1456_v47 }
 0xaf6   :  { %v829_v17 = vpop.permute.xlu1 %828 }
 0xaf7   :  { %v834_v19 = vmul.f32 %v829_v17, %v1448_v49  ;;  %v1014_v49 = vld [vmem:[#allocation6] ss:$0 sm:$0xff] }
 0xb5a   :  { %v875_v18 = vpop.permute.xlu0 %874 }
 0xb5b   :  { %v879_v21 = vsel %vm869_vm4, %v835_v15, %v875_v18 }
 0xb5c   :  { %v873_v20 = vpop.permute.xlu1 %872  ;;  %884 = vrot.lane.b32.xlu0 %v879_v21, %s1160_s1 }
 0xb5d   :  { %v878_v22 = vsel %vm868_vm5, %v834_v19, %v873_v20 }
 0xb5e   :  { %882 = vrot.lane.b32.xlu1 %v878_v22, %s1160_s1 }
 0xb60   :  { %840 = vrot.lane.b32.xlu0 %v823_v2, %s1162_s19 }
 0xb62   :  { %838 = vrot.lane.b32.xlu1 %v822_v41, %s1162_s19 }
 0xb64   :  { %850 = vrot.lane.b32.xlu0 %v835_v15, %s1160_s1 }
 0xb66   :  { %848 = vrot.lane.b32.xlu1 %v834_v19, %s1160_s1 }
 0xbce   :  { %v885_v14 = vpop.permute.xlu0 %884 }
 0xbcf   :  { %889 = vst.msk [vmem:[#allocation5 + $0x8] sm:$0xff] %vm80_vm0, %v885_v14 }
 0xbd0   :  { %v883_v61 = vpop.permute.xlu1 %882 }
 0xbd1   :  { %888 = vst.msk [vmem:[#allocation5] sm:$0xff] %vm80_vm0, %v883_v61 }
 0xbd2   :  { %v841_v23 = vpop.permute.xlu0 %840 }
 0xbd3   :  { %845 = vst.msk [vmem:[#allocation4 + $0x8] sm:$0xff] %vm80_vm0, %v841_v23 }
 0xbd4   :  { %v839_v24 = vpop.permute.xlu1 %838 }
 0xbd5   :  { %844 = vst.msk [vmem:[#allocation4] sm:$0xff] %vm80_vm0, %v839_v24 }
 0xbd6   :  { %v851_v25 = vpop.permute.xlu0 %850  ;;  %v891_v29 = vld [vmem:[#allocation5 + $0x8] sm:$0xff] }
 0xbd7   :  { %855 = vst.msk [vmem:[#allocation3 + $0x8] sm:$0xff] %vm80_vm0, %v851_v25 }
 0xbd8   :  { %v849_v27 = vpop.permute.xlu1 %848  ;;  %v890_v28 = vld [vmem:[#allocation5] sm:$0xff] }
 0xbd9   :  { %854 = vst.msk [vmem:[#allocation3] sm:$0xff] %vm80_vm0, %v849_v27  ;;  %1093 = vmatprep.mubr.msk.f32.mxu0 %vm80_vm0, %v890_v28 }
 0xbda   :  { %1094 = vmatmul.mubr.msk.f32.vlgmr.msra.gmra.mrb[12].mxu0 %vm80_vm0, %v891_v29 }
 0xcad   :  { %v1095_v30 = vpop.f32.mrb[12].mxu0 }
 0xcae   :  { %v981_v31 = vadd.f32 %v1095_v30, %v1014_v49  ;;  %v975_v47 = vpop.f32.mrb[13].mxu0 }
 0xcaf   :  { %v976_v32 = vadd.f32 %v1014_v49, %v975_v47 }
 0xcb0   :  { %986 = vst.msk [vmem:[%s1533_s7 + $0x8] sm:$0xff] %vm984_vm6, %v981_v31 }
 0xcb1   :  { %985 = vst.msk [vmem:[%s1533_s7] sm:$0xff] %vm984_vm6, %v976_v32 }

// kernel: _lambda_.2
= control target key start
LH: loop header
LB: loop body
LE: loop exit
PB: predicated region body
PF: predicated region fallthrough
CT: control target
= control target key end

     0   :  { %vm100_vm0 = vcmask 261120   ;;  %v1938_v1 = vmov 0.0   ;;  %vm1939_vm1 = vmmov 0   ;;  %v246_v12 = vlaneseq  ;;  %s1941_s7 = smov 64   ;;  %s1942_s12 = smov 96   ;;  %s2654_s1 = inlined_call_operand.vmem [shape: bf16[32,128], index: 1, kind: input, shape index: {}]   ;;  %s2655_s2 = inlined_call_operand.vmem [shape: bf16[32,128], index: 2, kind: input, shape index: {}]   ;;  %s2656_s0 = inlined_call_operand.vmem [shape: bf16[8,16,32], index: 0, kind: input, shape index: {}]   ;;  %s2657_s3 = inlined_call_operand.vmem [shape: f32[1,128], index: 3, kind: input, shape index: {}]   ;;  %s2658_s5 = inlined_call_operand.vmem [shape: f32[16,32], index: 5, kind: output, shape index: {}]   ;;  %s2659_s4 = inlined_call_operand.vmem [shape: s32[16,1], index: 4, kind: input, shape index: {}]  }
   0x1   :  { %v1847_v0 = vld [vmem:[%s2654_s1] sm:$0xff]   ;;  %1775 = vmatprep.subr.bf16.mxu1 %v1938_v1  ;;  %238 = vst.msk [vmem:[#allocation3] sm:$0xff] %vm100_vm0, %v1938_v1  ;;  %239 = vst.msk [vmem:[#allocation3 + $0x8] sm:$0xff] %vm100_vm0, %v1938_v1  ;;  %1779 = vmatprep.mubr.msk.bf16.mxu1 %vm1939_vm1, %v1938_v1  ;;  %v1849_v3 = vld [vmem:[%s2654_s1 + $0x8] sm:$0xff]   ;;  %s1940_s1 = smov 32  }
   0x2   :  { %240 = vst.msk [vmem:[#allocation4] sm:$0xff] %vm100_vm0, %v1938_v1  ;;  %241 = vst.msk [vmem:[#allocation4 + $0x8] sm:$0xff] %vm100_vm0, %v1938_v1  ;;  %v1848_v2 = vld [vmem:[%s2655_s2] sm:$0xff]   ;;  %1755 = vmatprep.subr.bf16.mxu0 %v1847_v0  ;;  %v1850_v4 = vld [vmem:[%s2655_s2 + $0x8] sm:$0xff]   ;;  %v247_v13 = vand.u32 127, %v246_v12 }
   0x3   :  { %1756 = vmatpush3.bf16.msra.mxu0 %v1847_v0  ;;  %1776 = vmatpush3.bf16.msra.mxu1 %v1848_v2  ;;  %v1851_v5 = vld [vmem:[%s2656_s0] sm:$0xff]   ;;  %v1852_v6 = vld [vmem:[%s2656_s0 + $0x8] sm:$0xff]   ;;  %243 = vst.msk [vmem:[%s2658_s5 + $0x8] sm:$0xff] %vm100_vm0, %v1938_v1  ;;  %242 = vst.msk [vmem:[%s2658_s5] sm:$0xff] %vm100_vm0, %v1938_v1 }
   0x4   :  { %1757 = vmatprep.subr.bf16.mxu0 %v1849_v3  ;;  %1777 = vmatprep.subr.bf16.mxu1 %v1938_v1  ;;  %v2016_v14 = vld [vmem:[%s2657_s3] ss:$0 sm:$0xff]  ;;  %vm248_vm2 = vcmp.ge.s32.totalorder %v247_v13, 64  ;;  %vm249_vm3 = vcmp.lt.s32.totalorder %v247_v13, 96  ;;  %v1854_v55 = vld [vmem:[%s2655_s2 + $0x8] sm:$0xff]  }
   0x5   :  { %1759 = vmatprep.mubr.msk.bf16.mxu0 %vm100_vm0, %v1851_v5  ;;  %vm2024_vm4 = vmand %vm248_vm2, %vm249_vm3  ;;  %v1853_v54 = vld [vmem:[%s2655_s2] sm:$0xff]  }
   0x7   :  { %1758 = vmatpush3.bf16.msra.mxu0 %v1849_v3  ;;  %1778 = vmatpush3.bf16.msra.mxu1 %v1850_v4 }
   0x8   :  { %v253_v7 = vld [vmem:[#allocation3] sm:$0xff]  ;;  %v254_v8 = vld [vmem:[#allocation3 + $0x8] sm:$0xff]  ;;  %1783 = vmatprep.subr.bf16.mxu1 %v1938_v1  ;;  %1807 = vmatprep.subr.bf16.mxu0 %v1938_v1 }
   0x9   :  { %v330_v9 = vld [vmem:[#allocation4] sm:$0xff]  ;;  %v255_v10 = vpack.c.bf16 %v254_v8, %v253_v7  ;;  %v331_v11 = vld [vmem:[#allocation4 + $0x8] sm:$0xff] }
   0xa   :  { %334 = vrot.lane.b32.xlu1 %v330_v9, %s1940_s1  ;;  %1760 = vmatmul.mubr.msk.bf16.vlgmr.msra.gmra.mrb[0].mxu0 %vm100_vm0, %v1852_v6 }
   0xb   :  { %1780 = vmatmul.mubr.msk.bf16.vlgmr.msra.gmra.mrb[0].mxu1 %vm100_vm0, %v255_v10 }
   0xc   :  { %1787 = vmatprep.mubr.msk.bf16.mxu1 %vm1939_vm1, %v1938_v1  ;;  %1784 = vmatpush3.bf16.msra.mxu1 %v1853_v54 }
   0xd   :  { %1785 = vmatprep.subr.bf16.mxu1 %v1938_v1 }
   0xe   :  { %336 = vrot.lane.b32.xlu1 %v331_v11, %s1940_s1 }
  0x10   :  { %1786 = vmatpush3.bf16.msra.mxu1 %v1854_v55 }
  0x11   :  { %1791 = vmatprep.subr.bf16.mxu1 %v1938_v1 }
  0x7c   :  { %v335_v44 = vpop.permute.xlu1 %334 }
  0x80   :  { %v337_v46 = vpop.permute.xlu1 %336 }
  0xdd   :  { %v2018_v15 = vpop.f32.mrb[0].mxu0 }
  0xde   :  { %v309_v16 = vpop.f32.mrb[0].mxu1  ;;  %v159_v17 = vpop.f32.mrb[1].mxu0  ;;  %v168_v4 = vadd.f32 %v2018_v15, %v2016_v14 }
  0xdf   :  { %v1781_v18 = vpop.f32.mrb[1].mxu1  ;;  %v160_v19 = vadd.f32 %v2016_v14, %v159_v17  ;;  %v2021_v20 = vpop.f32.mrb[2].mxu0 }
  0xe0   :  { %v312_v21 = vpop.f32.mrb[2].mxu1  ;;  %v162_v22 = vpop.f32.mrb[3].mxu0  ;;  %v171_v6 = vadd.f32 %v2021_v20, %v2016_v14 }
  0xe1   :  { %v1782_v23 = vpop.f32.mrb[3].mxu1  ;;  %v316_v24 = vadd.f32 %v309_v16, %v160_v19  ;;  %v163_v25 = vadd.f32 %v2016_v14, %v162_v22 }
  0xe3   :  { %v318_v27 = vmul.f32 0.5, %v316_v24  ;;  %v317_v28 = vadd.f32 %v312_v21, %v163_v25 }
  0xe5   :  { %v320_v29 = vsel %vm2024_vm4, %v316_v24, %v318_v27  ;;  %v319_v30 = vmul.f32 0.5, %v317_v28 }
  0xe6   :  { %1873 = vtanh.f32 %v320_v29 }
  0xe7   :  { %v321_v31 = vsel %vm2024_vm4, %v317_v28, %v319_v30 }
  0xe8   :  { %1875 = vtanh.f32 %v321_v31 }
  0xf0   :  { %v1874_v32 = vpop.eup %1873 }
  0xf1   :  { %v324_v33 = vmul.f32 0.5, %v1874_v32 }
  0xf2   :  { %v1876_v34 = vpop.eup %1875 }
  0xf3   :  { %v326_v35 = vadd.f32 0.5, %v324_v33  ;;  %v325_v36 = vmul.f32 0.5, %v1876_v34 }
  0xf5   :  { %v328_v37 = vsel %vm2024_vm4, %v1874_v32, %v326_v35  ;;  %v327_v38 = vadd.f32 0.5, %v325_v36 }
  0xf6   :  { %344 = vrot.lane.b32.xlu0 %v328_v37, %s1941_s7  ;;  %v340_v45 = vmul.f32 %v335_v44, %v328_v37  ;;  %v1857_v44 = vld [vmem:[%s2656_s0 + $0x18] sm:$0xff]  }
  0xf7   :  { %v329_v39 = vsel %vm2024_vm4, %v1876_v34, %v327_v38 }
  0xf8   :  { %v341_v49 = vmul.f32 %v337_v46, %v329_v39 }
  0xfa   :  { %346 = vrot.lane.b32.xlu0 %v329_v39, %s1941_s7 }
 0x168   :  { %v345_v40 = vpop.permute.xlu0 %344 }
 0x169   :  { %v350_v41 = vmul.f32 %v345_v40, %v328_v37 }
 0x16b   :  { %354 = vrot.lane.b32.xlu0 %v350_v41, %s1940_s1 }
 0x16c   :  { %v347_v42 = vpop.permute.xlu0 %346 }
 0x16d   :  { %v351_v43 = vmul.f32 %v347_v42, %v329_v39  ;;  %v1855_v42 = vld [vmem:[%s2655_s2] sm:$0xff]  }
 0x16f   :  { %356 = vrot.lane.b32.xlu1 %v351_v43, %s1940_s1  ;;  %v1856_v43 = vld [vmem:[%s2656_s0 + $0x10] sm:$0xff]  }
 0x170   :  { %1763 = vmatprep.mubr.msk.bf16.mxu0 %vm100_vm0, %v1856_v43 }
 0x171   :  { %1764 = vmatmul.mubr.msk.bf16.gmra.mrb[4].mxu0 %vm100_vm0, %v1857_v44 }
 0x1dd   :  { %v355_v47 = vpop.permute.xlu0 %354 }
 0x1de   :  { %v360_v48 = vadd.f32 %v355_v47, %v340_v45  ;;  %v1858_v45 = vld [vmem:[%s2655_s2 + $0x8] sm:$0xff]  }
 0x1e0   :  { %1877 = vtanh.f32 %v360_v48 }
 0x1e1   :  { %v357_v50 = vpop.permute.xlu1 %356 }
 0x1e2   :  { %v361_v51 = vadd.f32 %v357_v50, %v341_v49 }
 0x1e4   :  { %1879 = vtanh.f32 %v361_v51 }
 0x1ea   :  { %v1878_v52 = vpop.eup %1877 }
 0x1eb   :  { %366 = vrot.lane.b32.xlu0 %v1878_v52, %s1941_s7 }
 0x1ee   :  { %v1880_v53 = vpop.eup %1879 }
 0x1ef   :  { %368 = vrot.lane.b32.xlu1 %v1880_v53, %s1941_s7 }
 0x25d   :  { %v367_v56 = vpop.permute.xlu0 %366 }
 0x25e   :  { %v2049_v57 = vmul.f32 %v367_v56, %v328_v37 }
 0x260   :  { %386 = vrot.lane.b32.xlu0 %v2049_v57, %s1940_s1 }
 0x261   :  { %v369_v58 = vpop.permute.xlu1 %368 }
 0x262   :  { %v2054_v59 = vmul.f32 %v369_v58, %v329_v39  ;;  %v2120_v58 = vpop.f32.mrb[4].mxu0 }
 0x264   :  { %388 = vrot.lane.b32.xlu1 %v2054_v59, %s1940_s1  ;;  %376 = vrot.lane.b32.xlu0 %v360_v48, %s1942_s12 }
 0x268   :  { %378 = vrot.lane.b32.xlu1 %v361_v51, %s1942_s12 }
 0x2d2   :  { %v387_v60 = vpop.permute.xlu0 %386 }
 0x2d3   :  { %392 = vst.msk [vmem:[#allocation3] sm:$0xff] %vm100_vm0, %v387_v60  ;;  %v175_v60 = vpop.f32.mrb[5].mxu0 }
 0x2d6   :  { %v389_v61 = vpop.permute.xlu1 %388  ;;  %v377_v62 = vpop.permute.xlu0 %376 }
 0x2d7   :  { %393 = vst.msk [vmem:[#allocation3 + $0x8] sm:$0xff] %vm100_vm0, %v389_v61  ;;  %382 = vst.msk [vmem:[#allocation4] sm:$0xff] %vm100_vm0, %v377_v62  ;;  %v2122_v61 = vpop.f32.mrb[6].mxu0 }
 0x2d8   :  { %v178_v62 = vpop.f32.mrb[7].mxu0 }
 0x2da   :  { %v379_v63 = vpop.permute.xlu1 %378  ;;  %v431_v0 = vld [vmem:[#allocation3] sm:$0xff] }
 0x2db   :  { %383 = vst.msk [vmem:[#allocation4 + $0x8] sm:$0xff] %vm100_vm0, %v379_v63  ;;  %v176_v63 = vadd.f32 %v2016_v14, %v175_v60 }
 0x2de   :  { %v432_v2 = vld [vmem:[#allocation3 + $0x8] sm:$0xff]  ;;  %v508_v25 = vld [vmem:[#allocation4] sm:$0xff] }
 0x2df   :  { %v433_v3 = vpack.c.bf16 %v432_v2, %v431_v0  ;;  %v179_v2 = vadd.f32 %v2016_v14, %v178_v62 }
 0x2e1   :  { %1788 = vmatmul.mubr.msk.bf16.vlgmr.msra.gmra.mrb[4].mxu1 %vm100_vm0, %v433_v3 }
 0x2e2   :  { %1795 = vmatprep.mubr.msk.bf16.mxu1 %vm1939_vm1, %v1938_v1  ;;  %v509_v27 = vld [vmem:[#allocation4 + $0x8] sm:$0xff]  ;;  %1792 = vmatpush3.bf16.msra.mxu1 %v1855_v42 }
 0x2e3   :  { %1793 = vmatprep.subr.bf16.mxu1 %v1938_v1 }
 0x2e6   :  { %1794 = vmatpush3.bf16.msra.mxu1 %v1858_v45 }
 0x2e7   :  { %1799 = vmatprep.subr.bf16.mxu1 %v1938_v1 }
 0x3b4   :  { %v487_v5 = vpop.f32.mrb[4].mxu1 }
 0x3b5   :  { %v494_v7 = vadd.f32 %v487_v5, %v168_v4  ;;  %v1789_v8 = vpop.f32.mrb[5].mxu1 }
 0x3b6   :  { %v490_v9 = vpop.f32.mrb[6].mxu1 }
 0x3b7   :  { %v496_v10 = vmul.f32 0.5, %v494_v7  ;;  %v495_v11 = vadd.f32 %v490_v9, %v171_v6  ;;  %v1790_v12 = vpop.f32.mrb[7].mxu1 }
 0x3b9   :  { %v498_v13 = vsel %vm2024_vm4, %v494_v7, %v496_v10  ;;  %v497_v16 = vmul.f32 0.5, %v495_v11 }
 0x3ba   :  { %1881 = vtanh.f32 %v498_v13 }
 0x3bb   :  { %v499_v17 = vsel %vm2024_vm4, %v495_v11, %v497_v16 }
 0x3bc   :  { %1883 = vtanh.f32 %v499_v17 }
 0x3c4   :  { %v1882_v15 = vpop.eup %1881 }
 0x3c5   :  { %v502_v18 = vmul.f32 0.5, %v1882_v15 }
 0x3c6   :  { %v1884_v19 = vpop.eup %1883 }
 0x3c7   :  { %v504_v21 = vadd.f32 0.5, %v502_v18  ;;  %v503_v20 = vmul.f32 0.5, %v1884_v19 }
 0x3c9   :  { %v506_v22 = vsel %vm2024_vm4, %v1882_v15, %v504_v21  ;;  %v505_v23 = vadd.f32 0.5, %v503_v20 }
 0x3ca   :  { %522 = vrot.lane.b32.xlu0 %v506_v22, %s1941_s7 }
 0x3cb   :  { %v507_v24 = vsel %vm2024_vm4, %v1884_v19, %v505_v23 }
 0x3cc   :  { %524 = vrot.lane.b32.xlu1 %v507_v24, %s1941_s7 }
 0x3ce   :  { %512 = vrot.lane.b32.xlu0 %v508_v25, %s1940_s1 }
 0x3d0   :  { %514 = vrot.lane.b32.xlu1 %v509_v27, %s1940_s1 }
 0x43c   :  { %v523_v28 = vpop.permute.xlu0 %522 }
 0x43d   :  { %v528_v29 = vmul.f32 %v523_v28, %v506_v22 }
 0x43e   :  { %v525_v30 = vpop.permute.xlu1 %524 }
 0x43f   :  { %v529_v31 = vmul.f32 %v525_v30, %v507_v24  ;;  %532 = vrot.lane.b32.xlu0 %v528_v29, %s1940_s1 }
 0x440   :  { %v513_v32 = vpop.permute.xlu0 %512 }
 0x441   :  { %534 = vrot.lane.b32.xlu1 %v529_v31, %s1940_s1  ;;  %v518_v34 = vmul.f32 %v513_v32, %v506_v22 }
 0x442   :  { %v515_v33 = vpop.permute.xlu1 %514 }
 0x443   :  { %v519_v36 = vmul.f32 %v515_v33, %v507_v24 }
 0x4b1   :  { %v533_v35 = vpop.permute.xlu0 %532 }
 0x4b2   :  { %v538_v37 = vadd.f32 %v533_v35, %v518_v34 }
 0x4b3   :  { %v535_v38 = vpop.permute.xlu1 %534 }
 0x4b4   :  { %1885 = vtanh.f32 %v538_v37  ;;  %v539_v39 = vadd.f32 %v535_v38, %v519_v36  ;;  %v1859_v38 = vld [vmem:[%s2655_s2] sm:$0xff]  }
 0x4b6   :  { %1887 = vtanh.f32 %v539_v39 }
 0x4be   :  { %v1886_v40 = vpop.eup %1885 }
 0x4bf   :  { %544 = vrot.lane.b32.xlu0 %v1886_v40, %s1941_s7 }
 0x4c0   :  { %v1888_v41 = vpop.eup %1887 }
 0x4c1   :  { %546 = vrot.lane.b32.xlu1 %v1888_v41, %s1941_s7 }
 0x531   :  { %v545_v46 = vpop.permute.xlu0 %544 }
 0x532   :  { %v2103_v47 = vmul.f32 %v545_v46, %v506_v22 }
 0x533   :  { %v547_v48 = vpop.permute.xlu1 %546 }
 0x534   :  { %v2105_v49 = vmul.f32 %v547_v48, %v507_v24  ;;  %564 = vrot.lane.b32.xlu0 %v2103_v47, %s1940_s1 }
 0x536   :  { %566 = vrot.lane.b32.xlu1 %v2105_v49, %s1940_s1 }
 0x538   :  { %554 = vrot.lane.b32.xlu0 %v538_v37, %s1942_s12 }
 0x53a   :  { %556 = vrot.lane.b32.xlu1 %v539_v39, %s1942_s12  ;;  %v1860_v39 = vld [vmem:[%s2655_s2 + $0x8] sm:$0xff]  }
 0x5a6   :  { %v565_v50 = vpop.permute.xlu0 %564 }
 0x5a7   :  { %570 = vst.msk [vmem:[#allocation3] sm:$0xff] %vm100_vm0, %v565_v50 }
 0x5a8   :  { %v567_v51 = vpop.permute.xlu1 %566 }
 0x5a9   :  { %571 = vst.msk [vmem:[#allocation3 + $0x8] sm:$0xff] %vm100_vm0, %v567_v51 }
 0x5aa   :  { %v555_v52 = vpop.permute.xlu0 %554 }
 0x5ab   :  { %560 = vst.msk [vmem:[#allocation4] sm:$0xff] %vm100_vm0, %v555_v52 }
 0x5ac   :  { %v557_v53 = vpop.permute.xlu1 %556 }
 0x5ad   :  { %561 = vst.msk [vmem:[#allocation4 + $0x8] sm:$0xff] %vm100_vm0, %v557_v53  ;;  %v184_v53 = vadd.f32 %v2120_v58, %v2016_v14 }
 0x5ae   :  { %v609_v54 = vld [vmem:[#allocation3] sm:$0xff] }
 0x5b0   :  { %v610_v55 = vld [vmem:[#allocation3 + $0x8] sm:$0xff] }
 0x5b1   :  { %v611_v56 = vpack.c.bf16 %v610_v55, %v609_v54  ;;  %v187_v55 = vadd.f32 %v2122_v61, %v2016_v14 }
 0x5b2   :  { %v686_v20 = vld [vmem:[#allocation4] sm:$0xff] }
 0x5b3   :  { %1796 = vmatmul.mubr.msk.bf16.vlgmr.msra.gmra.mrb[8].mxu1 %vm100_vm0, %v611_v56 }
 0x5b4   :  { %1803 = vmatprep.mubr.msk.bf16.mxu1 %vm1939_vm1, %v1938_v1  ;;  %v687_v22 = vld [vmem:[#allocation4 + $0x8] sm:$0xff]  ;;  %1800 = vmatpush3.bf16.msra.mxu1 %v1859_v38 }
 0x5b5   :  { %1801 = vmatprep.subr.bf16.mxu1 %v1938_v1 }
 0x5b8   :  { %1802 = vmatpush3.bf16.msra.mxu1 %v1860_v39 }
 0x5b9   :  { %1815 = vmatprep.subr.bf16.mxu1 %v1938_v1 }
 0x686   :  { %v665_v0 = vpop.f32.mrb[8].mxu1 }
 0x687   :  { %v672_v3 = vadd.f32 %v665_v0, %v176_v63  ;;  %v1797_v4 = vpop.f32.mrb[9].mxu1 }
 0x688   :  { %v668_v5 = vpop.f32.mrb[10].mxu1 }
 0x689   :  { %v674_v6 = vmul.f32 0.5, %v672_v3  ;;  %v673_v7 = vadd.f32 %v668_v5, %v179_v2  ;;  %v1798_v8 = vpop.f32.mrb[11].mxu1 }
 0x68b   :  { %v676_v9 = vsel %vm2024_vm4, %v672_v3, %v674_v6  ;;  %v675_v10 = vmul.f32 0.5, %v673_v7 }
 0x68c   :  { %1889 = vtanh.f32 %v676_v9 }
 0x68d   :  { %v677_v11 = vsel %vm2024_vm4, %v673_v7, %v675_v10 }
 0x68e   :  { %1891 = vtanh.f32 %v677_v11 }
 0x696   :  { %v1890_v12 = vpop.eup %1889 }
 0x697   :  { %v680_v13 = vmul.f32 0.5, %v1890_v12 }
 0x698   :  { %v1892_v16 = vpop.eup %1891 }
 0x699   :  { %v682_v17 = vadd.f32 0.5, %v680_v13  ;;  %v681_v15 = vmul.f32 0.5, %v1892_v16 }
 0x69b   :  { %v684_v18 = vsel %vm2024_vm4, %v1890_v12, %v682_v17  ;;  %v683_v19 = vadd.f32 0.5, %v681_v15 }
 0x69c   :  { %700 = vrot.lane.b32.xlu0 %v684_v18, %s1941_s7 }
 0x69d   :  { %v685_v21 = vsel %vm2024_vm4, %v1892_v16, %v683_v19 }
 0x69e   :  { %702 = vrot.lane.b32.xlu1 %v685_v21, %s1941_s7 }
 0x6a0   :  { %690 = vrot.lane.b32.xlu0 %v686_v20, %s1940_s1 }
 0x6a2   :  { %692 = vrot.lane.b32.xlu1 %v687_v22, %s1940_s1 }
 0x70e   :  { %v701_v23 = vpop.permute.xlu0 %700 }
 0x70f   :  { %v706_v24 = vmul.f32 %v701_v23, %v684_v18 }
 0x710   :  { %v703_v25 = vpop.permute.xlu1 %702 }
 0x711   :  { %v707_v27 = vmul.f32 %v703_v25, %v685_v21  ;;  %710 = vrot.lane.b32.xlu0 %v706_v24, %s1940_s1 }
 0x712   :  { %v691_v28 = vpop.permute.xlu0 %690 }
 0x713   :  { %712 = vrot.lane.b32.xlu1 %v707_v27, %s1940_s1  ;;  %v696_v30 = vmul.f32 %v691_v28, %v684_v18  ;;  %v1861_v28 = vld [vmem:[%s2655_s2] sm:$0xff]  }
 0x714   :  { %v693_v29 = vpop.permute.xlu1 %692  ;;  %1808 = vmatpush3.bf16.msra.mxu0 %v1861_v28 }
 0x715   :  { %v697_v32 = vmul.f32 %v693_v29, %v685_v21  ;;  %v1862_v29 = vld [vmem:[%s2656_s0 + $0x20] sm:$0xff]   ;;  %1809 = vmatprep.subr.bf16.mxu0 %v1938_v1 }
 0x716   :  { %1767 = vmatprep.mubr.msk.bf16.mxu0 %vm100_vm0, %v1862_v29 }
 0x783   :  { %v711_v31 = vpop.permute.xlu0 %710 }
 0x784   :  { %v716_v33 = vadd.f32 %v711_v31, %v696_v30  ;;  %v1863_v30 = vld [vmem:[%s2656_s0 + $0x28] sm:$0xff]  }
 0x785   :  { %v713_v34 = vpop.permute.xlu1 %712  ;;  %v1864_v31 = vld [vmem:[%s2655_s2 + $0x8] sm:$0xff]   ;;  %1768 = vmatmul.mubr.msk.bf16.gmra.mrb[8].mxu0 %vm100_vm0, %v1863_v30 }
 0x786   :  { %1893 = vtanh.f32 %v716_v33  ;;  %v717_v35 = vadd.f32 %v713_v34, %v697_v32  ;;  %1810 = vmatpush3.bf16.msra.mxu0 %v1864_v31  ;;  %v1865_v34 = vld [vmem:[%s2656_s0 + $0x30] sm:$0xff]  }
 0x787   :  { %1823 = vmatprep.subr.bf16.mxu0 %v1938_v1  ;;  %1771 = vmatprep.mubr.msk.bf16.mxu0 %vm100_vm0, %v1865_v34 }
 0x788   :  { %1895 = vtanh.f32 %v717_v35 }
 0x790   :  { %v1894_v36 = vpop.eup %1893 }
 0x791   :  { %722 = vrot.lane.b32.xlu0 %v1894_v36, %s1941_s7 }
 0x792   :  { %v1896_v37 = vpop.eup %1895 }
 0x793   :  { %724 = vrot.lane.b32.xlu1 %v1896_v37, %s1941_s7 }
 0x803   :  { %v723_v40 = vpop.permute.xlu0 %722 }
 0x804   :  { %v2150_v41 = vmul.f32 %v723_v40, %v684_v18 }
 0x805   :  { %v725_v42 = vpop.permute.xlu1 %724 }
 0x806   :  { %v2152_v43 = vmul.f32 %v725_v42, %v685_v21  ;;  %742 = vrot.lane.b32.xlu0 %v2150_v41, %s1940_s1 }
 0x808   :  { %744 = vrot.lane.b32.xlu1 %v2152_v43, %s1940_s1 }
 0x80a   :  { %732 = vrot.lane.b32.xlu0 %v716_v33, %s1942_s12 }
 0x80c   :  { %734 = vrot.lane.b32.xlu1 %v717_v35, %s1942_s12  ;;  %v1866_v35 = vld [vmem:[%s2656_s0 + $0x38] sm:$0xff]  }
 0x80d   :  { %1772 = vmatmul.mubr.msk.bf16.gmra.mrb[12].mxu0 %vm100_vm0, %v1866_v35 }
 0x80e   :  { %1811 = vmatprep.mubr.msk.bf16.mxu0 %vm1939_vm1, %v1938_v1 }
 0x858   :  { %v2223_v40 = vpop.f32.mrb[8].mxu0 }
 0x859   :  { %v191_v42 = vpop.f32.mrb[9].mxu0 }
 0x878   :  { %v743_v44 = vpop.permute.xlu0 %742 }
 0x879   :  { %748 = vst.msk [vmem:[#allocation3] sm:$0xff] %vm100_vm0, %v743_v44  ;;  %v2225_v44 = vpop.f32.mrb[10].mxu0 }
 0x87a   :  { %v745_v45 = vpop.permute.xlu1 %744 }
 0x87b   :  { %749 = vst.msk [vmem:[#allocation3 + $0x8] sm:$0xff] %vm100_vm0, %v745_v45  ;;  %v194_v45 = vpop.f32.mrb[11].mxu0 }
 0x87c   :  { %v733_v46 = vpop.permute.xlu0 %732 }
 0x87d   :  { %738 = vst.msk [vmem:[#allocation4] sm:$0xff] %vm100_vm0, %v733_v46 }
 0x87e   :  { %v735_v48 = vpop.permute.xlu1 %734 }
 0x87f   :  { %739 = vst.msk [vmem:[#allocation4 + $0x8] sm:$0xff] %vm100_vm0, %v735_v48 }
 0x880   :  { %v787_v50 = vld [vmem:[#allocation3] sm:$0xff] }
 0x882   :  { %v788_v51 = vld [vmem:[#allocation3 + $0x8] sm:$0xff] }
 0x883   :  { %v789_v52 = vpack.c.bf16 %v788_v51, %v787_v50 }
 0x884   :  { %v864_v12 = vld [vmem:[#allocation4] sm:$0xff] }
 0x885   :  { %1804 = vmatmul.mubr.msk.bf16.vlgmr.msra.gmra.mrb[12].mxu1 %vm100_vm0, %v789_v52 }
 0x886   :  { %1819 = vmatprep.mubr.msk.bf16.mxu1 %vm1939_vm1, %v1938_v1  ;;  %v865_v13 = vld [vmem:[#allocation4 + $0x8] sm:$0xff] }
 0x958   :  { %v843_v54 = vpop.f32.mrb[12].mxu1 }
 0x959   :  { %v850_v56 = vadd.f32 %v843_v54, %v184_v53  ;;  %v1805_v60 = vpop.f32.mrb[13].mxu1 }
 0x95a   :  { %v846_v62 = vpop.f32.mrb[14].mxu1 }
 0x95b   :  { %v852_v63 = vmul.f32 0.5, %v850_v56  ;;  %v851_v0 = vadd.f32 %v846_v62, %v187_v55  ;;  %v1806_v2 = vpop.f32.mrb[15].mxu1  ;;  %v2234_v55 = vpop.f32.mrb[12].mxu0 }
 0x95c   :  { %v195_v2 = vadd.f32 %v2016_v14, %v194_v45 }
 0x95d   :  { %v854_v3 = vsel %vm2024_vm4, %v850_v56, %v852_v63  ;;  %v853_v4 = vmul.f32 0.5, %v851_v0  ;;  %v2236_v56 = vpop.f32.mrb[13].mxu0  ;;  %v192_v63 = vadd.f32 %v2016_v14, %v191_v42 }
 0x95e   :  { %1897 = vtanh.f32 %v854_v3  ;;  %v2238_v60 = vpop.f32.mrb[14].mxu0 }
 0x95f   :  { %v855_v5 = vsel %vm2024_vm4, %v851_v0, %v853_v4  ;;  %v2240_v62 = vpop.f32.mrb[15].mxu0 }
 0x960   :  { %1899 = vtanh.f32 %v855_v5 }
 0x968   :  { %v1898_v58 = vpop.eup %1897 }
 0x969   :  { %v858_v6 = vmul.f32 0.5, %v1898_v58 }
 0x96a   :  { %v1900_v7 = vpop.eup %1899 }
 0x96b   :  { %v860_v8 = vadd.f32 0.5, %v858_v6  ;;  %v859_v61 = vmul.f32 0.5, %v1900_v7 }
 0x96d   :  { %v862_v9 = vsel %vm2024_vm4, %v1898_v58, %v860_v8  ;;  %v861_v10 = vadd.f32 0.5, %v859_v61 }
 0x96e   :  { %878 = vrot.lane.b32.xlu0 %v862_v9, %s1941_s7 }
 0x96f   :  { %v863_v11 = vsel %vm2024_vm4, %v1900_v7, %v861_v10 }
 0x970   :  { %880 = vrot.lane.b32.xlu1 %v863_v11, %s1941_s7 }
 0x972   :  { %868 = vrot.lane.b32.xlu0 %v864_v12, %s1940_s1 }
 0x974   :  { %870 = vrot.lane.b32.xlu1 %v865_v13, %s1940_s1 }
 0x9e0   :  { %v879_v16 = vpop.permute.xlu0 %878 }
 0x9e1   :  { %v884_v17 = vmul.f32 %v879_v16, %v862_v9 }
 0x9e2   :  { %v881_v15 = vpop.permute.xlu1 %880 }
 0x9e3   :  { %v885_v18 = vmul.f32 %v881_v15, %v863_v11  ;;  %888 = vrot.lane.b32.xlu0 %v884_v17, %s1940_s1 }
 0x9e4   :  { %v869_v19 = vpop.permute.xlu0 %868 }
 0x9e5   :  { %890 = vrot.lane.b32.xlu1 %v885_v18, %s1940_s1  ;;  %v874_v20 = vmul.f32 %v869_v19, %v862_v9 }
 0x9e6   :  { %v871_v21 = vpop.permute.xlu1 %870 }
 0x9e7   :  { %v875_v23 = vmul.f32 %v871_v21, %v863_v11 }
 0xa55   :  { %v889_v22 = vpop.permute.xlu0 %888 }
 0xa56   :  { %v894_v24 = vadd.f32 %v889_v22, %v874_v20 }
 0xa57   :  { %v891_v25 = vpop.permute.xlu1 %890 }
 0xa58   :  { %1901 = vtanh.f32 %v894_v24  ;;  %v895_v27 = vadd.f32 %v891_v25, %v875_v23 }
 0xa5a   :  { %1903 = vtanh.f32 %v895_v27 }
 0xa62   :  { %v1902_v32 = vpop.eup %1901 }
 0xa63   :  { %900 = vrot.lane.b32.xlu0 %v1902_v32, %s1941_s7 }
 0xa64   :  { %v1904_v33 = vpop.eup %1903 }
 0xa65   :  { %902 = vrot.lane.b32.xlu1 %v1904_v33, %s1941_s7 }
 0xad5   :  { %v901_v36 = vpop.permute.xlu0 %900 }
 0xad6   :  { %v2213_v37 = vmul.f32 %v901_v36, %v862_v9  ;;  %v1867_v36 = vld [vmem:[%s2655_s2] sm:$0xff]  }
 0xad7   :  { %v903_v38 = vpop.permute.xlu1 %902  ;;  %1816 = vmatpush3.bf16.msra.mxu1 %v1867_v36  ;;  %v1869_v36 = vld [vmem:[%s2655_s2] sm:$0xff]  }
 0xad8   :  { %v2215_v39 = vmul.f32 %v903_v38, %v863_v11  ;;  %920 = vrot.lane.b32.xlu0 %v2213_v37, %s1940_s1  ;;  %1817 = vmatprep.subr.bf16.mxu1 %v1938_v1  ;;  %v1868_v38 = vld [vmem:[%s2655_s2 + $0x8] sm:$0xff]  }
 0xada   :  { %922 = vrot.lane.b32.xlu1 %v2215_v39, %s1940_s1 }
 0xadb   :  { %1818 = vmatpush3.bf16.msra.mxu1 %v1868_v38  ;;  %v1870_v38 = vld [vmem:[%s2655_s2 + $0x8] sm:$0xff]  }
 0xadc   :  { %910 = vrot.lane.b32.xlu0 %v894_v24, %s1942_s12  ;;  %1831 = vmatprep.subr.bf16.mxu1 %v1938_v1 }
 0xade   :  { %912 = vrot.lane.b32.xlu1 %v895_v27, %s1942_s12 }
 0xb4a   :  { %v921_v46 = vpop.permute.xlu0 %920 }
 0xb4b   :  { %926 = vst.msk [vmem:[#allocation3] sm:$0xff] %vm100_vm0, %v921_v46 }
 0xb4c   :  { %v923_v48 = vpop.permute.xlu1 %922 }
 0xb4d   :  { %927 = vst.msk [vmem:[#allocation3 + $0x8] sm:$0xff] %vm100_vm0, %v923_v48 }
 0xb4e   :  { %v911_v50 = vpop.permute.xlu0 %910 }
 0xb4f   :  { %916 = vst.msk [vmem:[#allocation4] sm:$0xff] %vm100_vm0, %v911_v50 }
 0xb50   :  { %v913_v51 = vpop.permute.xlu1 %912 }
 0xb51   :  { %917 = vst.msk [vmem:[#allocation4 + $0x8] sm:$0xff] %vm100_vm0, %v913_v51 }
 0xb52   :  { %v965_v52 = vld [vmem:[#allocation3] sm:$0xff] }
 0xb54   :  { %v966_v53 = vld [vmem:[#allocation3 + $0x8] sm:$0xff] }
 0xb55   :  { %v967_v54 = vpack.c.bf16 %v966_v53, %v965_v52 }
 0xb56   :  { %v1042_v19 = vld [vmem:[#allocation4] sm:$0xff] }
 0xb57   :  { %1812 = vmatmul.mubr.msk.bf16.vlgmr.msra.gmra.mrb[16].mxu0 %vm100_vm0, %v967_v54 }
 0xb58   :  { %1827 = vmatprep.mubr.msk.bf16.mxu0 %vm1939_vm1, %v1938_v1  ;;  %v1043_v21 = vld [vmem:[#allocation4 + $0x8] sm:$0xff]  ;;  %1824 = vmatpush3.bf16.msra.mxu0 %v1869_v36 }
 0xb59   :  { %1825 = vmatprep.subr.bf16.mxu0 %v1938_v1 }
 0xb5c   :  { %1826 = vmatpush3.bf16.msra.mxu0 %v1870_v38 }
 0xc2a   :  { %v1021_v0 = vpop.f32.mrb[16].mxu0 }
 0xc2b   :  { %v1028_v3 = vadd.f32 %v1021_v0, %v192_v63  ;;  %v1813_v4 = vpop.f32.mrb[17].mxu0 }
 0xc2c   :  { %v1024_v5 = vpop.f32.mrb[18].mxu0  ;;  %v203_v4 = vadd.f32 %v2225_v44, %v2016_v14 }
 0xc2d   :  { %v1030_v58 = vmul.f32 0.5, %v1028_v3  ;;  %v1029_v6 = vadd.f32 %v1024_v5, %v195_v2  ;;  %v1814_v7 = vpop.f32.mrb[19].mxu0  ;;  %v200_v2 = vadd.f32 %v2223_v40, %v2016_v14 }
 0xc2f   :  { %v1032_v8 = vsel %vm2024_vm4, %v1028_v3, %v1030_v58  ;;  %v1031_v61 = vmul.f32 0.5, %v1029_v6 }
 0xc30   :  { %1905 = vtanh.f32 %v1032_v8 }
 0xc31   :  { %v1033_v9 = vsel %vm2024_vm4, %v1029_v6, %v1031_v61 }
 0xc32   :  { %1907 = vtanh.f32 %v1033_v9 }
 0xc3a   :  { %v1906_v10 = vpop.eup %1905 }
 0xc3b   :  { %v1036_v11 = vmul.f32 0.5, %v1906_v10 }
 0xc3c   :  { %v1908_v12 = vpop.eup %1907 }
 0xc3d   :  { %v1038_v13 = vadd.f32 0.5, %v1036_v11  ;;  %v1037_v16 = vmul.f32 0.5, %v1908_v12 }
 0xc3f   :  { %v1040_v17 = vsel %vm2024_vm4, %v1906_v10, %v1038_v13  ;;  %v1039_v15 = vadd.f32 0.5, %v1037_v16 }
 0xc40   :  { %1056 = vrot.lane.b32.xlu0 %v1040_v17, %s1941_s7 }
 0xc41   :  { %v1041_v18 = vsel %vm2024_vm4, %v1908_v12, %v1039_v15 }
 0xc42   :  { %1058 = vrot.lane.b32.xlu1 %v1041_v18, %s1941_s7 }
 0xc44   :  { %1046 = vrot.lane.b32.xlu0 %v1042_v19, %s1940_s1 }
 0xc46   :  { %1048 = vrot.lane.b32.xlu1 %v1043_v21, %s1940_s1 }
 0xcb2   :  { %v1057_v20 = vpop.permute.xlu0 %1056 }
 0xcb3   :  { %v1062_v22 = vmul.f32 %v1057_v20, %v1040_v17 }
 0xcb4   :  { %v1059_v23 = vpop.permute.xlu1 %1058 }
 0xcb5   :  { %v1063_v24 = vmul.f32 %v1059_v23, %v1041_v18  ;;  %1066 = vrot.lane.b32.xlu0 %v1062_v22, %s1940_s1 }
 0xcb6   :  { %v1047_v25 = vpop.permute.xlu0 %1046 }
 0xcb7   :  { %1068 = vrot.lane.b32.xlu1 %v1063_v24, %s1940_s1  ;;  %v1052_v28 = vmul.f32 %v1047_v25, %v1040_v17 }
 0xcb8   :  { %v1049_v27 = vpop.permute.xlu1 %1048 }
 0xcb9   :  { %v1053_v30 = vmul.f32 %v1049_v27, %v1041_v18 }
 0xd27   :  { %v1067_v29 = vpop.permute.xlu0 %1066 }
 0xd28   :  { %v1072_v31 = vadd.f32 %v1067_v29, %v1052_v28 }
 0xd29   :  { %v1069_v32 = vpop.permute.xlu1 %1068 }
 0xd2a   :  { %1909 = vtanh.f32 %v1072_v31  ;;  %v1073_v33 = vadd.f32 %v1069_v32, %v1053_v30 }
 0xd2c   :  { %1911 = vtanh.f32 %v1073_v33 }
 0xd34   :  { %v1910_v34 = vpop.eup %1909 }
 0xd35   :  { %1078 = vrot.lane.b32.xlu0 %v1910_v34, %s1941_s7 }
 0xd36   :  { %v1912_v35 = vpop.eup %1911 }
 0xd37   :  { %1080 = vrot.lane.b32.xlu1 %v1912_v35, %s1941_s7 }
 0xda7   :  { %v1079_v42 = vpop.permute.xlu0 %1078 }
 0xda8   :  { %v2268_v45 = vmul.f32 %v1079_v42, %v1040_v17  ;;  %v2333_v42 = vld [vmem:[%s2659_s4] sm:$0xff] }
 0xda9   :  { %v1081_v46 = vpop.permute.xlu1 %1080  ;;  %vm394_vm5 = vcmp.eq.s32.totalorder %v2333_v42, 0  ;;  %vm572_vm10 = vcmp.eq.s32.totalorder %v2333_v42, 1  ;;  %vm750_vm14 = vcmp.eq.s32.totalorder %v2333_v42, 2  ;;  %vm928_vm3 = vcmp.eq.s32.totalorder %v2333_v42, 3 }
 0xdaa   :  { %v2270_v48 = vmul.f32 %v1081_v46, %v1041_v18  ;;  %1098 = vrot.lane.b32.xlu0 %v2268_v45, %s1940_s1 }
 0xdac   :  { %1100 = vrot.lane.b32.xlu1 %v2270_v48, %s1940_s1 }
 0xdae   :  { %1088 = vrot.lane.b32.xlu0 %v1072_v31, %s1942_s12 }
 0xdb0   :  { %1090 = vrot.lane.b32.xlu1 %v1073_v33, %s1942_s12  ;;  %v1943_v33 = vmov 0  }
 0xdb1   :  { %1845 = vset.pattern.permute.xlu0 %v1943_v33  ;;  %1846 = vset.pattern.permute.xlu1 %v1943_v33 }
 0xe1c   :  { %v1099_v50 = vpop.permute.xlu0 %1098 }
 0xe1d   :  { %1104 = vst.msk [vmem:[#allocation3] sm:$0xff] %vm100_vm0, %v1099_v50  ;;  %v2338_v50 = vld [vmem:[%s2659_s4 + $0x8] sm:$0xff] }
 0xe1e   :  { %v1101_v51 = vpop.permute.xlu1 %1100  ;;  %vm395_vm6 = vcmp.eq.s32.totalorder %v2338_v50, 0  ;;  %vm573_vm8 = vcmp.eq.s32.totalorder %v2338_v50, 1  ;;  %vm751_vm13 = vcmp.eq.s32.totalorder %v2338_v50, 2 }
 0xe1f   :  { %1105 = vst.msk [vmem:[#allocation3 + $0x8] sm:$0xff] %vm100_vm0, %v1101_v51 }
 0xe20   :  { %v1089_v52 = vpop.permute.xlu0 %1088 }
 0xe21   :  { %1094 = vst.msk [vmem:[#allocation4] sm:$0xff] %vm100_vm0, %v1089_v52 }
 0xe22   :  { %v1091_v53 = vpop.permute.xlu1 %1090 }
 0xe23   :  { %1095 = vst.msk [vmem:[#allocation4 + $0x8] sm:$0xff] %vm100_vm0, %v1091_v53 }
 0xe24   :  { %v1143_v54 = vld [vmem:[#allocation3] sm:$0xff] }
 0xe26   :  { %v1144_v63 = vld [vmem:[#allocation3 + $0x8] sm:$0xff] }
 0xe27   :  { %v1145_v0 = vpack.c.bf16 %v1144_v63, %v1143_v54  ;;  %v398_v54 = vsel %vm394_vm5, 1, %v1943_v33  ;;  %v399_v63 = vsel %vm395_vm6, 1, %v1943_v33 }
 0xe28   :  { %v1220_v18 = vld [vmem:[#allocation4] sm:$0xff] }
 0xe29   :  { %1820 = vmatmul.mubr.msk.bf16.vlgmr.msra.gmra.mrb[16].mxu1 %vm100_vm0, %v1145_v0  ;;  %v397_v0 = vld [vmem:[%s2658_s5 + $0x8] sm:$0xff] }
 0xe2a   :  { %1835 = vmatprep.mubr.msk.bf16.mxu1 %vm1939_vm1, %v1938_v1  ;;  %v1221_v19 = vld [vmem:[#allocation4 + $0x8] sm:$0xff]  ;;  %vm929_vm1 = vcmp.eq.s32.totalorder %v2338_v50, 3 }
 0xefc   :  { %v1199_v3 = vpop.f32.mrb[16].mxu1 }
 0xefd   :  { %v1206_v5 = vadd.f32 %v1199_v3, %v200_v2  ;;  %v1821_v58 = vpop.f32.mrb[17].mxu1  ;;  %v396_v2 = vld [vmem:[%s2658_s5] sm:$0xff] }
 0xefe   :  { %v1202_v6 = vpop.f32.mrb[18].mxu1 }
 0xeff   :  { %v1208_v7 = vmul.f32 0.5, %v1206_v5  ;;  %v1207_v8 = vadd.f32 %v1202_v6, %v203_v4  ;;  %v1822_v61 = vpop.f32.mrb[19].mxu1 }
 0xf01   :  { %v1210_v9 = vsel %vm2024_vm4, %v1206_v5, %v1208_v7  ;;  %v1209_v10 = vmul.f32 0.5, %v1207_v8 }
 0xf02   :  { %1913 = vtanh.f32 %v1210_v9 }
 0xf03   :  { %v1211_v11 = vsel %vm2024_vm4, %v1207_v8, %v1209_v10 }
 0xf04   :  { %1915 = vtanh.f32 %v1211_v11 }
 0xf0c   :  { %v1914_v40 = vpop.eup %1913 }
 0xf0d   :  { %v1214_v12 = vmul.f32 0.5, %v1914_v40 }
 0xf0e   :  { %v1916_v13 = vpop.eup %1915 }
 0xf0f   :  { %v1216_v16 = vadd.f32 0.5, %v1214_v12  ;;  %v1215_v14 = vmul.f32 0.5, %v1916_v13  ;;  %v576_v12 = vsel %vm572_vm10, 1, %v1943_v33  ;;  %vm1285_vm10 = vcmp.eq.s32.totalorder %v2338_v50, 5 }
 0xf11   :  { %v1218_v44 = vsel %vm2024_vm4, %v1914_v40, %v1216_v16  ;;  %v1217_v17 = vadd.f32 0.5, %v1215_v14  ;;  %v577_v40 = vsel %vm573_vm8, 1, %v1943_v33  ;;  %v2390_v14 = vld [vmem:[%s2657_s3] ss:$0 sm:$0xff]  ;;  %vm1106_vm8 = vcmp.eq.s32.totalorder %v2333_v42, 4 }
 0xf12   :  { %1234 = vrot.lane.b32.xlu0 %v1218_v44, %s1941_s7 }
 0xf13   :  { %v1219_v15 = vsel %vm2024_vm4, %v1916_v13, %v1217_v17 }
 0xf14   :  { %1236 = vrot.lane.b32.xlu1 %v1219_v15, %s1941_s7 }
 0xf16   :  { %1224 = vrot.lane.b32.xlu0 %v1220_v18, %s1940_s1 }
 0xf18   :  { %1226 = vrot.lane.b32.xlu1 %v1221_v19, %s1940_s1 }
 0xf84   :  { %v1235_v21 = vpop.permute.xlu0 %1234 }
 0xf85   :  { %v1240_v20 = vmul.f32 %v1235_v21, %v1218_v44 }
 0xf86   :  { %v1237_v22 = vpop.permute.xlu1 %1236 }
 0xf87   :  { %v1241_v23 = vmul.f32 %v1237_v22, %v1219_v15  ;;  %1244 = vrot.lane.b32.xlu0 %v1240_v20, %s1940_s1 }
 0xf88   :  { %v1225_v24 = vpop.permute.xlu0 %1224 }
 0xf89   :  { %1246 = vrot.lane.b32.xlu1 %v1241_v23, %s1940_s1  ;;  %v1230_v27 = vmul.f32 %v1225_v24, %v1218_v44 }
 0xf8a   :  { %v1227_v25 = vpop.permute.xlu1 %1226 }
 0xf8b   :  { %v1231_v29 = vmul.f32 %v1227_v25, %v1219_v15 }
 0xff9   :  { %v1245_v28 = vpop.permute.xlu0 %1244 }
 0xffa   :  { %v2303_v30 = vadd.f32 %v1245_v28, %v1230_v27 }
 0xffb   :  { %v1247_v31 = vpop.permute.xlu1 %1246 }
 0xffc   :  { %1917 = vtanh.f32 %v2303_v30  ;;  %v2306_v32 = vadd.f32 %v1247_v31, %v1231_v29 }
 0xffe   :  { %1919 = vtanh.f32 %v2306_v32 }
0x1006   :  { %v1918_v34 = vpop.eup %1917 }
0x1007   :  { %1256 = vrot.lane.b32.xlu0 %v1918_v34, %s1941_s7 }
0x1008   :  { %v1920_v35 = vpop.eup %1919 }
0x1009   :  { %1258 = vrot.lane.b32.xlu1 %v1920_v35, %s1941_s7 }
0x1079   :  { %v1257_v46 = vpop.permute.xlu0 %1256 }
0x107a   :  { %v2340_v51 = vmul.f32 %v1257_v46, %v1218_v44  ;;  %v208_v44 = vadd.f32 %v2390_v14, %v2236_v56 }
0x107b   :  { %v1259_v52 = vpop.permute.xlu1 %1258 }
0x107c   :  { %v2343_v53 = vmul.f32 %v1259_v52, %v1219_v15  ;;  %1276 = vrot.lane.b32.xlu0 %v2340_v51, %s1940_s1  ;;  %v211_v15 = vadd.f32 %v2390_v14, %v2240_v62  ;;  %v754_v52 = vsel %vm750_vm14, 1, %v1943_v33 }
0x107e   :  { %1278 = vrot.lane.b32.xlu1 %v2343_v53, %s1940_s1 }
0x1080   :  { %401 = vperm.xlu0 %1845, %v398_v54  }
0x1082   :  { %404 = vperm.xlu1 %1846, %v399_v63  }
0x1084   :  { %412 = vrot.lane.b32.xlu0 %v397_v0, %s1942_s12 }
0x1086   :  { %410 = vrot.lane.b32.xlu1 %v396_v2, %s1942_s12 }
0x10ee   :  { %v1277_v3 = vpop.permute.xlu0 %1276 }
0x10ef   :  { %1282 = vst.msk [vmem:[#allocation3] sm:$0xff] %vm100_vm0, %v1277_v3 }
0x10f0   :  { %v1279_v4 = vpop.permute.xlu1 %1278 }
0x10f1   :  { %1283 = vst.msk [vmem:[#allocation3 + $0x8] sm:$0xff] %vm100_vm0, %v1279_v4 }
0x10f6   :  { %v1321_v5 = vld [vmem:[#allocation3] sm:$0xff] }
0x10f8   :  { %v1322_v58 = vld [vmem:[#allocation3 + $0x8] sm:$0xff] }
0x10f9   :  { %v1323_v6 = vpack.c.bf16 %v1322_v58, %v1321_v5 }
0x10fb   :  { %1828 = vmatmul.mubr.msk.bf16.vlgmr.msra.gmra.mrb[20].mxu0 %vm100_vm0, %v1323_v6 }
0x10ff   :  { %v402_v7 = vpop.permute.xlu0 %401 }
0x1100   :  { %vm406_vm9 = vcmp.eq.s32.totalorder %v402_v7, 1 }
0x1101   :  { %v405_v8 = vpop.permute.xlu1 %404 }
0x1102   :  { %vm407_vm7 = vcmp.eq.s32.totalorder %v405_v8, 1 }
0x1103   :  { %v413_v61 = vpop.permute.xlu0 %412 }
0x1104   :  { %v417_v9 = vsel %vm407_vm7, %v2054_v59, %v413_v61  ;;  %vm1107_vm7 = vcmp.eq.s32.totalorder %v2338_v50, 4 }
0x1105   :  { %v411_v10 = vpop.permute.xlu1 %410  ;;  %422 = vrot.lane.b32.xlu0 %v417_v9, %s1940_s1 }
0x1106   :  { %v416_v11 = vsel %vm406_vm9, %v2049_v57, %v411_v10 }
0x1107   :  { %420 = vrot.lane.b32.xlu1 %v416_v11, %s1940_s1 }
0x1109   :  { %582 = vperm.xlu0 %1845, %v577_v40  }
0x110b   :  { %579 = vperm.xlu1 %1846, %v576_v12  }
0x1177   :  { %v423_v13 = vpop.permute.xlu0 %422 }
0x1178   :  { %427 = vst.msk [vmem:[%s2658_s5 + $0x8] sm:$0xff] %vm100_vm0, %v423_v13 }
0x1179   :  { %v421_v59 = vpop.permute.xlu1 %420 }
0x117a   :  { %426 = vst.msk [vmem:[%s2658_s5] sm:$0xff] %vm100_vm0, %v421_v59 }
0x117f   :  { %v575_v57 = vld [vmem:[%s2658_s5 + $0x8] sm:$0xff] }
0x1180   :  { %590 = vrot.lane.b32.xlu0 %v575_v57, %s1942_s12  ;;  %v933_v57 = vsel %vm929_vm1, 1, %v1943_v33  ;;  %vm1462_vm1 = vcmp.eq.s32.totalorder %v2333_v42, 6 }
0x1181   :  { %v574_v16 = vld [vmem:[%s2658_s5] sm:$0xff] }
0x1182   :  { %588 = vrot.lane.b32.xlu1 %v574_v16, %s1942_s12  ;;  %v932_v16 = vsel %vm928_vm3, 1, %v1943_v33 }
0x1188   :  { %v583_v56 = vpop.permute.xlu0 %582 }
0x1189   :  { %vm585_vm11 = vcmp.eq.s32.totalorder %v583_v56, 1 }
0x118a   :  { %v580_v28 = vpop.permute.xlu1 %579 }
0x118b   :  { %vm584_vm12 = vcmp.eq.s32.totalorder %v580_v28, 1  ;;  %v1871_v28 = vld [vmem:[%s2655_s2] sm:$0xff]  }
0x118c   :  { %1832 = vmatpush3.bf16.msra.mxu1 %v1871_v28  ;;  %v1466_v28 = vsel %vm1462_vm1, 1, %v1943_v33 }
0x118d   :  { %1833 = vmatprep.subr.bf16.mxu1 %v1938_v1 }
0x11ce   :  { %v1377_v17 = vpop.f32.mrb[20].mxu0 }
0x11cf   :  { %v1384_v18 = vadd.f32 %v1377_v17, %v208_v44  ;;  %v1829_v19 = vpop.f32.mrb[21].mxu0 }
0x11d0   :  { %v1380_v21 = vpop.f32.mrb[22].mxu0 }
0x11d1   :  { %v1385_v20 = vadd.f32 %v1380_v21, %v211_v15  ;;  %v1830_v22 = vpop.f32.mrb[23].mxu0  ;;  %v1386_v24 = vmul.f32 0.5, %v1384_v18 }
0x11d3   :  { %v1387_v23 = vmul.f32 0.5, %v1385_v20  ;;  %v1388_v27 = vsel %vm2024_vm4, %v1384_v18, %v1386_v24 }
0x11d5   :  { %v1389_v25 = vsel %vm2024_vm4, %v1385_v20, %v1387_v23 }
0x11d6   :  { %1921 = vtanh.f32 %v1389_v25 }
0x11d7   :  { %1923 = vtanh.f32 %v1388_v27 }
0x11e0   :  { %v1922_v31 = vpop.eup %1921 }
0x11e1   :  { %v1924_v36 = vpop.eup %1923  ;;  %v1393_v38 = vmul.f32 0.5, %v1922_v31 }
0x11e2   :  { %v1392_v46 = vmul.f32 0.5, %v1924_v36 }
0x11e4   :  { %v1394_v54 = vadd.f32 0.5, %v1392_v46 }
0x11f2   :  { %v591_v29 = vpop.permute.xlu0 %590 }
0x11f3   :  { %v595_v62 = vsel %vm585_vm11, %v2105_v49, %v591_v29  ;;  %v755_v49 = vsel %vm751_vm13, 1, %v1943_v33 }
0x11f4   :  { %v589_v34 = vpop.permute.xlu1 %588  ;;  %600 = vrot.lane.b32.xlu0 %v595_v62, %s1940_s1  ;;  %v1872_v62 = vld [vmem:[%s2655_s2 + $0x8] sm:$0xff]  }
0x11f5   :  { %v594_v35 = vsel %vm584_vm12, %v2103_v47, %v589_v34  ;;  %v1395_v47 = vadd.f32 0.5, %v1393_v38  ;;  %1834 = vmatpush3.bf16.msra.mxu1 %v1872_v62  ;;  %vm1284_vm12 = vcmp.eq.s32.totalorder %v2333_v42, 5 }
0x11f6   :  { %598 = vrot.lane.b32.xlu1 %v594_v35, %s1940_s1 }
0x11f7   :  { %v2414_v63 = vsel %vm2024_vm4, %v1922_v31, %v1395_v47 }
0x11f8   :  { %1268 = vrot.lane.b32.xlu0 %v2306_v32, %s1942_s12  ;;  %v2420_v32 = vsel %vm2024_vm4, %v1924_v36, %v1394_v54 }
0x11fa   :  { %1266 = vrot.lane.b32.xlu1 %v2303_v30, %s1942_s12 }
0x11fc   :  { %760 = vperm.xlu0 %1845, %v755_v49  }
0x11fe   :  { %757 = vperm.xlu1 %1846, %v754_v52  }
0x1200   :  { %1414 = vrot.lane.b32.xlu0 %v2414_v63, %s1941_s7 }
0x1202   :  { %1412 = vrot.lane.b32.xlu1 %v2420_v32, %s1941_s7 }
0x1266   :  { %v601_v30 = vpop.permute.xlu0 %600 }
0x1267   :  { %605 = vst.msk [vmem:[%s2658_s5 + $0x8] sm:$0xff] %vm100_vm0, %v601_v30 }
0x1268   :  { %v599_v0 = vpop.permute.xlu1 %598 }
0x1269   :  { %604 = vst.msk [vmem:[%s2658_s5] sm:$0xff] %vm100_vm0, %v599_v0 }
0x126a   :  { %v1269_v2 = vpop.permute.xlu0 %1268 }
0x126b   :  { %1273 = vst.msk [vmem:[#allocation4 + $0x8] sm:$0xff] %vm100_vm0, %v1269_v2 }
0x126c   :  { %v1267_v3 = vpop.permute.xlu1 %1266 }
0x126d   :  { %1272 = vst.msk [vmem:[#allocation4] sm:$0xff] %vm100_vm0, %v1267_v3 }
0x126e   :  { %v753_v4 = vld [vmem:[%s2658_s5 + $0x8] sm:$0xff] }
0x126f   :  { %768 = vrot.lane.b32.xlu0 %v753_v4, %s1942_s12 }
0x1270   :  { %v752_v5 = vld [vmem:[%s2658_s5] sm:$0xff] }
0x1271   :  { %766 = vrot.lane.b32.xlu1 %v752_v5, %s1942_s12 }
0x1272   :  { %v1399_v58 = vld [vmem:[#allocation4 + $0x8] sm:$0xff] }
0x1273   :  { %1404 = vrot.lane.b32.xlu0 %v1399_v58, %s1940_s1 }
0x1274   :  { %v1398_v6 = vld [vmem:[#allocation4] sm:$0xff] }
0x1275   :  { %1402 = vrot.lane.b32.xlu1 %v1398_v6, %s1940_s1 }
0x127b   :  { %v761_v7 = vpop.permute.xlu0 %760 }
0x127c   :  { %vm763_vm15 = vcmp.eq.s32.totalorder %v761_v7, 1 }
0x127d   :  { %v758_v8 = vpop.permute.xlu1 %757 }
0x127e   :  { %vm762_vm2 = vcmp.eq.s32.totalorder %v758_v8, 1 }
0x127f   :  { %v1415_v61 = vpop.permute.xlu0 %1414 }
0x1280   :  { %v1419_v9 = vmul.f32 %v1415_v61, %v2414_v63  ;;  %v1289_v61 = vsel %vm1285_vm10, 1, %v1943_v33 }
0x1281   :  { %v1413_v10 = vpop.permute.xlu1 %1412 }
0x1282   :  { %v1418_v11 = vmul.f32 %v1413_v10, %v2420_v32  ;;  %1424 = vrot.lane.b32.xlu0 %v1419_v9, %s1940_s1  ;;  %v1288_v9 = vsel %vm1284_vm12, 1, %v1943_v33  ;;  %v216_v10 = vadd.f32 %v2390_v14, %v2234_v55 }
0x1284   :  { %1422 = vrot.lane.b32.xlu1 %v1418_v11, %s1940_s1  ;;  %v219_v11 = vadd.f32 %v2390_v14, %v2238_v60 }
0x12e1   :  { %v769_v40 = vpop.permute.xlu0 %768 }
0x12e2   :  { %v773_v12 = vsel %vm763_vm15, %v2152_v43, %v769_v40  ;;  %vm1463_vm15 = vcmp.eq.s32.totalorder %v2338_v50, 6 }
0x12e3   :  { %v767_v13 = vpop.permute.xlu1 %766  ;;  %778 = vrot.lane.b32.xlu0 %v773_v12, %s1940_s1 }
0x12e4   :  { %v772_v59 = vsel %vm762_vm2, %v2150_v41, %v767_v13  ;;  %vm1641_vm2 = vcmp.eq.s32.totalorder %v2338_v50, 7 }
0x12e5   :  { %776 = vrot.lane.b32.xlu1 %v772_v59, %s1940_s1  ;;  %v1405_v44 = vpop.permute.xlu0 %1404 }
0x12e6   :  { %v1409_v43 = vmul.f32 %v1405_v44, %v2414_v63 }
0x12e7   :  { %938 = vperm.xlu0 %1845, %v933_v57   ;;  %v1403_v17 = vpop.permute.xlu1 %1402 }
0x12e8   :  { %v1408_v19 = vmul.f32 %v1403_v17, %v2420_v32 }
0x12e9   :  { %935 = vperm.xlu1 %1846, %v932_v16  }
0x12f4   :  { %v1425_v15 = vpop.permute.xlu0 %1424 }
0x12f5   :  { %v2458_v21 = vadd.f32 %v1425_v15, %v1409_v43 }
0x12f6   :  { %v1423_v18 = vpop.permute.xlu1 %1422 }
0x12f7   :  { %v2460_v20 = vadd.f32 %v1423_v18, %v1408_v19  ;;  %1925 = vtanh.f32 %v2458_v21 }
0x12f9   :  { %1927 = vtanh.f32 %v2460_v20 }
0x1301   :  { %v1926_v25 = vpop.eup %1925 }
0x1303   :  { %v1928_v27 = vpop.eup %1927 }
0x1355   :  { %v779_v41 = vpop.permute.xlu0 %778 }
0x1356   :  { %783 = vst.msk [vmem:[%s2658_s5 + $0x8] sm:$0xff] %vm100_vm0, %v779_v41 }
0x1357   :  { %v777_v22 = vpop.permute.xlu1 %776 }
0x1358   :  { %782 = vst.msk [vmem:[%s2658_s5] sm:$0xff] %vm100_vm0, %v777_v22 }
0x135d   :  { %v931_v23 = vld [vmem:[%s2658_s5 + $0x8] sm:$0xff] }
0x135e   :  { %946 = vrot.lane.b32.xlu0 %v931_v23, %s1942_s12 }
0x135f   :  { %v930_v24 = vld [vmem:[%s2658_s5] sm:$0xff] }
0x1360   :  { %944 = vrot.lane.b32.xlu1 %v930_v24, %s1942_s12 }
0x1362   :  { %1436 = vrot.lane.b32.xlu0 %v1926_v25, %s1941_s7 }
0x1364   :  { %1434 = vrot.lane.b32.xlu1 %v1928_v27, %s1941_s7 }
0x1366   :  { %v939_v56 = vpop.permute.xlu0 %938 }
0x1367   :  { %vm941_vm5 = vcmp.eq.s32.totalorder %v939_v56, 1 }
0x1368   :  { %v936_v29 = vpop.permute.xlu1 %935 }
0x1369   :  { %vm940_vm6 = vcmp.eq.s32.totalorder %v936_v29, 1 }
0x13d0   :  { %v947_v31 = vpop.permute.xlu0 %946 }
0x13d1   :  { %v951_v34 = vsel %vm941_vm5, %v2215_v39, %v947_v31  ;;  %v1110_v39 = vsel %vm1106_vm8, 1, %v1943_v33  ;;  %vm1640_vm5 = vcmp.eq.s32.totalorder %v2333_v42, 7 }
0x13d2   :  { %v945_v35 = vpop.permute.xlu1 %944  ;;  %956 = vrot.lane.b32.xlu0 %v951_v34, %s1940_s1 }
0x13d3   :  { %v950_v36 = vsel %vm940_vm6, %v2213_v37, %v945_v35  ;;  %v1111_v37 = vsel %vm1107_vm7, 1, %v1943_v33 }
0x13d4   :  { %954 = vrot.lane.b32.xlu1 %v950_v36, %s1940_s1  ;;  %v1437_v38 = vpop.permute.xlu0 %1436 }
0x13d5   :  { %v2494_v49 = vmul.f32 %v1437_v38, %v2414_v63 }
0x13d6   :  { %v1435_v46 = vpop.permute.xlu1 %1434 }
0x13d7   :  { %v2498_v1 = vmul.f32 %v1435_v46, %v2420_v32  ;;  %1456 = vrot.lane.b32.xlu0 %v2494_v49, %s1940_s1 }
0x13d9   :  { %1454 = vrot.lane.b32.xlu1 %v2498_v1, %s1940_s1 }
0x13db   :  { %1116 = vperm.xlu0 %1845, %v1111_v37  }
0x13dd   :  { %1113 = vperm.xlu1 %1846, %v1110_v39  }
0x1444   :  { %v957_v52 = vpop.permute.xlu0 %956 }
0x1445   :  { %961 = vst.msk [vmem:[%s2658_s5 + $0x8] sm:$0xff] %vm100_vm0, %v957_v52 }
0x1446   :  { %v955_v47 = vpop.permute.xlu1 %954 }
0x1447   :  { %960 = vst.msk [vmem:[%s2658_s5] sm:$0xff] %vm100_vm0, %v955_v47 }
0x1449   :  { %v1457_v54 = vpop.permute.xlu0 %1456 }
0x144a   :  { %1461 = vst.msk [vmem:[#allocation3 + $0x8] sm:$0xff] %vm100_vm0, %v1457_v54 }
0x144b   :  { %v1455_v63 = vpop.permute.xlu1 %1454 }
0x144c   :  { %1460 = vst.msk [vmem:[#allocation3] sm:$0xff] %vm100_vm0, %v1455_v63  ;;  %v1109_v32 = vld [vmem:[%s2658_s5 + $0x8] sm:$0xff] }
0x144d   :  { %1124 = vrot.lane.b32.xlu0 %v1109_v32, %s1942_s12 }
0x144e   :  { %v1108_v30 = vld [vmem:[%s2658_s5] sm:$0xff] }
0x144f   :  { %1122 = vrot.lane.b32.xlu1 %v1108_v30, %s1942_s12 }
0x1451   :  { %v1500_v2 = vld [vmem:[#allocation3 + $0x8] sm:$0xff] }
0x1453   :  { %v1499_v0 = vld [vmem:[#allocation3] sm:$0xff] }
0x1454   :  { %v1501_v3 = vpack.c.bf16 %v1500_v2, %v1499_v0 }
0x1456   :  { %1836 = vmatmul.mubr.msk.bf16.vlgmr.msra.gmra.mrb[20].mxu1 %vm100_vm0, %v1501_v3  ;;  %v1645_v3 = vsel %vm1641_vm2, 1, %v1943_v33 }
0x145a   :  { %v1117_v4 = vpop.permute.xlu0 %1116 }
0x145b   :  { %vm1119_vm9 = vcmp.eq.s32.totalorder %v1117_v4, 1  ;;  %v1644_v4 = vsel %vm1640_vm5, 1, %v1943_v33 }
0x145c   :  { %v1114_v5 = vpop.permute.xlu1 %1113 }
0x145d   :  { %vm1118_vm11 = vcmp.eq.s32.totalorder %v1114_v5, 1 }
0x14bf   :  { %v1125_v58 = vpop.permute.xlu0 %1124 }
0x14c0   :  { %v1129_v6 = vsel %vm1119_vm9, %v2270_v48, %v1125_v58 }
0x14c1   :  { %v1123_v7 = vpop.permute.xlu1 %1122  ;;  %1134 = vrot.lane.b32.xlu0 %v1129_v6, %s1940_s1 }
0x14c2   :  { %v1128_v8 = vsel %vm1118_vm11, %v2268_v45, %v1123_v7 }
0x14c3   :  { %1132 = vrot.lane.b32.xlu1 %v1128_v8, %s1940_s1 }
0x14c5   :  { %1294 = vperm.xlu0 %1845, %v1289_v61  }
0x14c7   :  { %1291 = vperm.xlu1 %1846, %v1288_v9  }
0x1529   :  { %v1555_v48 = vpop.f32.mrb[20].mxu1 }
0x152a   :  { %v1562_v40 = vadd.f32 %v1555_v48, %v216_v10  ;;  %v1837_v12 = vpop.f32.mrb[21].mxu1 }
0x152b   :  { %v1558_v13 = vpop.f32.mrb[22].mxu1 }
0x152c   :  { %v1563_v59 = vadd.f32 %v1558_v13, %v219_v11  ;;  %v1838_v45 = vpop.f32.mrb[23].mxu1  ;;  %v1564_v44 = vmul.f32 0.5, %v1562_v40 }
0x152e   :  { %v1565_v14 = vmul.f32 0.5, %v1563_v59  ;;  %v1566_v15 = vsel %vm2024_vm4, %v1562_v40, %v1564_v44 }
0x1530   :  { %v1567_v17 = vsel %vm2024_vm4, %v1563_v59, %v1565_v14 }
0x1531   :  { %1929 = vtanh.f32 %v1567_v17 }
0x1532   :  { %1931 = vtanh.f32 %v1566_v15 }
0x1533   :  { %v1135_v57 = vpop.permute.xlu0 %1134 }
0x1534   :  { %1139 = vst.msk [vmem:[%s2658_s5 + $0x8] sm:$0xff] %vm100_vm0, %v1135_v57 }
0x1535   :  { %v1133_v16 = vpop.permute.xlu1 %1132 }
0x1536   :  { %1138 = vst.msk [vmem:[%s2658_s5] sm:$0xff] %vm100_vm0, %v1133_v16 }
0x153b   :  { %v1287_v55 = vld [vmem:[%s2658_s5 + $0x8] sm:$0xff]  ;;  %v1930_v22 = vpop.eup %1929 }
0x153c   :  { %1302 = vrot.lane.b32.xlu0 %v1287_v55, %s1942_s12  ;;  %v1932_v25 = vpop.eup %1931  ;;  %v1571_v27 = vmul.f32 0.5, %v1930_v22 }
0x153d   :  { %v1286_v60 = vld [vmem:[%s2658_s5] sm:$0xff]  ;;  %v1570_v56 = vmul.f32 0.5, %v1932_v25 }
0x153e   :  { %1300 = vrot.lane.b32.xlu1 %v1286_v60, %s1942_s12 }
0x153f   :  { %v1572_v29 = vadd.f32 0.5, %v1570_v56 }
0x1544   :  { %v1295_v43 = vpop.permute.xlu0 %1294 }
0x1545   :  { %vm1297_vm13 = vcmp.eq.s32.totalorder %v1295_v43, 1 }
0x1546   :  { %v1292_v18 = vpop.permute.xlu1 %1291 }
0x1547   :  { %vm1296_vm14 = vcmp.eq.s32.totalorder %v1292_v18, 1 }
0x15ae   :  { %v1303_v19 = vpop.permute.xlu0 %1302 }
0x15af   :  { %v1307_v41 = vsel %vm1297_vm13, %v2343_v53, %v1303_v19  ;;  %v1467_v53 = vsel %vm1463_vm15, 1, %v1943_v33 }
0x15b0   :  { %v1301_v23 = vpop.permute.xlu1 %1300  ;;  %1312 = vrot.lane.b32.xlu0 %v1307_v41, %s1940_s1 }
0x15b1   :  { %v1306_v24 = vsel %vm1296_vm14, %v2340_v51, %v1301_v23  ;;  %v1573_v51 = vadd.f32 0.5, %v1571_v27 }
0x15b2   :  { %1310 = vrot.lane.b32.xlu1 %v1306_v24, %s1940_s1 }
0x15b3   :  { %v2572_v62 = vsel %vm2024_vm4, %v1930_v22, %v1573_v51 }
0x15b4   :  { %1446 = vrot.lane.b32.xlu0 %v2458_v21, %s1942_s12  ;;  %v2578_v21 = vsel %vm2024_vm4, %v1932_v25, %v1572_v29 }
0x15b6   :  { %1444 = vrot.lane.b32.xlu1 %v2460_v20, %s1942_s12 }
0x15b8   :  { %1472 = vperm.xlu0 %1845, %v1467_v53  }
0x15ba   :  { %1469 = vperm.xlu1 %1846, %v1466_v28  }
0x15bc   :  { %1592 = vrot.lane.b32.xlu0 %v2572_v62, %s1941_s7 }
0x15be   :  { %1590 = vrot.lane.b32.xlu1 %v2578_v21, %s1941_s7 }
0x1622   :  { %v1313_v20 = vpop.permute.xlu0 %1312 }
0x1623   :  { %1317 = vst.msk [vmem:[%s2658_s5 + $0x8] sm:$0xff] %vm100_vm0, %v1313_v20 }
0x1624   :  { %v1311_v31 = vpop.permute.xlu1 %1310 }
0x1625   :  { %1316 = vst.msk [vmem:[%s2658_s5] sm:$0xff] %vm100_vm0, %v1311_v31 }
0x1626   :  { %v1447_v34 = vpop.permute.xlu0 %1446 }
0x1627   :  { %1451 = vst.msk [vmem:[#allocation4 + $0x8] sm:$0xff] %vm100_vm0, %v1447_v34 }
0x1628   :  { %v1445_v26 = vpop.permute.xlu1 %1444 }
0x1629   :  { %1450 = vst.msk [vmem:[#allocation4] sm:$0xff] %vm100_vm0, %v1445_v26 }
0x162a   :  { %v1465_v35 = vld [vmem:[%s2658_s5 + $0x8] sm:$0xff] }
0x162b   :  { %1480 = vrot.lane.b32.xlu0 %v1465_v35, %s1942_s12 }
0x162c   :  { %v1464_v36 = vld [vmem:[%s2658_s5] sm:$0xff] }
0x162d   :  { %1478 = vrot.lane.b32.xlu1 %v1464_v36, %s1942_s12 }
0x162e   :  { %v1577_v38 = vld [vmem:[#allocation4 + $0x8] sm:$0xff] }
0x162f   :  { %1582 = vrot.lane.b32.xlu0 %v1577_v38, %s1940_s1 }
0x1630   :  { %v1576_v46 = vld [vmem:[#allocation4] sm:$0xff] }
0x1631   :  { %1580 = vrot.lane.b32.xlu1 %v1576_v46, %s1940_s1 }
0x1637   :  { %v1473_v37 = vpop.permute.xlu0 %1472 }
0x1638   :  { %vm1475_vm4 = vcmp.eq.s32.totalorder %v1473_v37, 1 }
0x1639   :  { %v1470_v39 = vpop.permute.xlu1 %1469 }
0x163a   :  { %vm1474_vm3 = vcmp.eq.s32.totalorder %v1470_v39, 1 }
0x163b   :  { %v1593_v52 = vpop.permute.xlu0 %1592 }
0x163c   :  { %v1597_v47 = vmul.f32 %v1593_v52, %v2572_v62 }
0x163d   :  { %v1591_v54 = vpop.permute.xlu1 %1590 }
0x163e   :  { %v1596_v63 = vmul.f32 %v1591_v54, %v2578_v21  ;;  %1602 = vrot.lane.b32.xlu0 %v1597_v47, %s1940_s1 }
0x1640   :  { %1600 = vrot.lane.b32.xlu1 %v1596_v63, %s1940_s1 }
0x169d   :  { %v1481_v32 = vpop.permute.xlu0 %1480 }
0x169e   :  { %v1485_v30 = vsel %vm1475_vm4, %v2494_v49, %v1481_v32 }
0x169f   :  { %v1479_v0 = vpop.permute.xlu1 %1478  ;;  %1490 = vrot.lane.b32.xlu0 %v1485_v30, %s1940_s1 }
0x16a0   :  { %v1484_v2 = vsel %vm1474_vm3, %v2498_v1, %v1479_v0 }
0x16a1   :  { %1488 = vrot.lane.b32.xlu1 %v1484_v2, %s1940_s1  ;;  %v1583_v5 = vpop.permute.xlu0 %1582 }
0x16a2   :  { %v1587_v49 = vmul.f32 %v1583_v5, %v2572_v62 }
0x16a3   :  { %1650 = vperm.xlu0 %1845, %v1645_v3   ;;  %v1581_v50 = vpop.permute.xlu1 %1580 }
0x16a4   :  { %v1586_v6 = vmul.f32 %v1581_v50, %v2578_v21 }
0x16a5   :  { %1647 = vperm.xlu1 %1846, %v1644_v4  }
0x16b0   :  { %v1603_v58 = vpop.permute.xlu0 %1602 }
0x16b1   :  { %v1607_v7 = vadd.f32 %v1603_v58, %v1587_v49 }
0x16b2   :  { %v1601_v8 = vpop.permute.xlu1 %1600 }
0x16b3   :  { %1933 = vtanh.f32 %v1607_v7  ;;  %v1606_v42 = vadd.f32 %v1601_v8, %v1586_v6 }
0x16b5   :  { %1935 = vtanh.f32 %v1606_v42 }
0x16bd   :  { %v1934_v1 = vpop.eup %1933 }
0x16be   :  { %1614 = vrot.lane.b32.xlu0 %v1934_v1, %s1941_s7 }
0x16bf   :  { %v1936_v61 = vpop.eup %1935 }
0x16c0   :  { %1612 = vrot.lane.b32.xlu1 %v1936_v61, %s1941_s7 }
0x1711   :  { %v1491_v33 = vpop.permute.xlu0 %1490 }
0x1712   :  { %1495 = vst.msk [vmem:[%s2658_s5 + $0x8] sm:$0xff] %vm100_vm0, %v1491_v33 }
0x1713   :  { %v1489_v9 = vpop.permute.xlu1 %1488 }
0x1714   :  { %1494 = vst.msk [vmem:[%s2658_s5] sm:$0xff] %vm100_vm0, %v1489_v9 }
0x1719   :  { %v1643_v10 = vld [vmem:[%s2658_s5 + $0x8] sm:$0xff] }
0x171a   :  { %1658 = vrot.lane.b32.xlu0 %v1643_v10, %s1942_s12 }
0x171b   :  { %v1642_v48 = vld [vmem:[%s2658_s5] sm:$0xff] }
0x171c   :  { %1656 = vrot.lane.b32.xlu1 %v1642_v48, %s1942_s12 }
0x171e   :  { %1624 = vrot.lane.b32.xlu0 %v1607_v7, %s1942_s12 }
0x1720   :  { %1622 = vrot.lane.b32.xlu1 %v1606_v42, %s1942_s12 }
0x1722   :  { %v1651_v11 = vpop.permute.xlu0 %1650 }
0x1723   :  { %vm1653_vm6 = vcmp.eq.s32.totalorder %v1651_v11, 1 }
0x1724   :  { %v1648_v40 = vpop.permute.xlu1 %1647 }
0x1725   :  { %vm1652_vm7 = vcmp.eq.s32.totalorder %v1648_v40, 1 }
0x1730   :  { %v1615_v12 = vpop.permute.xlu0 %1614 }
0x1731   :  { %v1619_v13 = vmul.f32 %v1615_v12, %v2572_v62 }
0x1732   :  { %v1613_v59 = vpop.permute.xlu1 %1612 }
0x1733   :  { %v1618_v45 = vmul.f32 %v1613_v59, %v2578_v21  ;;  %1634 = vrot.lane.b32.xlu0 %v1619_v13, %s1940_s1 }
0x1735   :  { %1632 = vrot.lane.b32.xlu1 %v1618_v45, %s1940_s1 }
0x178c   :  { %v1659_v57 = vpop.permute.xlu0 %1658 }
0x178d   :  { %v1663_v16 = vsel %vm1653_vm6, %v1619_v13, %v1659_v57 }
0x178e   :  { %v1657_v55 = vpop.permute.xlu1 %1656  ;;  %1668 = vrot.lane.b32.xlu0 %v1663_v16, %s1940_s1 }
0x178f   :  { %v1662_v60 = vsel %vm1652_vm7, %v1618_v45, %v1657_v55 }
0x1790   :  { %1666 = vrot.lane.b32.xlu1 %v1662_v60, %s1940_s1  ;;  %v1625_v14 = vpop.permute.xlu0 %1624 }
0x1791   :  { %1629 = vst.msk [vmem:[#allocation4 + $0x8] sm:$0xff] %vm100_vm0, %v1625_v14 }
0x1792   :  { %v1623_v44 = vpop.permute.xlu1 %1622 }
0x1793   :  { %1628 = vst.msk [vmem:[#allocation4] sm:$0xff] %vm100_vm0, %v1623_v44 }
0x17a5   :  { %v1635_v17 = vpop.permute.xlu0 %1634 }
0x17a6   :  { %1639 = vst.msk [vmem:[#allocation3 + $0x8] sm:$0xff] %vm100_vm0, %v1635_v17 }
0x17a7   :  { %v1633_v15 = vpop.permute.xlu1 %1632 }
0x17a8   :  { %1638 = vst.msk [vmem:[#allocation3] sm:$0xff] %vm100_vm0, %v1633_v15 }
0x1800   :  { %v1669_v43 = vpop.permute.xlu0 %1668 }
0x1801   :  { %1673 = vst.msk [vmem:[%s2658_s5 + $0x8] sm:$0xff] %vm100_vm0, %v1669_v43 }
0x1802   :  { %v1667_v18 = vpop.permute.xlu1 %1666 }
0x1803   :  { %1672 = vst.msk [vmem:[%s2658_s5] sm:$0xff] %vm100_vm0, %v1667_v18 }

</bundles_post_ra>
